<compile_context>
chip_gen: v6e
topology: v6e:2x2x1
jax: 0.10.0
libtpu: 0.0.40
codegen_flags: <defaults>
</compile_context>

<pallas_src>
import math

import jax
import jax.numpy as jnp
from jax.experimental import pallas as pl
from jax.experimental.pallas import tpu as pltpu

# ---- "setting" (small, consistent with the module) -------------------------
B, S, D = 2, 8, 32          # batch, seq_len, word_size
N = B * S                   # folded (batch, seq) rows -> sublane-dense
H = 4                       # word_head_num
DH = D // H                 # per-head dim
FF = 2048                   # nn.TransformerEncoderLayer default dim_feedforward
N_LAYERS = 2                # word_layer_num
LN_EPS = 1e-5               # nn.LayerNorm default eps


def _layer_norm(x, gamma, beta):
    mu = jnp.mean(x, axis=-1, keepdims=True)
    var = jnp.mean((x - mu) ** 2, axis=-1, keepdims=True)
    return (x - mu) * jax.lax.rsqrt(var + LN_EPS) * gamma + beta


def _tree_sum(xs):
    while len(xs) > 1:
        nxt = [xs[i] + xs[i + 1] for i in range(0, len(xs) - 1, 2)]
        if len(xs) % 2:
            nxt.append(xs[-1])
        xs = nxt
    return xs[0]


def com_word_kernel(x_ref,
                    wqkv_ref, bqkv_ref, wo_ref, bo_ref,
                    g1_ref, be1_ref,
                    wf1_ref, bf1_ref, wf2_ref, bf2_ref,
                    g2_ref, be2_ref,
                    hw_ref, hb_ref,
                    out_ref):
    """Full Com_Word forward: N_LAYERS post-norm encoder layers + Linear/ReLU."""
    x = x_ref[...].astype(jnp.float32)                       # (N, D)
    scale = 1.0 / math.sqrt(DH)

    for l in range(N_LAYERS):                                # static unroll
        # --- fused Q/K/V projection: one (N,D) @ (D,3D) matmul (bf16 -> f32) ---
        qkv = jnp.dot(x.astype(jnp.bfloat16), wqkv_ref[l],
                      preferred_element_type=jnp.float32) + bqkv_ref[l]   # (N,3D)
        q3 = qkv[:, 0 * D:1 * D].reshape(B, S, D)
        k3 = qkv[:, 1 * D:2 * D].reshape(B, S, D)
        v3 = qkv[:, 2 * D:3 * D].reshape(B, S, D)

        # --- multi-head attention (softmax in f32) ---
        wo_t = wo_ref[l]                                     # (D, D) = Wo^T, bf16
        proj = []
        for h in range(H):                                   # static head loop
            sl = slice(h * DH, (h + 1) * DH)
            qh, kh, vh = q3[:, :, sl], k3[:, :, sl], v3[:, :, sl]
            s = jnp.einsum('bqd,bkd->bqk', qh, kh,
                           preferred_element_type=jnp.float32) * scale
            s = s - jnp.max(s, axis=-1, keepdims=True)
            p = jnp.exp(s)
            p = p / jnp.sum(p, axis=-1, keepdims=True)
            oh = jnp.einsum('bqk,bkd->bqd', p, vh,
                            preferred_element_type=jnp.float32)           # (B,S,DH)
            # concat_h(o_h) @ Wo^T  ==  sum_h o_h @ Wo^T[h*DH:(h+1)*DH, :]
            proj.append(jnp.dot(oh.reshape(N, DH).astype(jnp.bfloat16),
                                wo_t[sl, :],
                                preferred_element_type=jnp.float32))
        attn = _tree_sum(proj) + bo_ref[l]                   # (N, D)

        # residual + LayerNorm1 (attention dropout = identity in eval mode)
        x1 = _layer_norm(x + attn, g1_ref[l], be1_ref[l])

        # --- feed-forward: linear1 -> ReLU -> linear2 (bf16 weights, f32 acc) ---
        hmid = jnp.dot(x1.astype(jnp.bfloat16), wf1_ref[l],
                       preferred_element_type=jnp.float32) + bf1_ref[l]   # (N,FF)
        hmid = jnp.maximum(hmid, 0.0)
        ff = jnp.einsum('nf,df->nd', hmid.astype(jnp.bfloat16), wf2_ref[l],
                        preferred_element_type=jnp.float32) + bf2_ref[l]  # (N,D)

        # residual + LayerNorm2
        x = _layer_norm(x1 + ff, g2_ref[l], be2_ref[l])

    # --- head: Linear(D,D) -> ReLU -> Dropout(identity, eval mode) ---
    y = jnp.dot(x.astype(jnp.bfloat16), hw_ref[...],
                preferred_element_type=jnp.float32) + hb_ref[...]
    out_ref[...] = jnp.maximum(y, 0.0).astype(out_ref.dtype)


_VMEM = pl.BlockSpec(memory_space=pltpu.MemorySpace.VMEM)


@jax.jit
def com_word_forward(word, params):
    b, s, d = word.shape
    x2d = word.reshape(b * s, d)                             # contiguous, free
    args = (x2d,
            params["wqkv"], params["bqkv"], params["wo"], params["bo"],
            params["g1"], params["be1"],
            params["wf1"], params["bf1"], params["wf2"], params["bf2"],
            params["g2"], params["be2"],
            params["head_w"], params["head_b"])
    out2d = pl.pallas_call(
        com_word_kernel,
        out_shape=jax.ShapeDtypeStruct((b * s, d), word.dtype),
        in_specs=[_VMEM] * len(args),
        out_specs=_VMEM,
        compiler_params=pltpu.CompilerParams(
            vmem_limit_bytes=32 * 1024 * 1024),
    )(*args)
    return out2d.reshape(b, s, d)


def init_params(key):
    """Weights are stored pre-transposed (kernel computes x @ W_t):
       wqkv = in_proj_weight.T (D,3D); wo = out_proj.weight.T (D,D);
       wf1 = linear1.weight.T (D,FF);  wf2 = linear2.weight (D,FF) -- both
       lane-dense; head_w = linear.weight.T (D,D).  Matmul weights in bf16,
       biases / LayerNorm params in f32."""
    def w(k, shape, scale=0.02):
        return jax.random.normal(k, shape, jnp.float32) * scale

    wqkv, bqkv, wo, bo = [], [], [], []
    g1, be1, wf1, bf1 = [], [], [], []
    wf2, bf2, g2, be2 = [], [], [], []
    for l in range(N_LAYERS):
        ks = jax.random.split(jax.random.fold_in(key, l), 8)
        wqkv.append(w(ks[0], (D, 3 * D)).astype(jnp.bfloat16))
        bqkv.append(w(ks[1], (1, 3 * D)))
        wo.append(w(ks[2], (D, D)).astype(jnp.bfloat16))
        bo.append(w(ks[3], (1, D)))
        g1.append(jnp.ones((1, D), jnp.float32))
        be1.append(jnp.zeros((1, D), jnp.float32))
        wf1.append(w(ks[4], (D, FF)).astype(jnp.bfloat16))   # lane-dense (32,2048)
        bf1.append(w(ks[5], (1, FF)))
        wf2.append(w(ks[6], (D, FF)).astype(jnp.bfloat16))   # lane-dense (32,2048)
        bf2.append(w(ks[7], (1, D)))
        g2.append(jnp.ones((1, D), jnp.float32))
        be2.append(jnp.zeros((1, D), jnp.float32))

    kh1, kh2 = jax.random.split(jax.random.fold_in(key, 999))
    stack = lambda xs: jnp.stack(xs, axis=0)
    return {
        "wqkv": stack(wqkv), "bqkv": stack(bqkv),
        "wo": stack(wo), "bo": stack(bo),
        "g1": stack(g1), "be1": stack(be1),
        "wf1": stack(wf1), "bf1": stack(bf1),
        "wf2": stack(wf2), "bf2": stack(bf2),
        "g2": stack(g2), "be2": stack(be2),
        "head_w": w(kh1, (D, D)).astype(jnp.bfloat16),
        "head_b": w(kh2, (1, D)),
    }


if __name__ == "__main__":
    key = jax.random.PRNGKey(0)
    k_in, k_par = jax.random.split(key)
    word = jax.random.normal(k_in, (B, S, D), jnp.float32)   # (batch, seq, word_size)
    params = init_params(k_par)

    out = jax.block_until_ready(com_word_forward(word, params))

    assert out.shape == (B, S, D), out.shape
    assert bool(jnp.all(jnp.isfinite(out)))
    assert bool(jnp.all(out >= 0.0))   # final ReLU
    print("KERNEL_OK")
</pallas_src>

<mosaic_0001>
module attributes {stable_mosaic.version = 11 : i64} {
  func.func @com_word_kernel(%arg0: memref<16x32xf32, #tpu.memory_space<vmem>>, %arg1: memref<2x32x96xbf16, #tpu.memory_space<vmem>>, %arg2: memref<2x1x96xf32, #tpu.memory_space<vmem>>, %arg3: memref<2x32x32xbf16, #tpu.memory_space<vmem>>, %arg4: memref<2x1x32xf32, #tpu.memory_space<vmem>>, %arg5: memref<2x1x32xf32, #tpu.memory_space<vmem>>, %arg6: memref<2x1x32xf32, #tpu.memory_space<vmem>>, %arg7: memref<2x32x2048xbf16, #tpu.memory_space<vmem>>, %arg8: memref<2x1x2048xf32, #tpu.memory_space<vmem>>, %arg9: memref<2x32x2048xbf16, #tpu.memory_space<vmem>>, %arg10: memref<2x1x32xf32, #tpu.memory_space<vmem>>, %arg11: memref<2x1x32xf32, #tpu.memory_space<vmem>>, %arg12: memref<2x1x32xf32, #tpu.memory_space<vmem>>, %arg13: memref<32x32xbf16, #tpu.memory_space<vmem>>, %arg14: memref<1x32xf32, #tpu.memory_space<vmem>>, %arg15: memref<16x32xf32, #tpu.memory_space<vmem>>) attributes {dimension_semantics = [], scalar_prefetch = 0 : i64, scratch_operands = 0 : i64, tpu.core_type = #tpu.core_type<tc>} {
    %c0 = arith.constant 0 : index
    %c0_0 = arith.constant 0 : index
    %0 = vector.load %arg0[%c0, %c0_0] : memref<16x32xf32, #tpu.memory_space<vmem>>, vector<16x32xf32>
    %1 = arith.truncf %0 : vector<16x32xf32> to vector<16x32xbf16>
    %c0_1 = arith.constant 0 : index
    %c0_2 = arith.constant 0 : index
    %c0_3 = arith.constant 0 : index
    %2 = vector.load %arg1[%c0_1, %c0_2, %c0_3] : memref<2x32x96xbf16, #tpu.memory_space<vmem>>, vector<1x32x96xbf16>
    %3 = vector.shape_cast %2 : vector<1x32x96xbf16> to vector<32x96xbf16>
    %cst = arith.constant dense<0.000000e+00> : vector<16x96xf32>
    %4 = tpu.matmul %1, %3, %cst {dimension_numbers = #tpu.dot_dimension_numbers<[1], [0], [0], [1], [0, 0, 1, 1], [], []>} : vector<16x32xbf16>, vector<32x96xbf16>, vector<16x96xf32> -> vector<16x96xf32>
    %c0_4 = arith.constant 0 : index
    %c0_5 = arith.constant 0 : index
    %c0_6 = arith.constant 0 : index
    %5 = vector.load %arg2[%c0_4, %c0_5, %c0_6] : memref<2x1x96xf32, #tpu.memory_space<vmem>>, vector<1x1x96xf32>
    %6 = vector.shape_cast %5 : vector<1x1x96xf32> to vector<1x96xf32>
    %7 = vector.broadcast %6 : vector<1x96xf32> to vector<16x96xf32>
    %8 = arith.addf %4, %7 : vector<16x96xf32>
    %9 = vector.extract_strided_slice %8 {offsets = [0, 0], sizes = [16, 32], strides = [1, 1]} : vector<16x96xf32> to vector<16x32xf32>
    %10 = vector.shape_cast %9 : vector<16x32xf32> to vector<2x8x32xf32>
    %11 = vector.extract_strided_slice %8 {offsets = [0, 32], sizes = [16, 32], strides = [1, 1]} : vector<16x96xf32> to vector<16x32xf32>
    %12 = vector.shape_cast %11 : vector<16x32xf32> to vector<2x8x32xf32>
    %13 = vector.extract_strided_slice %8 {offsets = [0, 64], sizes = [16, 32], strides = [1, 1]} : vector<16x96xf32> to vector<16x32xf32>
    %14 = vector.shape_cast %13 : vector<16x32xf32> to vector<2x8x32xf32>
    %c0_7 = arith.constant 0 : index
    %c0_8 = arith.constant 0 : index
    %c0_9 = arith.constant 0 : index
    %15 = vector.load %arg3[%c0_7, %c0_8, %c0_9] : memref<2x32x32xbf16, #tpu.memory_space<vmem>>, vector<1x32x32xbf16>
    %16 = vector.shape_cast %15 : vector<1x32x32xbf16> to vector<32x32xbf16>
    %17 = vector.extract_strided_slice %10 {offsets = [0, 0, 0], sizes = [2, 8, 8], strides = [1, 1, 1]} : vector<2x8x32xf32> to vector<2x8x8xf32>
    %18 = vector.extract_strided_slice %12 {offsets = [0, 0, 0], sizes = [2, 8, 8], strides = [1, 1, 1]} : vector<2x8x32xf32> to vector<2x8x8xf32>
    %19 = vector.extract_strided_slice %14 {offsets = [0, 0, 0], sizes = [2, 8, 8], strides = [1, 1, 1]} : vector<2x8x32xf32> to vector<2x8x8xf32>
    "tpu.trace_start"() <{level = 10 : i32, message = "bqd,bkd->bqk"}> : () -> ()
    %cst_10 = arith.constant dense<0.000000e+00> : vector<2x8x8xf32>
    %20 = tpu.matmul %17, %18, %cst_10 {dimension_numbers = #tpu.dot_dimension_numbers<[2], [2], [1], [1], [0, 0, 0, 1, 1, 1], [0], [0]>} : vector<2x8x8xf32>, vector<2x8x8xf32>, vector<2x8x8xf32> -> vector<2x8x8xf32>
    "tpu.trace_stop"() : () -> ()
    %cst_11 = arith.constant 0.353553385 : f32
    %21 = vector.broadcast %cst_11 : f32 to vector<2x8x8xf32>
    %22 = arith.mulf %20, %21 : vector<2x8x8xf32>
    %cst_12 = arith.constant dense<0xFF800000> : vector<2x8xf32>
    %23 = vector.multi_reduction <maximumf>, %22, %cst_12 [2] : vector<2x8x8xf32> to vector<2x8xf32>
    %24 = vector.shape_cast %23 : vector<2x8xf32> to vector<2x8x1xf32>
    %25 = vector.broadcast %24 : vector<2x8x1xf32> to vector<2x8x8xf32>
    %26 = arith.subf %22, %25 : vector<2x8x8xf32>
    %27 = math.exp %26 : vector<2x8x8xf32>
    %cst_13 = arith.constant dense<0.000000e+00> : vector<2x8xf32>
    %28 = vector.multi_reduction <add>, %27, %cst_13 [2] : vector<2x8x8xf32> to vector<2x8xf32>
    %29 = vector.shape_cast %28 : vector<2x8xf32> to vector<2x8x1xf32>
    %30 = vector.broadcast %29 : vector<2x8x1xf32> to vector<2x8x8xf32>
    %31 = arith.divf %27, %30 : vector<2x8x8xf32>
    "tpu.trace_start"() <{level = 10 : i32, message = "bqk,bkd->bqd"}> : () -> ()
    %cst_14 = arith.constant dense<0.000000e+00> : vector<2x8x8xf32>
    %32 = tpu.matmul %31, %19, %cst_14 {dimension_numbers = #tpu.dot_dimension_numbers<[2], [1], [1], [2], [0, 0, 0, 1, 1, 2], [0], [0]>} : vector<2x8x8xf32>, vector<2x8x8xf32>, vector<2x8x8xf32> -> vector<2x8x8xf32>
    "tpu.trace_stop"() : () -> ()
    %33 = vector.shape_cast %32 : vector<2x8x8xf32> to vector<16x8xf32>
    %34 = arith.truncf %33 : vector<16x8xf32> to vector<16x8xbf16>
    %35 = vector.extract_strided_slice %16 {offsets = [0, 0], sizes = [8, 32], strides = [1, 1]} : vector<32x32xbf16> to vector<8x32xbf16>
    %cst_15 = arith.constant dense<0.000000e+00> : vector<16x32xf32>
    %36 = tpu.matmul %34, %35, %cst_15 {dimension_numbers = #tpu.dot_dimension_numbers<[1], [0], [0], [1], [0, 0, 1, 1], [], []>} : vector<16x8xbf16>, vector<8x32xbf16>, vector<16x32xf32> -> vector<16x32xf32>
    %37 = vector.extract_strided_slice %10 {offsets = [0, 0, 8], sizes = [2, 8, 8], strides = [1, 1, 1]} : vector<2x8x32xf32> to vector<2x8x8xf32>
    %38 = vector.extract_strided_slice %12 {offsets = [0, 0, 8], sizes = [2, 8, 8], strides = [1, 1, 1]} : vector<2x8x32xf32> to vector<2x8x8xf32>
    %39 = vector.extract_strided_slice %14 {offsets = [0, 0, 8], sizes = [2, 8, 8], strides = [1, 1, 1]} : vector<2x8x32xf32> to vector<2x8x8xf32>
    "tpu.trace_start"() <{level = 10 : i32, message = "bqd,bkd->bqk"}> : () -> ()
    %cst_16 = arith.constant dense<0.000000e+00> : vector<2x8x8xf32>
    %40 = tpu.matmul %37, %38, %cst_16 {dimension_numbers = #tpu.dot_dimension_numbers<[2], [2], [1], [1], [0, 0, 0, 1, 1, 1], [0], [0]>} : vector<2x8x8xf32>, vector<2x8x8xf32>, vector<2x8x8xf32> -> vector<2x8x8xf32>
    "tpu.trace_stop"() : () -> ()
    %cst_17 = arith.constant 0.353553385 : f32
    %41 = vector.broadcast %cst_17 : f32 to vector<2x8x8xf32>
    %42 = arith.mulf %40, %41 : vector<2x8x8xf32>
    %cst_18 = arith.constant dense<0xFF800000> : vector<2x8xf32>
    %43 = vector.multi_reduction <maximumf>, %42, %cst_18 [2] : vector<2x8x8xf32> to vector<2x8xf32>
    %44 = vector.shape_cast %43 : vector<2x8xf32> to vector<2x8x1xf32>
    %45 = vector.broadcast %44 : vector<2x8x1xf32> to vector<2x8x8xf32>
    %46 = arith.subf %42, %45 : vector<2x8x8xf32>
    %47 = math.exp %46 : vector<2x8x8xf32>
    %cst_19 = arith.constant dense<0.000000e+00> : vector<2x8xf32>
    %48 = vector.multi_reduction <add>, %47, %cst_19 [2] : vector<2x8x8xf32> to vector<2x8xf32>
    %49 = vector.shape_cast %48 : vector<2x8xf32> to vector<2x8x1xf32>
    %50 = vector.broadcast %49 : vector<2x8x1xf32> to vector<2x8x8xf32>
    %51 = arith.divf %47, %50 : vector<2x8x8xf32>
    "tpu.trace_start"() <{level = 10 : i32, message = "bqk,bkd->bqd"}> : () -> ()
    %cst_20 = arith.constant dense<0.000000e+00> : vector<2x8x8xf32>
    %52 = tpu.matmul %51, %39, %cst_20 {dimension_numbers = #tpu.dot_dimension_numbers<[2], [1], [1], [2], [0, 0, 0, 1, 1, 2], [0], [0]>} : vector<2x8x8xf32>, vector<2x8x8xf32>, vector<2x8x8xf32> -> vector<2x8x8xf32>
    "tpu.trace_stop"() : () -> ()
    %53 = vector.shape_cast %52 : vector<2x8x8xf32> to vector<16x8xf32>
    %54 = arith.truncf %53 : vector<16x8xf32> to vector<16x8xbf16>
    %55 = vector.extract_strided_slice %16 {offsets = [8, 0], sizes = [8, 32], strides = [1, 1]} : vector<32x32xbf16> to vector<8x32xbf16>
    %cst_21 = arith.constant dense<0.000000e+00> : vector<16x32xf32>
    %56 = tpu.matmul %54, %55, %cst_21 {dimension_numbers = #tpu.dot_dimension_numbers<[1], [0], [0], [1], [0, 0, 1, 1], [], []>} : vector<16x8xbf16>, vector<8x32xbf16>, vector<16x32xf32> -> vector<16x32xf32>
    %57 = vector.extract_strided_slice %10 {offsets = [0, 0, 16], sizes = [2, 8, 8], strides = [1, 1, 1]} : vector<2x8x32xf32> to vector<2x8x8xf32>
    %58 = vector.extract_strided_slice %12 {offsets = [0, 0, 16], sizes = [2, 8, 8], strides = [1, 1, 1]} : vector<2x8x32xf32> to vector<2x8x8xf32>
    %59 = vector.extract_strided_slice %14 {offsets = [0, 0, 16], sizes = [2, 8, 8], strides = [1, 1, 1]} : vector<2x8x32xf32> to vector<2x8x8xf32>
    "tpu.trace_start"() <{level = 10 : i32, message = "bqd,bkd->bqk"}> : () -> ()
    %cst_22 = arith.constant dense<0.000000e+00> : vector<2x8x8xf32>
    %60 = tpu.matmul %57, %58, %cst_22 {dimension_numbers = #tpu.dot_dimension_numbers<[2], [2], [1], [1], [0, 0, 0, 1, 1, 1], [0], [0]>} : vector<2x8x8xf32>, vector<2x8x8xf32>, vector<2x8x8xf32> -> vector<2x8x8xf32>
    "tpu.trace_stop"() : () -> ()
    %cst_23 = arith.constant 0.353553385 : f32
    %61 = vector.broadcast %cst_23 : f32 to vector<2x8x8xf32>
    %62 = arith.mulf %60, %61 : vector<2x8x8xf32>
    %cst_24 = arith.constant dense<0xFF800000> : vector<2x8xf32>
    %63 = vector.multi_reduction <maximumf>, %62, %cst_24 [2] : vector<2x8x8xf32> to vector<2x8xf32>
    %64 = vector.shape_cast %63 : vector<2x8xf32> to vector<2x8x1xf32>
    %65 = vector.broadcast %64 : vector<2x8x1xf32> to vector<2x8x8xf32>
    %66 = arith.subf %62, %65 : vector<2x8x8xf32>
    %67 = math.exp %66 : vector<2x8x8xf32>
    %cst_25 = arith.constant dense<0.000000e+00> : vector<2x8xf32>
    %68 = vector.multi_reduction <add>, %67, %cst_25 [2] : vector<2x8x8xf32> to vector<2x8xf32>
    %69 = vector.shape_cast %68 : vector<2x8xf32> to vector<2x8x1xf32>
    %70 = vector.broadcast %69 : vector<2x8x1xf32> to vector<2x8x8xf32>
    %71 = arith.divf %67, %70 : vector<2x8x8xf32>
    "tpu.trace_start"() <{level = 10 : i32, message = "bqk,bkd->bqd"}> : () -> ()
    %cst_26 = arith.constant dense<0.000000e+00> : vector<2x8x8xf32>
    %72 = tpu.matmul %71, %59, %cst_26 {dimension_numbers = #tpu.dot_dimension_numbers<[2], [1], [1], [2], [0, 0, 0, 1, 1, 2], [0], [0]>} : vector<2x8x8xf32>, vector<2x8x8xf32>, vector<2x8x8xf32> -> vector<2x8x8xf32>
    "tpu.trace_stop"() : () -> ()
    %73 = vector.shape_cast %72 : vector<2x8x8xf32> to vector<16x8xf32>
    %74 = arith.truncf %73 : vector<16x8xf32> to vector<16x8xbf16>
    %75 = vector.extract_strided_slice %16 {offsets = [16, 0], sizes = [8, 32], strides = [1, 1]} : vector<32x32xbf16> to vector<8x32xbf16>
    %cst_27 = arith.constant dense<0.000000e+00> : vector<16x32xf32>
    %76 = tpu.matmul %74, %75, %cst_27 {dimension_numbers = #tpu.dot_dimension_numbers<[1], [0], [0], [1], [0, 0, 1, 1], [], []>} : vector<16x8xbf16>, vector<8x32xbf16>, vector<16x32xf32> -> vector<16x32xf32>
    %77 = vector.extract_strided_slice %10 {offsets = [0, 0, 24], sizes = [2, 8, 8], strides = [1, 1, 1]} : vector<2x8x32xf32> to vector<2x8x8xf32>
    %78 = vector.extract_strided_slice %12 {offsets = [0, 0, 24], sizes = [2, 8, 8], strides = [1, 1, 1]} : vector<2x8x32xf32> to vector<2x8x8xf32>
    %79 = vector.extract_strided_slice %14 {offsets = [0, 0, 24], sizes = [2, 8, 8], strides = [1, 1, 1]} : vector<2x8x32xf32> to vector<2x8x8xf32>
    "tpu.trace_start"() <{level = 10 : i32, message = "bqd,bkd->bqk"}> : () -> ()
    %cst_28 = arith.constant dense<0.000000e+00> : vector<2x8x8xf32>
    %80 = tpu.matmul %77, %78, %cst_28 {dimension_numbers = #tpu.dot_dimension_numbers<[2], [2], [1], [1], [0, 0, 0, 1, 1, 1], [0], [0]>} : vector<2x8x8xf32>, vector<2x8x8xf32>, vector<2x8x8xf32> -> vector<2x8x8xf32>
    "tpu.trace_stop"() : () -> ()
    %cst_29 = arith.constant 0.353553385 : f32
    %81 = vector.broadcast %cst_29 : f32 to vector<2x8x8xf32>
    %82 = arith.mulf %80, %81 : vector<2x8x8xf32>
    %cst_30 = arith.constant dense<0xFF800000> : vector<2x8xf32>
    %83 = vector.multi_reduction <maximumf>, %82, %cst_30 [2] : vector<2x8x8xf32> to vector<2x8xf32>
    %84 = vector.shape_cast %83 : vector<2x8xf32> to vector<2x8x1xf32>
    %85 = vector.broadcast %84 : vector<2x8x1xf32> to vector<2x8x8xf32>
    %86 = arith.subf %82, %85 : vector<2x8x8xf32>
    %87 = math.exp %86 : vector<2x8x8xf32>
    %cst_31 = arith.constant dense<0.000000e+00> : vector<2x8xf32>
    %88 = vector.multi_reduction <add>, %87, %cst_31 [2] : vector<2x8x8xf32> to vector<2x8xf32>
    %89 = vector.shape_cast %88 : vector<2x8xf32> to vector<2x8x1xf32>
    %90 = vector.broadcast %89 : vector<2x8x1xf32> to vector<2x8x8xf32>
    %91 = arith.divf %87, %90 : vector<2x8x8xf32>
    "tpu.trace_start"() <{level = 10 : i32, message = "bqk,bkd->bqd"}> : () -> ()
    %cst_32 = arith.constant dense<0.000000e+00> : vector<2x8x8xf32>
    %92 = tpu.matmul %91, %79, %cst_32 {dimension_numbers = #tpu.dot_dimension_numbers<[2], [1], [1], [2], [0, 0, 0, 1, 1, 2], [0], [0]>} : vector<2x8x8xf32>, vector<2x8x8xf32>, vector<2x8x8xf32> -> vector<2x8x8xf32>
    "tpu.trace_stop"() : () -> ()
    %93 = vector.shape_cast %92 : vector<2x8x8xf32> to vector<16x8xf32>
    %94 = arith.truncf %93 : vector<16x8xf32> to vector<16x8xbf16>
    %95 = vector.extract_strided_slice %16 {offsets = [24, 0], sizes = [8, 32], strides = [1, 1]} : vector<32x32xbf16> to vector<8x32xbf16>
    %cst_33 = arith.constant dense<0.000000e+00> : vector<16x32xf32>
    %96 = tpu.matmul %94, %95, %cst_33 {dimension_numbers = #tpu.dot_dimension_numbers<[1], [0], [0], [1], [0, 0, 1, 1], [], []>} : vector<16x8xbf16>, vector<8x32xbf16>, vector<16x32xf32> -> vector<16x32xf32>
    %97 = arith.addf %36, %56 : vector<16x32xf32>
    %98 = arith.addf %76, %96 : vector<16x32xf32>
    %99 = arith.addf %97, %98 : vector<16x32xf32>
    %c0_34 = arith.constant 0 : index
    %c0_35 = arith.constant 0 : index
    %c0_36 = arith.constant 0 : index
    %100 = vector.load %arg4[%c0_34, %c0_35, %c0_36] : memref<2x1x32xf32, #tpu.memory_space<vmem>>, vector<1x1x32xf32>
    %101 = vector.shape_cast %100 : vector<1x1x32xf32> to vector<1x32xf32>
    %102 = vector.broadcast %101 : vector<1x32xf32> to vector<16x32xf32>
    %103 = arith.addf %99, %102 : vector<16x32xf32>
    %104 = arith.addf %0, %103 : vector<16x32xf32>
    %c0_37 = arith.constant 0 : index
    %c0_38 = arith.constant 0 : index
    %c0_39 = arith.constant 0 : index
    %105 = vector.load %arg5[%c0_37, %c0_38, %c0_39] : memref<2x1x32xf32, #tpu.memory_space<vmem>>, vector<1x1x32xf32>
    %106 = vector.shape_cast %105 : vector<1x1x32xf32> to vector<1x32xf32>
    %c0_40 = arith.constant 0 : index
    %c0_41 = arith.constant 0 : index
    %c0_42 = arith.constant 0 : index
    %107 = vector.load %arg6[%c0_40, %c0_41, %c0_42] : memref<2x1x32xf32, #tpu.memory_space<vmem>>, vector<1x1x32xf32>
    %108 = vector.shape_cast %107 : vector<1x1x32xf32> to vector<1x32xf32>
    %cst_43 = arith.constant dense<0.000000e+00> : vector<16xf32>
    %109 = vector.multi_reduction <add>, %104, %cst_43 [1] : vector<16x32xf32> to vector<16xf32>
    %110 = vector.shape_cast %109 : vector<16xf32> to vector<16x1xf32>
    %cst_44 = arith.constant 3.200000e+01 : f32
    %111 = vector.broadcast %cst_44 : f32 to vector<16x1xf32>
    %112 = arith.divf %110, %111 : vector<16x1xf32>
    %113 = vector.broadcast %112 : vector<16x1xf32> to vector<16x32xf32>
    %114 = arith.subf %104, %113 : vector<16x32xf32>
    %115 = arith.mulf %114, %114 : vector<16x32xf32>
    %cst_45 = arith.constant dense<0.000000e+00> : vector<16xf32>
    %116 = vector.multi_reduction <add>, %115, %cst_45 [1] : vector<16x32xf32> to vector<16xf32>
    %117 = vector.shape_cast %116 : vector<16xf32> to vector<16x1xf32>
    %cst_46 = arith.constant 3.200000e+01 : f32
    %118 = vector.broadcast %cst_46 : f32 to vector<16x1xf32>
    %119 = arith.divf %117, %118 : vector<16x1xf32>
    %120 = vector.broadcast %112 : vector<16x1xf32> to vector<16x32xf32>
    %121 = arith.subf %104, %120 : vector<16x32xf32>
    %cst_47 = arith.constant 9.99999974E-6 : f32
    %122 = vector.broadcast %cst_47 : f32 to vector<16x1xf32>
    %123 = arith.addf %119, %122 : vector<16x1xf32>
    %124 = math.rsqrt %123 : vector<16x1xf32>
    %125 = vector.broadcast %124 : vector<16x1xf32> to vector<16x32xf32>
    %126 = arith.mulf %121, %125 : vector<16x32xf32>
    %127 = vector.broadcast %106 : vector<1x32xf32> to vector<16x32xf32>
    %128 = arith.mulf %126, %127 : vector<16x32xf32>
    %129 = vector.broadcast %108 : vector<1x32xf32> to vector<16x32xf32>
    %130 = arith.addf %128, %129 : vector<16x32xf32>
    %131 = arith.truncf %130 : vector<16x32xf32> to vector<16x32xbf16>
    %c0_48 = arith.constant 0 : index
    %c0_49 = arith.constant 0 : index
    %c0_50 = arith.constant 0 : index
    %132 = vector.load %arg7[%c0_48, %c0_49, %c0_50] : memref<2x32x2048xbf16, #tpu.memory_space<vmem>>, vector<1x32x2048xbf16>
    %133 = vector.shape_cast %132 : vector<1x32x2048xbf16> to vector<32x2048xbf16>
    %cst_51 = arith.constant dense<0.000000e+00> : vector<16x2048xf32>
    %134 = tpu.matmul %131, %133, %cst_51 {dimension_numbers = #tpu.dot_dimension_numbers<[1], [0], [0], [1], [0, 0, 1, 1], [], []>} : vector<16x32xbf16>, vector<32x2048xbf16>, vector<16x2048xf32> -> vector<16x2048xf32>
    %c0_52 = arith.constant 0 : index
    %c0_53 = arith.constant 0 : index
    %c0_54 = arith.constant 0 : index
    %135 = vector.load %arg8[%c0_52, %c0_53, %c0_54] : memref<2x1x2048xf32, #tpu.memory_space<vmem>>, vector<1x1x2048xf32>
    %136 = vector.shape_cast %135 : vector<1x1x2048xf32> to vector<1x2048xf32>
    %137 = vector.broadcast %136 : vector<1x2048xf32> to vector<16x2048xf32>
    %138 = arith.addf %134, %137 : vector<16x2048xf32>
    %cst_55 = arith.constant 0.000000e+00 : f32
    %139 = vector.broadcast %cst_55 : f32 to vector<16x2048xf32>
    %140 = arith.maximumf %138, %139 : vector<16x2048xf32>
    %141 = arith.truncf %140 : vector<16x2048xf32> to vector<16x2048xbf16>
    %c0_56 = arith.constant 0 : index
    %c0_57 = arith.constant 0 : index
    %c0_58 = arith.constant 0 : index
    %142 = vector.load %arg9[%c0_56, %c0_57, %c0_58] : memref<2x32x2048xbf16, #tpu.memory_space<vmem>>, vector<1x32x2048xbf16>
    %143 = vector.shape_cast %142 : vector<1x32x2048xbf16> to vector<32x2048xbf16>
    "tpu.trace_start"() <{level = 10 : i32, message = "nf,df->nd"}> : () -> ()
    %cst_59 = arith.constant dense<0.000000e+00> : vector<16x32xf32>
    %144 = tpu.matmul %141, %143, %cst_59 {dimension_numbers = #tpu.dot_dimension_numbers<[1], [1], [0], [0], [0, 0, 1, 0], [], []>} : vector<16x2048xbf16>, vector<32x2048xbf16>, vector<16x32xf32> -> vector<16x32xf32>
    "tpu.trace_stop"() : () -> ()
    %c0_60 = arith.constant 0 : index
    %c0_61 = arith.constant 0 : index
    %c0_62 = arith.constant 0 : index
    %145 = vector.load %arg10[%c0_60, %c0_61, %c0_62] : memref<2x1x32xf32, #tpu.memory_space<vmem>>, vector<1x1x32xf32>
    %146 = vector.shape_cast %145 : vector<1x1x32xf32> to vector<1x32xf32>
    %147 = vector.broadcast %146 : vector<1x32xf32> to vector<16x32xf32>
    %148 = arith.addf %144, %147 : vector<16x32xf32>
    %149 = arith.addf %130, %148 : vector<16x32xf32>
    %c0_63 = arith.constant 0 : index
    %c0_64 = arith.constant 0 : index
    %c0_65 = arith.constant 0 : index
    %150 = vector.load %arg11[%c0_63, %c0_64, %c0_65] : memref<2x1x32xf32, #tpu.memory_space<vmem>>, vector<1x1x32xf32>
    %151 = vector.shape_cast %150 : vector<1x1x32xf32> to vector<1x32xf32>
    %c0_66 = arith.constant 0 : index
    %c0_67 = arith.constant 0 : index
    %c0_68 = arith.constant 0 : index
    %152 = vector.load %arg12[%c0_66, %c0_67, %c0_68] : memref<2x1x32xf32, #tpu.memory_space<vmem>>, vector<1x1x32xf32>
    %153 = vector.shape_cast %152 : vector<1x1x32xf32> to vector<1x32xf32>
    %cst_69 = arith.constant dense<0.000000e+00> : vector<16xf32>
    %154 = vector.multi_reduction <add>, %149, %cst_69 [1] : vector<16x32xf32> to vector<16xf32>
    %155 = vector.shape_cast %154 : vector<16xf32> to vector<16x1xf32>
    %cst_70 = arith.constant 3.200000e+01 : f32
    %156 = vector.broadcast %cst_70 : f32 to vector<16x1xf32>
    %157 = arith.divf %155, %156 : vector<16x1xf32>
    %158 = vector.broadcast %157 : vector<16x1xf32> to vector<16x32xf32>
    %159 = arith.subf %149, %158 : vector<16x32xf32>
    %160 = arith.mulf %159, %159 : vector<16x32xf32>
    %cst_71 = arith.constant dense<0.000000e+00> : vector<16xf32>
    %161 = vector.multi_reduction <add>, %160, %cst_71 [1] : vector<16x32xf32> to vector<16xf32>
    %162 = vector.shape_cast %161 : vector<16xf32> to vector<16x1xf32>
    %cst_72 = arith.constant 3.200000e+01 : f32
    %163 = vector.broadcast %cst_72 : f32 to vector<16x1xf32>
    %164 = arith.divf %162, %163 : vector<16x1xf32>
    %165 = vector.broadcast %157 : vector<16x1xf32> to vector<16x32xf32>
    %166 = arith.subf %149, %165 : vector<16x32xf32>
    %cst_73 = arith.constant 9.99999974E-6 : f32
    %167 = vector.broadcast %cst_73 : f32 to vector<16x1xf32>
    %168 = arith.addf %164, %167 : vector<16x1xf32>
    %169 = math.rsqrt %168 : vector<16x1xf32>
    %170 = vector.broadcast %169 : vector<16x1xf32> to vector<16x32xf32>
    %171 = arith.mulf %166, %170 : vector<16x32xf32>
    %172 = vector.broadcast %151 : vector<1x32xf32> to vector<16x32xf32>
    %173 = arith.mulf %171, %172 : vector<16x32xf32>
    %174 = vector.broadcast %153 : vector<1x32xf32> to vector<16x32xf32>
    %175 = arith.addf %173, %174 : vector<16x32xf32>
    %176 = arith.truncf %175 : vector<16x32xf32> to vector<16x32xbf16>
    %c1 = arith.constant 1 : index
    %c0_74 = arith.constant 0 : index
    %c0_75 = arith.constant 0 : index
    %177 = vector.load %arg1[%c1, %c0_74, %c0_75] : memref<2x32x96xbf16, #tpu.memory_space<vmem>>, vector<1x32x96xbf16>
    %178 = vector.shape_cast %177 : vector<1x32x96xbf16> to vector<32x96xbf16>
    %cst_76 = arith.constant dense<0.000000e+00> : vector<16x96xf32>
    %179 = tpu.matmul %176, %178, %cst_76 {dimension_numbers = #tpu.dot_dimension_numbers<[1], [0], [0], [1], [0, 0, 1, 1], [], []>} : vector<16x32xbf16>, vector<32x96xbf16>, vector<16x96xf32> -> vector<16x96xf32>
    %c1_77 = arith.constant 1 : index
    %c0_78 = arith.constant 0 : index
    %c0_79 = arith.constant 0 : index
    %180 = vector.load %arg2[%c1_77, %c0_78, %c0_79] : memref<2x1x96xf32, #tpu.memory_space<vmem>>, vector<1x1x96xf32>
    %181 = vector.shape_cast %180 : vector<1x1x96xf32> to vector<1x96xf32>
    %182 = vector.broadcast %181 : vector<1x96xf32> to vector<16x96xf32>
    %183 = arith.addf %179, %182 : vector<16x96xf32>
    %184 = vector.extract_strided_slice %183 {offsets = [0, 0], sizes = [16, 32], strides = [1, 1]} : vector<16x96xf32> to vector<16x32xf32>
    %185 = vector.shape_cast %184 : vector<16x32xf32> to vector<2x8x32xf32>
    %186 = vector.extract_strided_slice %183 {offsets = [0, 32], sizes = [16, 32], strides = [1, 1]} : vector<16x96xf32> to vector<16x32xf32>
    %187 = vector.shape_cast %186 : vector<16x32xf32> to vector<2x8x32xf32>
    %188 = vector.extract_strided_slice %183 {offsets = [0, 64], sizes = [16, 32], strides = [1, 1]} : vector<16x96xf32> to vector<16x32xf32>
    %189 = vector.shape_cast %188 : vector<16x32xf32> to vector<2x8x32xf32>
    %c1_80 = arith.constant 1 : index
    %c0_81 = arith.constant 0 : index
    %c0_82 = arith.constant 0 : index
    %190 = vector.load %arg3[%c1_80, %c0_81, %c0_82] : memref<2x32x32xbf16, #tpu.memory_space<vmem>>, vector<1x32x32xbf16>
    %191 = vector.shape_cast %190 : vector<1x32x32xbf16> to vector<32x32xbf16>
    %192 = vector.extract_strided_slice %185 {offsets = [0, 0, 0], sizes = [2, 8, 8], strides = [1, 1, 1]} : vector<2x8x32xf32> to vector<2x8x8xf32>
    %193 = vector.extract_strided_slice %187 {offsets = [0, 0, 0], sizes = [2, 8, 8], strides = [1, 1, 1]} : vector<2x8x32xf32> to vector<2x8x8xf32>
    %194 = vector.extract_strided_slice %189 {offsets = [0, 0, 0], sizes = [2, 8, 8], strides = [1, 1, 1]} : vector<2x8x32xf32> to vector<2x8x8xf32>
    "tpu.trace_start"() <{level = 10 : i32, message = "bqd,bkd->bqk"}> : () -> ()
    %cst_83 = arith.constant dense<0.000000e+00> : vector<2x8x8xf32>
    %195 = tpu.matmul %192, %193, %cst_83 {dimension_numbers = #tpu.dot_dimension_numbers<[2], [2], [1], [1], [0, 0, 0, 1, 1, 1], [0], [0]>} : vector<2x8x8xf32>, vector<2x8x8xf32>, vector<2x8x8xf32> -> vector<2x8x8xf32>
    "tpu.trace_stop"() : () -> ()
    %cst_84 = arith.constant 0.353553385 : f32
    %196 = vector.broadcast %cst_84 : f32 to vector<2x8x8xf32>
    %197 = arith.mulf %195, %196 : vector<2x8x8xf32>
    %cst_85 = arith.constant dense<0xFF800000> : vector<2x8xf32>
    %198 = vector.multi_reduction <maximumf>, %197, %cst_85 [2] : vector<2x8x8xf32> to vector<2x8xf32>
    %199 = vector.shape_cast %198 : vector<2x8xf32> to vector<2x8x1xf32>
    %200 = vector.broadcast %199 : vector<2x8x1xf32> to vector<2x8x8xf32>
    %201 = arith.subf %197, %200 : vector<2x8x8xf32>
    %202 = math.exp %201 : vector<2x8x8xf32>
    %cst_86 = arith.constant dense<0.000000e+00> : vector<2x8xf32>
    %203 = vector.multi_reduction <add>, %202, %cst_86 [2] : vector<2x8x8xf32> to vector<2x8xf32>
    %204 = vector.shape_cast %203 : vector<2x8xf32> to vector<2x8x1xf32>
    %205 = vector.broadcast %204 : vector<2x8x1xf32> to vector<2x8x8xf32>
    %206 = arith.divf %202, %205 : vector<2x8x8xf32>
    "tpu.trace_start"() <{level = 10 : i32, message = "bqk,bkd->bqd"}> : () -> ()
    %cst_87 = arith.constant dense<0.000000e+00> : vector<2x8x8xf32>
    %207 = tpu.matmul %206, %194, %cst_87 {dimension_numbers = #tpu.dot_dimension_numbers<[2], [1], [1], [2], [0, 0, 0, 1, 1, 2], [0], [0]>} : vector<2x8x8xf32>, vector<2x8x8xf32>, vector<2x8x8xf32> -> vector<2x8x8xf32>
    "tpu.trace_stop"() : () -> ()
    %208 = vector.shape_cast %207 : vector<2x8x8xf32> to vector<16x8xf32>
    %209 = arith.truncf %208 : vector<16x8xf32> to vector<16x8xbf16>
    %210 = vector.extract_strided_slice %191 {offsets = [0, 0], sizes = [8, 32], strides = [1, 1]} : vector<32x32xbf16> to vector<8x32xbf16>
    %cst_88 = arith.constant dense<0.000000e+00> : vector<16x32xf32>
    %211 = tpu.matmul %209, %210, %cst_88 {dimension_numbers = #tpu.dot_dimension_numbers<[1], [0], [0], [1], [0, 0, 1, 1], [], []>} : vector<16x8xbf16>, vector<8x32xbf16>, vector<16x32xf32> -> vector<16x32xf32>
    %212 = vector.extract_strided_slice %185 {offsets = [0, 0, 8], sizes = [2, 8, 8], strides = [1, 1, 1]} : vector<2x8x32xf32> to vector<2x8x8xf32>
    %213 = vector.extract_strided_slice %187 {offsets = [0, 0, 8], sizes = [2, 8, 8], strides = [1, 1, 1]} : vector<2x8x32xf32> to vector<2x8x8xf32>
    %214 = vector.extract_strided_slice %189 {offsets = [0, 0, 8], sizes = [2, 8, 8], strides = [1, 1, 1]} : vector<2x8x32xf32> to vector<2x8x8xf32>
    "tpu.trace_start"() <{level = 10 : i32, message = "bqd,bkd->bqk"}> : () -> ()
    %cst_89 = arith.constant dense<0.000000e+00> : vector<2x8x8xf32>
    %215 = tpu.matmul %212, %213, %cst_89 {dimension_numbers = #tpu.dot_dimension_numbers<[2], [2], [1], [1], [0, 0, 0, 1, 1, 1], [0], [0]>} : vector<2x8x8xf32>, vector<2x8x8xf32>, vector<2x8x8xf32> -> vector<2x8x8xf32>
    "tpu.trace_stop"() : () -> ()
    %cst_90 = arith.constant 0.353553385 : f32
    %216 = vector.broadcast %cst_90 : f32 to vector<2x8x8xf32>
    %217 = arith.mulf %215, %216 : vector<2x8x8xf32>
    %cst_91 = arith.constant dense<0xFF800000> : vector<2x8xf32>
    %218 = vector.multi_reduction <maximumf>, %217, %cst_91 [2] : vector<2x8x8xf32> to vector<2x8xf32>
    %219 = vector.shape_cast %218 : vector<2x8xf32> to vector<2x8x1xf32>
    %220 = vector.broadcast %219 : vector<2x8x1xf32> to vector<2x8x8xf32>
    %221 = arith.subf %217, %220 : vector<2x8x8xf32>
    %222 = math.exp %221 : vector<2x8x8xf32>
    %cst_92 = arith.constant dense<0.000000e+00> : vector<2x8xf32>
    %223 = vector.multi_reduction <add>, %222, %cst_92 [2] : vector<2x8x8xf32> to vector<2x8xf32>
    %224 = vector.shape_cast %223 : vector<2x8xf32> to vector<2x8x1xf32>
    %225 = vector.broadcast %224 : vector<2x8x1xf32> to vector<2x8x8xf32>
    %226 = arith.divf %222, %225 : vector<2x8x8xf32>
    "tpu.trace_start"() <{level = 10 : i32, message = "bqk,bkd->bqd"}> : () -> ()
    %cst_93 = arith.constant dense<0.000000e+00> : vector<2x8x8xf32>
    %227 = tpu.matmul %226, %214, %cst_93 {dimension_numbers = #tpu.dot_dimension_numbers<[2], [1], [1], [2], [0, 0, 0, 1, 1, 2], [0], [0]>} : vector<2x8x8xf32>, vector<2x8x8xf32>, vector<2x8x8xf32> -> vector<2x8x8xf32>
    "tpu.trace_stop"() : () -> ()
    %228 = vector.shape_cast %227 : vector<2x8x8xf32> to vector<16x8xf32>
    %229 = arith.truncf %228 : vector<16x8xf32> to vector<16x8xbf16>
    %230 = vector.extract_strided_slice %191 {offsets = [8, 0], sizes = [8, 32], strides = [1, 1]} : vector<32x32xbf16> to vector<8x32xbf16>
    %cst_94 = arith.constant dense<0.000000e+00> : vector<16x32xf32>
    %231 = tpu.matmul %229, %230, %cst_94 {dimension_numbers = #tpu.dot_dimension_numbers<[1], [0], [0], [1], [0, 0, 1, 1], [], []>} : vector<16x8xbf16>, vector<8x32xbf16>, vector<16x32xf32> -> vector<16x32xf32>
    %232 = vector.extract_strided_slice %185 {offsets = [0, 0, 16], sizes = [2, 8, 8], strides = [1, 1, 1]} : vector<2x8x32xf32> to vector<2x8x8xf32>
    %233 = vector.extract_strided_slice %187 {offsets = [0, 0, 16], sizes = [2, 8, 8], strides = [1, 1, 1]} : vector<2x8x32xf32> to vector<2x8x8xf32>
    %234 = vector.extract_strided_slice %189 {offsets = [0, 0, 16], sizes = [2, 8, 8], strides = [1, 1, 1]} : vector<2x8x32xf32> to vector<2x8x8xf32>
    "tpu.trace_start"() <{level = 10 : i32, message = "bqd,bkd->bqk"}> : () -> ()
    %cst_95 = arith.constant dense<0.000000e+00> : vector<2x8x8xf32>
    %235 = tpu.matmul %232, %233, %cst_95 {dimension_numbers = #tpu.dot_dimension_numbers<[2], [2], [1], [1], [0, 0, 0, 1, 1, 1], [0], [0]>} : vector<2x8x8xf32>, vector<2x8x8xf32>, vector<2x8x8xf32> -> vector<2x8x8xf32>
    "tpu.trace_stop"() : () -> ()
    %cst_96 = arith.constant 0.353553385 : f32
    %236 = vector.broadcast %cst_96 : f32 to vector<2x8x8xf32>
    %237 = arith.mulf %235, %236 : vector<2x8x8xf32>
    %cst_97 = arith.constant dense<0xFF800000> : vector<2x8xf32>
    %238 = vector.multi_reduction <maximumf>, %237, %cst_97 [2] : vector<2x8x8xf32> to vector<2x8xf32>
    %239 = vector.shape_cast %238 : vector<2x8xf32> to vector<2x8x1xf32>
    %240 = vector.broadcast %239 : vector<2x8x1xf32> to vector<2x8x8xf32>
    %241 = arith.subf %237, %240 : vector<2x8x8xf32>
    %242 = math.exp %241 : vector<2x8x8xf32>
    %cst_98 = arith.constant dense<0.000000e+00> : vector<2x8xf32>
    %243 = vector.multi_reduction <add>, %242, %cst_98 [2] : vector<2x8x8xf32> to vector<2x8xf32>
    %244 = vector.shape_cast %243 : vector<2x8xf32> to vector<2x8x1xf32>
    %245 = vector.broadcast %244 : vector<2x8x1xf32> to vector<2x8x8xf32>
    %246 = arith.divf %242, %245 : vector<2x8x8xf32>
    "tpu.trace_start"() <{level = 10 : i32, message = "bqk,bkd->bqd"}> : () -> ()
    %cst_99 = arith.constant dense<0.000000e+00> : vector<2x8x8xf32>
    %247 = tpu.matmul %246, %234, %cst_99 {dimension_numbers = #tpu.dot_dimension_numbers<[2], [1], [1], [2], [0, 0, 0, 1, 1, 2], [0], [0]>} : vector<2x8x8xf32>, vector<2x8x8xf32>, vector<2x8x8xf32> -> vector<2x8x8xf32>
    "tpu.trace_stop"() : () -> ()
    %248 = vector.shape_cast %247 : vector<2x8x8xf32> to vector<16x8xf32>
    %249 = arith.truncf %248 : vector<16x8xf32> to vector<16x8xbf16>
    %250 = vector.extract_strided_slice %191 {offsets = [16, 0], sizes = [8, 32], strides = [1, 1]} : vector<32x32xbf16> to vector<8x32xbf16>
    %cst_100 = arith.constant dense<0.000000e+00> : vector<16x32xf32>
    %251 = tpu.matmul %249, %250, %cst_100 {dimension_numbers = #tpu.dot_dimension_numbers<[1], [0], [0], [1], [0, 0, 1, 1], [], []>} : vector<16x8xbf16>, vector<8x32xbf16>, vector<16x32xf32> -> vector<16x32xf32>
    %252 = vector.extract_strided_slice %185 {offsets = [0, 0, 24], sizes = [2, 8, 8], strides = [1, 1, 1]} : vector<2x8x32xf32> to vector<2x8x8xf32>
    %253 = vector.extract_strided_slice %187 {offsets = [0, 0, 24], sizes = [2, 8, 8], strides = [1, 1, 1]} : vector<2x8x32xf32> to vector<2x8x8xf32>
    %254 = vector.extract_strided_slice %189 {offsets = [0, 0, 24], sizes = [2, 8, 8], strides = [1, 1, 1]} : vector<2x8x32xf32> to vector<2x8x8xf32>
    "tpu.trace_start"() <{level = 10 : i32, message = "bqd,bkd->bqk"}> : () -> ()
    %cst_101 = arith.constant dense<0.000000e+00> : vector<2x8x8xf32>
    %255 = tpu.matmul %252, %253, %cst_101 {dimension_numbers = #tpu.dot_dimension_numbers<[2], [2], [1], [1], [0, 0, 0, 1, 1, 1], [0], [0]>} : vector<2x8x8xf32>, vector<2x8x8xf32>, vector<2x8x8xf32> -> vector<2x8x8xf32>
    "tpu.trace_stop"() : () -> ()
    %cst_102 = arith.constant 0.353553385 : f32
    %256 = vector.broadcast %cst_102 : f32 to vector<2x8x8xf32>
    %257 = arith.mulf %255, %256 : vector<2x8x8xf32>
    %cst_103 = arith.constant dense<0xFF800000> : vector<2x8xf32>
    %258 = vector.multi_reduction <maximumf>, %257, %cst_103 [2] : vector<2x8x8xf32> to vector<2x8xf32>
    %259 = vector.shape_cast %258 : vector<2x8xf32> to vector<2x8x1xf32>
    %260 = vector.broadcast %259 : vector<2x8x1xf32> to vector<2x8x8xf32>
    %261 = arith.subf %257, %260 : vector<2x8x8xf32>
    %262 = math.exp %261 : vector<2x8x8xf32>
    %cst_104 = arith.constant dense<0.000000e+00> : vector<2x8xf32>
    %263 = vector.multi_reduction <add>, %262, %cst_104 [2] : vector<2x8x8xf32> to vector<2x8xf32>
    %264 = vector.shape_cast %263 : vector<2x8xf32> to vector<2x8x1xf32>
    %265 = vector.broadcast %264 : vector<2x8x1xf32> to vector<2x8x8xf32>
    %266 = arith.divf %262, %265 : vector<2x8x8xf32>
    "tpu.trace_start"() <{level = 10 : i32, message = "bqk,bkd->bqd"}> : () -> ()
    %cst_105 = arith.constant dense<0.000000e+00> : vector<2x8x8xf32>
    %267 = tpu.matmul %266, %254, %cst_105 {dimension_numbers = #tpu.dot_dimension_numbers<[2], [1], [1], [2], [0, 0, 0, 1, 1, 2], [0], [0]>} : vector<2x8x8xf32>, vector<2x8x8xf32>, vector<2x8x8xf32> -> vector<2x8x8xf32>
    "tpu.trace_stop"() : () -> ()
    %268 = vector.shape_cast %267 : vector<2x8x8xf32> to vector<16x8xf32>
    %269 = arith.truncf %268 : vector<16x8xf32> to vector<16x8xbf16>
    %270 = vector.extract_strided_slice %191 {offsets = [24, 0], sizes = [8, 32], strides = [1, 1]} : vector<32x32xbf16> to vector<8x32xbf16>
    %cst_106 = arith.constant dense<0.000000e+00> : vector<16x32xf32>
    %271 = tpu.matmul %269, %270, %cst_106 {dimension_numbers = #tpu.dot_dimension_numbers<[1], [0], [0], [1], [0, 0, 1, 1], [], []>} : vector<16x8xbf16>, vector<8x32xbf16>, vector<16x32xf32> -> vector<16x32xf32>
    %272 = arith.addf %211, %231 : vector<16x32xf32>
    %273 = arith.addf %251, %271 : vector<16x32xf32>
    %274 = arith.addf %272, %273 : vector<16x32xf32>
    %c1_107 = arith.constant 1 : index
    %c0_108 = arith.constant 0 : index
    %c0_109 = arith.constant 0 : index
    %275 = vector.load %arg4[%c1_107, %c0_108, %c0_109] : memref<2x1x32xf32, #tpu.memory_space<vmem>>, vector<1x1x32xf32>
    %276 = vector.shape_cast %275 : vector<1x1x32xf32> to vector<1x32xf32>
    %277 = vector.broadcast %276 : vector<1x32xf32> to vector<16x32xf32>
    %278 = arith.addf %274, %277 : vector<16x32xf32>
    %279 = arith.addf %175, %278 : vector<16x32xf32>
    %c1_110 = arith.constant 1 : index
    %c0_111 = arith.constant 0 : index
    %c0_112 = arith.constant 0 : index
    %280 = vector.load %arg5[%c1_110, %c0_111, %c0_112] : memref<2x1x32xf32, #tpu.memory_space<vmem>>, vector<1x1x32xf32>
    %281 = vector.shape_cast %280 : vector<1x1x32xf32> to vector<1x32xf32>
    %c1_113 = arith.constant 1 : index
    %c0_114 = arith.constant 0 : index
    %c0_115 = arith.constant 0 : index
    %282 = vector.load %arg6[%c1_113, %c0_114, %c0_115] : memref<2x1x32xf32, #tpu.memory_space<vmem>>, vector<1x1x32xf32>
    %283 = vector.shape_cast %282 : vector<1x1x32xf32> to vector<1x32xf32>
    %cst_116 = arith.constant dense<0.000000e+00> : vector<16xf32>
    %284 = vector.multi_reduction <add>, %279, %cst_116 [1] : vector<16x32xf32> to vector<16xf32>
    %285 = vector.shape_cast %284 : vector<16xf32> to vector<16x1xf32>
    %cst_117 = arith.constant 3.200000e+01 : f32
    %286 = vector.broadcast %cst_117 : f32 to vector<16x1xf32>
    %287 = arith.divf %285, %286 : vector<16x1xf32>
    %288 = vector.broadcast %287 : vector<16x1xf32> to vector<16x32xf32>
    %289 = arith.subf %279, %288 : vector<16x32xf32>
    %290 = arith.mulf %289, %289 : vector<16x32xf32>
    %cst_118 = arith.constant dense<0.000000e+00> : vector<16xf32>
    %291 = vector.multi_reduction <add>, %290, %cst_118 [1] : vector<16x32xf32> to vector<16xf32>
    %292 = vector.shape_cast %291 : vector<16xf32> to vector<16x1xf32>
    %cst_119 = arith.constant 3.200000e+01 : f32
    %293 = vector.broadcast %cst_119 : f32 to vector<16x1xf32>
    %294 = arith.divf %292, %293 : vector<16x1xf32>
    %295 = vector.broadcast %287 : vector<16x1xf32> to vector<16x32xf32>
    %296 = arith.subf %279, %295 : vector<16x32xf32>
    %cst_120 = arith.constant 9.99999974E-6 : f32
    %297 = vector.broadcast %cst_120 : f32 to vector<16x1xf32>
    %298 = arith.addf %294, %297 : vector<16x1xf32>
    %299 = math.rsqrt %298 : vector<16x1xf32>
    %300 = vector.broadcast %299 : vector<16x1xf32> to vector<16x32xf32>
    %301 = arith.mulf %296, %300 : vector<16x32xf32>
    %302 = vector.broadcast %281 : vector<1x32xf32> to vector<16x32xf32>
    %303 = arith.mulf %301, %302 : vector<16x32xf32>
    %304 = vector.broadcast %283 : vector<1x32xf32> to vector<16x32xf32>
    %305 = arith.addf %303, %304 : vector<16x32xf32>
    %306 = arith.truncf %305 : vector<16x32xf32> to vector<16x32xbf16>
    %c1_121 = arith.constant 1 : index
    %c0_122 = arith.constant 0 : index
    %c0_123 = arith.constant 0 : index
    %307 = vector.load %arg7[%c1_121, %c0_122, %c0_123] : memref<2x32x2048xbf16, #tpu.memory_space<vmem>>, vector<1x32x2048xbf16>
    %308 = vector.shape_cast %307 : vector<1x32x2048xbf16> to vector<32x2048xbf16>
    %cst_124 = arith.constant dense<0.000000e+00> : vector<16x2048xf32>
    %309 = tpu.matmul %306, %308, %cst_124 {dimension_numbers = #tpu.dot_dimension_numbers<[1], [0], [0], [1], [0, 0, 1, 1], [], []>} : vector<16x32xbf16>, vector<32x2048xbf16>, vector<16x2048xf32> -> vector<16x2048xf32>
    %c1_125 = arith.constant 1 : index
    %c0_126 = arith.constant 0 : index
    %c0_127 = arith.constant 0 : index
    %310 = vector.load %arg8[%c1_125, %c0_126, %c0_127] : memref<2x1x2048xf32, #tpu.memory_space<vmem>>, vector<1x1x2048xf32>
    %311 = vector.shape_cast %310 : vector<1x1x2048xf32> to vector<1x2048xf32>
    %312 = vector.broadcast %311 : vector<1x2048xf32> to vector<16x2048xf32>
    %313 = arith.addf %309, %312 : vector<16x2048xf32>
    %cst_128 = arith.constant 0.000000e+00 : f32
    %314 = vector.broadcast %cst_128 : f32 to vector<16x2048xf32>
    %315 = arith.maximumf %313, %314 : vector<16x2048xf32>
    %316 = arith.truncf %315 : vector<16x2048xf32> to vector<16x2048xbf16>
    %c1_129 = arith.constant 1 : index
    %c0_130 = arith.constant 0 : index
    %c0_131 = arith.constant 0 : index
    %317 = vector.load %arg9[%c1_129, %c0_130, %c0_131] : memref<2x32x2048xbf16, #tpu.memory_space<vmem>>, vector<1x32x2048xbf16>
    %318 = vector.shape_cast %317 : vector<1x32x2048xbf16> to vector<32x2048xbf16>
    "tpu.trace_start"() <{level = 10 : i32, message = "nf,df->nd"}> : () -> ()
    %cst_132 = arith.constant dense<0.000000e+00> : vector<16x32xf32>
    %319 = tpu.matmul %316, %318, %cst_132 {dimension_numbers = #tpu.dot_dimension_numbers<[1], [1], [0], [0], [0, 0, 1, 0], [], []>} : vector<16x2048xbf16>, vector<32x2048xbf16>, vector<16x32xf32> -> vector<16x32xf32>
    "tpu.trace_stop"() : () -> ()
    %c1_133 = arith.constant 1 : index
    %c0_134 = arith.constant 0 : index
    %c0_135 = arith.constant 0 : index
    %320 = vector.load %arg10[%c1_133, %c0_134, %c0_135] : memref<2x1x32xf32, #tpu.memory_space<vmem>>, vector<1x1x32xf32>
    %321 = vector.shape_cast %320 : vector<1x1x32xf32> to vector<1x32xf32>
    %322 = vector.broadcast %321 : vector<1x32xf32> to vector<16x32xf32>
    %323 = arith.addf %319, %322 : vector<16x32xf32>
    %324 = arith.addf %305, %323 : vector<16x32xf32>
    %c1_136 = arith.constant 1 : index
    %c0_137 = arith.constant 0 : index
    %c0_138 = arith.constant 0 : index
    %325 = vector.load %arg11[%c1_136, %c0_137, %c0_138] : memref<2x1x32xf32, #tpu.memory_space<vmem>>, vector<1x1x32xf32>
    %326 = vector.shape_cast %325 : vector<1x1x32xf32> to vector<1x32xf32>
    %c1_139 = arith.constant 1 : index
    %c0_140 = arith.constant 0 : index
    %c0_141 = arith.constant 0 : index
    %327 = vector.load %arg12[%c1_139, %c0_140, %c0_141] : memref<2x1x32xf32, #tpu.memory_space<vmem>>, vector<1x1x32xf32>
    %328 = vector.shape_cast %327 : vector<1x1x32xf32> to vector<1x32xf32>
    %cst_142 = arith.constant dense<0.000000e+00> : vector<16xf32>
    %329 = vector.multi_reduction <add>, %324, %cst_142 [1] : vector<16x32xf32> to vector<16xf32>
    %330 = vector.shape_cast %329 : vector<16xf32> to vector<16x1xf32>
    %cst_143 = arith.constant 3.200000e+01 : f32
    %331 = vector.broadcast %cst_143 : f32 to vector<16x1xf32>
    %332 = arith.divf %330, %331 : vector<16x1xf32>
    %333 = vector.broadcast %332 : vector<16x1xf32> to vector<16x32xf32>
    %334 = arith.subf %324, %333 : vector<16x32xf32>
    %335 = arith.mulf %334, %334 : vector<16x32xf32>
    %cst_144 = arith.constant dense<0.000000e+00> : vector<16xf32>
    %336 = vector.multi_reduction <add>, %335, %cst_144 [1] : vector<16x32xf32> to vector<16xf32>
    %337 = vector.shape_cast %336 : vector<16xf32> to vector<16x1xf32>
    %cst_145 = arith.constant 3.200000e+01 : f32
    %338 = vector.broadcast %cst_145 : f32 to vector<16x1xf32>
    %339 = arith.divf %337, %338 : vector<16x1xf32>
    %340 = vector.broadcast %332 : vector<16x1xf32> to vector<16x32xf32>
    %341 = arith.subf %324, %340 : vector<16x32xf32>
    %cst_146 = arith.constant 9.99999974E-6 : f32
    %342 = vector.broadcast %cst_146 : f32 to vector<16x1xf32>
    %343 = arith.addf %339, %342 : vector<16x1xf32>
    %344 = math.rsqrt %343 : vector<16x1xf32>
    %345 = vector.broadcast %344 : vector<16x1xf32> to vector<16x32xf32>
    %346 = arith.mulf %341, %345 : vector<16x32xf32>
    %347 = vector.broadcast %326 : vector<1x32xf32> to vector<16x32xf32>
    %348 = arith.mulf %346, %347 : vector<16x32xf32>
    %349 = vector.broadcast %328 : vector<1x32xf32> to vector<16x32xf32>
    %350 = arith.addf %348, %349 : vector<16x32xf32>
    %351 = arith.truncf %350 : vector<16x32xf32> to vector<16x32xbf16>
    %c0_147 = arith.constant 0 : index
    %c0_148 = arith.constant 0 : index
    %352 = vector.load %arg13[%c0_147, %c0_148] : memref<32x32xbf16, #tpu.memory_space<vmem>>, vector<32x32xbf16>
    %cst_149 = arith.constant dense<0.000000e+00> : vector<16x32xf32>
    %353 = tpu.matmul %351, %352, %cst_149 {dimension_numbers = #tpu.dot_dimension_numbers<[1], [0], [0], [1], [0, 0, 1, 1], [], []>} : vector<16x32xbf16>, vector<32x32xbf16>, vector<16x32xf32> -> vector<16x32xf32>
    %c0_150 = arith.constant 0 : index
    %c0_151 = arith.constant 0 : index
    %354 = vector.load %arg14[%c0_150, %c0_151] : memref<1x32xf32, #tpu.memory_space<vmem>>, vector<1x32xf32>
    %355 = vector.broadcast %354 : vector<1x32xf32> to vector<16x32xf32>
    %356 = arith.addf %353, %355 : vector<16x32xf32>
    %cst_152 = arith.constant 0.000000e+00 : f32
    %357 = vector.broadcast %cst_152 : f32 to vector<16x32xf32>
    %358 = arith.maximumf %356, %357 : vector<16x32xf32>
    %c0_153 = arith.constant 0 : index
    %c0_154 = arith.constant 0 : index
    %359 = vector.load %arg15[%c0_153, %c0_154] : memref<16x32xf32, #tpu.memory_space<vmem>>, vector<16x32xf32>
    tpu.vector_store %arg15[%c0_153, %c0_154], %358 {strides = array<i32>} : memref<16x32xf32, #tpu.memory_space<vmem>>, vector<16x32xf32>,
    return
  }
}

</mosaic_0001>

<bundles_post_ra>
// kernel: com_word_forward.1
= control target key start
LH: loop header
LB: loop body
LE: loop exit
PB: predicated region body
PF: predicated region fallthrough
CT: control target
= control target key end

     0   :  { %20 = vsyncpa [#allocation3], 0  ;;  %s7960_s0 = inlined_call_operand.hbm [shape: f32[16,32], index: 0, kind: input, shape index: {}]   ;;  %s7961_s1 = inlined_call_operand.hbm [shape: bf16[2,32,96], index: 1, kind: input, shape index: {}]   ;;  %s7962_s2 = inlined_call_operand.vmem [shape: f32[2,1,96], index: 2, kind: input, shape index: {}]   ;;  %s7963_s3 = inlined_call_operand.hbm [shape: bf16[2,32,32], index: 3, kind: input, shape index: {}]   ;;  %s7964_s4 = inlined_call_operand.vmem [shape: f32[2,1,32], index: 4, kind: input, shape index: {}]   ;;  %s7965_s5 = inlined_call_operand.hbm [shape: f32[2,1,32], index: 5, kind: input, shape index: {}]   ;;  %s7966_s6 = inlined_call_operand.hbm [shape: f32[2,1,32], index: 6, kind: input, shape index: {}]   ;;  %s7967_s7 = inlined_call_operand.hbm [shape: bf16[2,32,2048], index: 7, kind: input, shape index: {}]   ;;  %s7968_s8 = inlined_call_operand.hbm [shape: f32[2,1,2048], index: 8, kind: input, shape index: {}]   ;;  %s7969_s9 = inlined_call_operand.hbm [shape: bf16[2,32,2048], index: 9, kind: input, shape index: {}]   ;;  %s7970_s10 = inlined_call_operand.hbm [shape: f32[2,1,32], index: 10, kind: input, shape index: {}]   ;;  %s7971_s11 = inlined_call_operand.hbm [shape: f32[2,1,32], index: 11, kind: input, shape index: {}]   ;;  %s7972_s12 = inlined_call_operand.hbm [shape: f32[2,1,32], index: 12, kind: input, shape index: {}]   ;;  %s7973_s13 = inlined_call_operand.vmem [shape: bf16[32,32], index: 13, kind: input, shape index: {}]   ;;  %s7974_s14 = inlined_call_operand.hbm [shape: f32[1,32], index: 14, kind: input, shape index: {}]   ;;  %s7975_s15 = inlined_call_operand.hbm [shape: f32[16,32], index: 15, kind: output, shape index: {}]  }
   0x1   :  { %21 = vsyncpa [#allocation6], 0 }
   0x2   :  { %22 = vsyncpa [#allocation9], 0 }
   0x3   :  { %23 = vsyncpa [#allocation12], 0 }
   0x4   :  { %24 = vsyncpa [#allocation15], 0 }
   0x5   :  { %25 = vsyncpa [#allocation18], 0 }
   0x6   :  { %26 = vsyncpa [#allocation21], 0 }
   0x7   :  { %27 = vsyncpa [#allocation4], 0  ;;  %s7053_s18 = smov [#allocation5]  }
   0x8   :  { %s45_s19 = sshll.u32 %s7053_s18, 4  ;;  %s46_s19 = int_to_ptr.vmem [resolvable:$true] %s45_s19 }
   0x9   :  { %s6785_s20 = scalar_lea.vmem %s46_s19, 512  ;;  %p6790_p1 = scmp.lt.s32.totalorder %s46_s19, %s46_s19 }
   0xa   :  { %p6786_p0 = scmp.ne.s32.totalorder %s46_s19, %s6785_s20  ;;  %p6791_p2 = scmp.lt.s32.totalorder %s6785_s20, %s6785_s20 }
   0xc   :  { %p6792_p3 = por %p6791_p2, %p6790_p1 }
   0xe   :  { %p6793_p4 = pnand %p6792_p3, %p6786_p0 }
  0x10   :  { %6796 = shalt.err (!%p6793_p4)
}
  0x11   :  { %s7054_s21 = smov 64   ;;  %s7055_s22 = smov 4  }
  0x12   :  { %51 = dma.hbm_to_vmem [thread:$0]  %s7961_s1, 512, %s46_s19, [#allocation6], %s7054_s21, %s7054_s21, %s7055_s22  }
  0x13   :  { %s7056_s25 = smov [#allocation8]  }
  0x14   :  { %s73_s26 = sshll.u32 %s7056_s25, 4  ;;  %s74_s26 = int_to_ptr.vmem [resolvable:$true] %s73_s26 }
  0x15   :  { %s6805_s27 = scalar_lea.vmem %s74_s26, 32  ;;  %p6810_p6 = scmp.lt.s32.totalorder %s74_s26, %s74_s26 }
  0x16   :  { %p6806_p5 = scmp.ne.s32.totalorder %s74_s26, %s6805_s27  ;;  %p6811_p7 = scmp.lt.s32.totalorder %s6805_s27, %s6805_s27 }
  0x18   :  { %p6812_p8 = por %p6811_p7, %p6810_p6 }
  0x1a   :  { %p6813_p9 = pnand %p6812_p8, %p6806_p5 }
  0x1c   :  { %6816 = shalt.err (!%p6813_p9)
}
  0x1d   :  { %s7057_s28 = smov 16   ;;  %s7058_s29 = smov 1  }
  0x1e   :  { %79 = dma.hbm_to_vmem [thread:$0]  %s7965_s5, 32, %s74_s26, [#allocation9], %s7057_s28, %s7057_s28, %s7058_s29  }
  0x1f   :  { %s7059_s1 = smov [#allocation11]   ;;  %s7060_s18 = smov [#allocation14]  }
  0x20   :  { %s97_s17 = sshll.u32 %s7059_s1, 4  ;;  %s121_s19 = sshll.u32 %s7060_s18, 4  ;;  %s98_s17 = int_to_ptr.vmem [resolvable:$true] %s97_s17  ;;  %s122_s19 = int_to_ptr.vmem [resolvable:$true] %s121_s19 }
  0x21   :  { %s6825_s20 = scalar_lea.vmem %s98_s17, 8192  ;;  %p6830_p11 = scmp.lt.s32.totalorder %s98_s17, %s98_s17 }
  0x22   :  { %p6826_p10 = scmp.ne.s32.totalorder %s98_s17, %s6825_s20  ;;  %p6831_p12 = scmp.lt.s32.totalorder %s6825_s20, %s6825_s20 }
  0x24   :  { %p6832_p13 = por %p6831_p12, %p6830_p11 }
  0x26   :  { %p6833_p0 = pnand %p6832_p13, %p6826_p10 }
  0x28   :  { %6836 = shalt.err (!%p6833_p0)
}
  0x29   :  { %s7061_s23 = smov 1024   ;;  %s6845_s5 = scalar_lea.vmem %s122_s19, 8192 }
  0x2a   :  { %103 = dma.hbm_to_vmem [thread:$0]  %s7967_s7, 8192, %s98_s17, [#allocation12], %s7061_s23, %s7061_s23, %s7054_s21  }
  0x2b   :  { %p6846_p1 = scmp.ne.s32.totalorder %s122_s19, %s6845_s5  ;;  %p6850_p2 = scmp.lt.s32.totalorder %s122_s19, %s122_s19 }
  0x2c   :  { %p6851_p3 = scmp.lt.s32.totalorder %s6845_s5, %s6845_s5 }
  0x2e   :  { %p6852_p4 = por %p6851_p3, %p6850_p2 }
  0x30   :  { %p6853_p5 = pnand %p6852_p4, %p6846_p1 }
  0x32   :  { %6856 = shalt.err (!%p6853_p5)
}
  0x33   :  { %127 = dma.hbm_to_vmem [thread:$0]  %s7969_s9, 8192, %s122_s19, [#allocation15], %s7061_s23, %s7061_s23, %s7054_s21  }
  0x34   :  { %s7062_s30 = smov [#allocation17]   ;;  %s7063_s1 = smov [#allocation2]  }
  0x35   :  { %s145_s16 = sshll.u32 %s7062_s30, 4  ;;  %s33_s18 = sshll.u32 %s7063_s1, 4  ;;  %s146_s16 = int_to_ptr.vmem [resolvable:$true] %s145_s16  ;;  %s34_s18 = int_to_ptr.vmem [resolvable:$true] %s33_s18 }
  0x36   :  { %s6865_s20 = scalar_lea.vmem %s146_s16, 32  ;;  %p6870_p7 = scmp.lt.s32.totalorder %s146_s16, %s146_s16 }
  0x37   :  { %p6866_p6 = scmp.ne.s32.totalorder %s146_s16, %s6865_s20  ;;  %p6871_p8 = scmp.lt.s32.totalorder %s6865_s20, %s6865_s20 }
  0x39   :  { %p6872_p9 = por %p6871_p8, %p6870_p7 }
  0x3b   :  { %p6873_p10 = pnand %p6872_p9, %p6866_p6 }
  0x3d   :  { %6876 = shalt.err (!%p6873_p10)
}
  0x3e   :  { %151 = dma.hbm_to_vmem [thread:$0]  %s7971_s11, 32, %s146_s16, [#allocation18], %s7057_s28, %s7057_s28, %s7058_s29  }
  0x3f   :  { %s6885_s9 = scalar_lea.vmem %s34_s18, 256  ;;  %p6890_p12 = scmp.lt.s32.totalorder %s34_s18, %s34_s18 }
  0x40   :  { %p6886_p11 = scmp.ne.s32.totalorder %s34_s18, %s6885_s9  ;;  %p6891_p13 = scmp.lt.s32.totalorder %s6885_s9, %s6885_s9 }
  0x42   :  { %p6892_p0 = por %p6891_p13, %p6890_p12 }
  0x44   :  { %p6893_p1 = pnand %p6892_p0, %p6886_p11 }
  0x46   :  { %6896 = shalt.err (!%p6893_p1)
}
  0x47   :  { %s7064_s19 = smov 128   ;;  %s7065_s23 = smov 8  }
  0x48   :  { %39 = dma.hbm_to_vmem [thread:$0]  %s7960_s0, 256, %s34_s18, [#allocation3], %s7064_s19, %s7064_s19, %s7065_s23  }
  0x49   :  { %s7066_s5 = smov [#allocation7]   ;;  %s7067_s11 = smov [#allocation10]  }
  0x4a   :  { %s59_s26 = sshll.u32 %s7066_s5, 4  ;;  %s85_s27 = sshll.u32 %s7067_s11, 4  ;;  %s60_s26 = int_to_ptr.vmem [resolvable:$true] %s59_s26  ;;  %s86_s27 = int_to_ptr.vmem [resolvable:$true] %s85_s27 }
  0x4b   :  { %s6905_s30 = scalar_lea.vmem %s60_s26, 512  ;;  %p6910_p3 = scmp.lt.s32.totalorder %s60_s26, %s60_s26 }
  0x4c   :  { %p6906_p2 = scmp.ne.s32.totalorder %s60_s26, %s6905_s30  ;;  %p6911_p4 = scmp.lt.s32.totalorder %s6905_s30, %s6905_s30 }
  0x4e   :  { %p6912_p5 = por %p6911_p4, %p6910_p3 }
  0x50   :  { %p6913_p6 = pnand %p6912_p5, %p6906_p2 }
  0x52   :  { %6916 = shalt.err (!%p6913_p6)
}
  0x53   :  { %65 = dma.hbm_to_vmem [thread:$0]  %s7963_s3, 512, %s60_s26, [#allocation6], %s7054_s21, %s7054_s21, %s7055_s22  }
  0x54   :  { %s6925_s0 = scalar_lea.vmem %s86_s27, 32  ;;  %p6930_p8 = scmp.lt.s32.totalorder %s86_s27, %s86_s27 }
  0x55   :  { %p6926_p7 = scmp.ne.s32.totalorder %s86_s27, %s6925_s0  ;;  %p6931_p9 = scmp.lt.s32.totalorder %s6925_s0, %s6925_s0 }
  0x57   :  { %p6932_p10 = por %p6931_p9, %p6930_p8 }
  0x59   :  { %p6933_p11 = pnand %p6932_p10, %p6926_p7 }
  0x5b   :  { %6936 = shalt.err (!%p6933_p11)
}
  0x5c   :  { %91 = dma.hbm_to_vmem [thread:$0]  %s7966_s6, 32, %s86_s27, [#allocation9], %s7057_s28, %s7057_s28, %s7058_s29  }
  0x5d   :  { %s7068_s7 = smov [#allocation13]  }
  0x5e   :  { %s109_s17 = sshll.u32 %s7068_s7, 4  ;;  %s110_s17 = int_to_ptr.vmem [resolvable:$true] %s109_s17 }
  0x5f   :  { %s6945_s9 = scalar_lea.vmem %s110_s17, 512  ;;  %p6950_p13 = scmp.lt.s32.totalorder %s110_s17, %s110_s17 }
  0x60   :  { %p6946_p12 = scmp.ne.s32.totalorder %s110_s17, %s6945_s9  ;;  %p6951_p0 = scmp.lt.s32.totalorder %s6945_s9, %s6945_s9 }
  0x62   :  { %p6952_p1 = por %p6951_p0, %p6950_p13 }
  0x64   :  { %p6953_p2 = pnand %p6952_p1, %p6946_p12 }
  0x66   :  { %6956 = shalt.err (!%p6953_p2)
}
  0x67   :  { %s7069_s3 = smov 256   ;;  %s7070_s25 = smov [#allocation16]  }
  0x68   :  { %115 = dma.hbm_to_vmem [thread:$0]  %s7968_s8, 512, %s110_s17, [#allocation12], %s7069_s3, %s7069_s3, %s7057_s28  }
  0x69   :  { %s133_s5 = sshll.u32 %s7070_s25, 4  ;;  %s7071_s6 = smov [#allocation19]   ;;  %s134_s5 = int_to_ptr.vmem [resolvable:$true] %s133_s5 }
  0x6a   :  { %s157_s26 = sshll.u32 %s7071_s6, 4  ;;  %s6965_s11 = scalar_lea.vmem %s134_s5, 32  ;;  %s158_s26 = int_to_ptr.vmem [resolvable:$true] %s157_s26 }
  0x6b   :  { %p6966_p3 = scmp.ne.s32.totalorder %s134_s5, %s6965_s11  ;;  %p6970_p4 = scmp.lt.s32.totalorder %s134_s5, %s134_s5 }
  0x6c   :  { %p6971_p5 = scmp.lt.s32.totalorder %s6965_s11, %s6965_s11 }
  0x6e   :  { %p6972_p6 = por %p6971_p5, %p6970_p4 }
  0x70   :  { %p6973_p7 = pnand %p6972_p6, %p6966_p3 }
  0x72   :  { %6976 = shalt.err (!%p6973_p7)
}
  0x73   :  { %139 = dma.hbm_to_vmem [thread:$0]  %s7970_s10, 32, %s134_s5, [#allocation15], %s7057_s28, %s7057_s28, %s7058_s29  }
  0x74   :  { %s6985_s8 = scalar_lea.vmem %s158_s26, 32  ;;  %p6990_p9 = scmp.lt.s32.totalorder %s158_s26, %s158_s26 }
  0x75   :  { %p6986_p8 = scmp.ne.s32.totalorder %s158_s26, %s6985_s8  ;;  %p6991_p10 = scmp.lt.s32.totalorder %s6985_s8, %s6985_s8 }
  0x77   :  { %p6992_p11 = por %p6991_p10, %p6990_p9 }
  0x79   :  { %p6993_p12 = pnand %p6992_p11, %p6986_p8 }
  0x7b   :  { %6996 = shalt.err (!%p6993_p12)
}
  0x7c   :  { %163 = dma.hbm_to_vmem [thread:$0]  %s7972_s12, 32, %s158_s26, [#allocation18], %s7057_s28, %s7057_s28, %s7058_s29  }
  0x7d   :  { %s7072_s0 = smov [#allocation20]  }
  0x7e   :  { %s172_s18 = sshll.u32 %s7072_s0, 4  ;;  %s173_s18 = int_to_ptr.vmem [resolvable:$true] %s172_s18 }
  0x7f   :  { %s7005_s20 = scalar_lea.vmem %s173_s18, 16  ;;  %s7009_s10 = scalar_lea.vmem %s173_s18, 32 }
  0x80   :  { %p7006_p13 = scmp.ne.s32.totalorder %s173_s18, %s7005_s20  ;;  %p7010_p0 = scmp.lt.s32.totalorder %s173_s18, %s173_s18 }
  0x81   :  { %p7011_p1 = scmp.lt.s32.totalorder %s7009_s10, %s7005_s20 }
  0x83   :  { %p7012_p2 = por %p7011_p1, %p7010_p0 }
  0x85   :  { %p7013_p3 = pnand %p7012_p2, %p7006_p13 }
  0x87   :  { %7016 = shalt.err (!%p7013_p3)
}
  0x88   :  { %175 = dma.hbm_to_vmem [thread:$0]  %s7974_s14, 16, %s173_s18, [#allocation21]  }
  0x89   :  { %7037 = dma.done.wait [#allocation3], 256  }
  0x8a   :  { %7038 = vsyncadd [#allocation3], 4294967040 }
  0x8b   :  { %7039 = dma.done.wait [#allocation6], 1024  }
  0x8c   :  { %7040 = vsyncadd [#allocation6], 4294966272 }
  0x8d   :  { %7041 = dma.done.wait [#allocation9], 64  }
  0x8e   :  { %7042 = vsyncadd [#allocation9], 4294967232 }
  0x8f   :  { %7043 = dma.done.wait [#allocation12], 8704  }
  0x90   :  { %7044 = vsyncadd [#allocation12], 4294958592 }
  0x91   :  { %7045 = dma.done.wait [#allocation15], 8224  }
  0x92   :  { %7046 = vsyncadd [#allocation15], 4294959072 }
  0x93   :  { %7047 = dma.done.wait [#allocation18], 64  }
  0x94   :  { %7048 = vsyncadd [#allocation18], 4294967232 }
  0x95   :  { %7049 = dma.done.wait [#allocation21], 16  }
  0x96   :  { %7050 = vsyncadd [#allocation21], 4294967280  ;;  %v7073_v0 = vmov 0.0   ;;  %vm7074_vm0 = vmmov 0   ;;  %v6691_v1 = vld [vmem:[#allocation5 + $0x8] sm:$0xff]   ;;  %v6692_v2 = vld [vmem:[#allocation5] sm:$0xff]  }
  0x97   :  { %6425 = vmatprep.subr.bf16.mxu0 %v7073_v0  ;;  %6429 = vmatprep.mubr.msk.bf16.mxu0 %vm7074_vm0, %v7073_v0  ;;  %v7236_v3 = vld [vmem:[#allocation2] sm:$0xff]  ;;  %v7238_v4 = vld [vmem:[#allocation2 + $0x8] sm:$0xff]  ;;  %vm239_vm1 = vcmask 261120   ;;  %s7075_s28 = smov 96   ;;  %s7076_s29 = smov 120   ;;  %vm291_vm2 = vcmask 64512  }
  0x98   :  { %6433 = vmatprep.subr.mxu1 %v7073_v0  ;;  %6435 = vmatprep.mubr.msk.f32.mxu1 %vm7074_vm0, %v7073_v0  ;;  %v215_v5 = vpack.c.bf16 %v7238_v4, %v7236_v3  ;;  %v6110_v6 = vld [vmem:[%s7962_s2] ss:$0 sm:$0xff]  ;;  %s7077_s9 = smov 88   ;;  %s7078_s3 = smov 80   ;;  %vm956_vm3 = vcmask 1043456  }
  0x99   :  { %6426 = vmatpush3.bf16.msra.mxu0 %v6691_v1  ;;  %s7079_s22 = smov 56   ;;  %s7080_s24 = smov 112  }
  0x9a   :  { %6427 = vmatprep.subr.bf16.mxu0 %v7073_v0  ;;  %s7081_s25 = smov 48   ;;  %s7082_s5 = smov 72  }
  0x9b   :  { %s7083_s6 = smov 104   ;;  %s7084_s26 = smov 40  }
  0x9d   :  { %6428 = vmatpush3.bf16.msra.mxu0 %v6692_v2 }
  0x9e   :  { %6448 = vmatprep.subr.mxu0 %v7073_v0 }
  0xa0   :  { %6430 = vmatmul.mubr.msk.bf16.vlgmr.msra.gmra.mxu0 %vm239_vm1, %v215_v5 }
  0xa1   :  { %6450 = vmatprep.mubr.msk.f32.mxu0 %vm7074_vm0, %v7073_v0 }
 0x160   :  { %v277_v7 = vpop.f32.mrf.mxu0 }
 0x161   :  { %v7250_v8 = vadd.f32 %v6110_v6, %v277_v7 }
 0x162   :  { %v6431_v9 = vpop.f32.mrf.mxu0 }
 0x163   :  { %289 = vrot.lane.b32.xlu0 %v7250_v8, %s7075_s28 }
 0x164   :  { %v280_v10 = vpop.f32.mrf.mxu0 }
 0x165   :  { %v7254_v11 = vadd.f32 %v6110_v6, %v280_v10 }
 0x166   :  { %v6432_v12 = vpop.f32.mrf.mxu0 }
 0x167   :  { %367 = vrot.lane.b32.xlu0 %v7254_v11, %s7075_s28 }
 0x16b   :  { %543 = vrot.lane.b32.xlu0 %v7254_v11, %s7054_s21 }
 0x16f   :  { %698 = vrot.lane.b32.xlu0 %v7254_v11, %s7076_s29 }
 0x1d5   :  { %v290_v13 = vpop.permute.xlu0 %289 }
 0x1d6   :  { %6434 = vmatpush3.xpose.msk.msra.mxu1 %vm291_vm2, %v290_v13 }
 0x1d7   :  { %6438 = vmatprep.subr.mxu1 %v7073_v0 }
 0x1d9   :  { %6436 = vmatmul.mubr.msk.f32.vlgmr.msra.gmra.mxu1 %vm291_vm2, %v7250_v8  ;;  %v368_v14 = vpop.permute.xlu0 %367 }
 0x1da   :  { %6439 = vmatpush3.xpose.msk.msra.mxu1 %vm291_vm2, %v368_v14  ;;  %6440 = vmatprep.mubr.msk.f32.mxu1 %vm7074_vm0, %v7073_v0 }
 0x1db   :  { %6443 = vmatprep.subr.mxu1 %v7073_v0 }
 0x1dd   :  { %6441 = vmatmul.mubr.msk.f32.vlgmr.msra.gmra.mxu1 %vm291_vm2, %v7254_v11  ;;  %v544_v15 = vpop.permute.xlu0 %543 }
 0x1de   :  { %6449 = vmatpush3.msra.mxu0 %v544_v15  ;;  %6445 = vmatprep.mubr.msk.f32.mxu1 %vm7074_vm0, %v7073_v0 }
 0x1df   :  { %6458 = vmatprep.subr.mxu0 %v7073_v0 }
 0x1e1   :  { %v699_v24 = vpop.permute.xlu0 %698 }
 0x299   :  { %v362_v16 = vpop.f32.mrf.mxu1 }
 0x29a   :  { %v443_v17 = vmul.f32 0.35355338, %v362_v16 }
 0x29b   :  { %v6437_v18 = vpop.f32.mrf.mxu1 }
 0x29c   :  { %v445_v19 = vsel %vm291_vm2, %v443_v17, -inf }
 0x29d   :  { %446 = vmax.xlane.f32.xlu0 %v445_v19  ;;  %v439_v20 = vpop.f32.mrf.mxu1 }
 0x29e   :  { %v444_v21 = vmul.f32 0.35355338, %v439_v20 }
 0x29f   :  { %v6442_v22 = vpop.f32.mrf.mxu1 }
 0x2a0   :  { %v448_v23 = vsel %vm291_vm2, %v444_v21, -inf }
 0x2a1   :  { %449 = vmax.xlane.f32.xlu1 %v448_v23 }
 0x2b3   :  { %467 = vrot.lane.b32.xlu0 %v7250_v8, %s7054_s21 }
 0x2b7   :  { %620 = vrot.lane.b32.xlu0 %v7250_v8, %s7076_s29 }
 0x326   :  { %v447_v25 = vpop.xlane.xlu0 %446 }
 0x327   :  { %v451_v32 = vsub.f32 %v443_v17, %v447_v25 }
 0x329   :  { %v453_v33 = vmul.f32 1.442695, %v451_v32 }
 0x32a   :  { %v450_v26 = vpop.xlane.xlu1 %449  ;;  %v468_v27 = vpop.permute.xlu0 %467 }
 0x32b   :  { %v452_v28 = vsub.f32 %v444_v21, %v450_v26  ;;  %6444 = vmatpush3.msra.mxu1 %v468_v27  ;;  %v285_v21 = vld [vmem:[#allocation7 + $0x4] sm:$0xf] }
 0x32c   :  { %6453 = vmatprep.subr.mxu1 %v7073_v0  ;;  %v958_v22 = vsel %vm956_vm3, %v285_v21, 0 }
 0x32d   :  { %v455_v29 = vmul.f32 1.442695, %v452_v28 }
 0x32e   :  { %v621_v44 = vpop.permute.xlu0 %620 }
 0x32f   :  { %6697 = vpow2.f32 %v455_v29 }
 0x330   :  { %6699 = vpow2.f32 %v453_v33 }
 0x33c   :  { %v6698_v30 = vpop.eup %6697 }
 0x33d   :  { %v460_v31 = vsel %vm291_vm2, %v6698_v30, 0.0  ;;  %v6700_v34 = vpop.eup %6699 }
 0x33e   :  { %461 = vadd.xlane.f32.xlu1 %v460_v31  ;;  %v457_v35 = vsel %vm291_vm2, %v6700_v34, 0.0 }
 0x34f   :  { %700 = vrot.lane.b32.xlu1 %v7254_v11, %s7077_s9 }
 0x373   :  { %458 = vadd.xlane.f32.xlu1 %v457_v35 }
 0x384   :  { %622 = vrot.lane.b32.xlu1 %v7250_v8, %s7077_s9 }
 0x388   :  { %1003 = vrot.lane.b32.xlu1 %v7250_v8, %s7078_s3 }
 0x3c7   :  { %v462_v36 = vpop.xlane.xlu1 %461 }
 0x3c8   :  { %6701 = vrcp.f32 %v462_v36 }
 0x3cb   :  { %v701_v39 = vpop.permute.xlu1 %700 }
 0x3d5   :  { %v6702_v37 = vpop.eup %6701 }
 0x3d6   :  { %v466_v38 = vmul.f32 %v6702_v37, %v6698_v30 }
 0x3d8   :  { %6451 = vmatmul.mubr.msk.f32.vlgmr.msra.gmra.mxu0 %vm291_vm2, %v466_v38 }
 0x3d9   :  { %6459 = vmatpush3.xpose.msk.msra.mxu0 %vm291_vm2, %v701_v39  ;;  %6460 = vmatprep.mubr.msk.f32.mxu0 %vm7074_vm0, %v7073_v0 }
 0x3da   :  { %6468 = vmatprep.subr.mxu0 %v7073_v0 }
 0x3dc   :  { %6461 = vmatmul.mubr.msk.f32.vlgmr.msra.gmra.mxu0 %vm291_vm2, %v699_v24 }
 0x3dd   :  { %6470 = vmatprep.mubr.msk.f32.mxu0 %vm7074_vm0, %v7073_v0 }
 0x3fc   :  { %v459_v40 = vpop.xlane.xlu1 %458 }
 0x3fd   :  { %6703 = vrcp.f32 %v459_v40 }
 0x400   :  { %v623_v43 = vpop.permute.xlu1 %622 }
 0x404   :  { %v1004_v13 = vpop.permute.xlu1 %1003 }
 0x40a   :  { %v6704_v41 = vpop.eup %6703 }
 0x40b   :  { %v464_v42 = vmul.f32 %v6704_v41, %v6700_v34 }
 0x40d   :  { %6446 = vmatmul.mubr.msk.f32.vlgmr.msra.gmra.mxu1 %vm291_vm2, %v464_v42 }
 0x40e   :  { %6454 = vmatpush3.xpose.msk.msra.mxu1 %vm291_vm2, %v623_v43  ;;  %6455 = vmatprep.mubr.msk.f32.mxu1 %vm7074_vm0, %v7073_v0 }
 0x40f   :  { %6463 = vmatprep.subr.mxu1 %v7073_v0 }
 0x411   :  { %6456 = vmatmul.mubr.msk.f32.vlgmr.msra.gmra.mxu1 %vm291_vm2, %v621_v44 }
 0x412   :  { %6465 = vmatprep.mubr.msk.f32.mxu1 %vm7074_vm0, %v7073_v0 }
 0x498   :  { %v7306_v45 = vpop.f32.mrf.mxu0 }
 0x49a   :  { %v6452_v46 = vpop.f32.mrf.mxu0 }
 0x49c   :  { %v772_v47 = vpop.f32.mrf.mxu0 }
 0x49d   :  { %v777_v48 = vmul.f32 0.35355338, %v772_v47 }
 0x49e   :  { %v6462_v49 = vpop.f32.mrf.mxu0 }
 0x49f   :  { %v781_v50 = vsel %vm291_vm2, %v777_v48, -inf }
 0x4a0   :  { %782 = vmax.xlane.f32.xlu0 %v781_v50 }
 0x4b6   :  { %876 = vrot.lane.b32.xlu0 %v7254_v11, %s7079_s22 }
 0x4ba   :  { %1001 = vrot.lane.b32.xlu0 %v7250_v8, %s7080_s24 }
 0x4be   :  { %1081 = vrot.lane.b32.xlu0 %v7254_v11, %s7078_s3 }
 0x4cd   :  { %v7315_v51 = vpop.f32.mrf.mxu1 }
 0x4ce   :  { %v619_v52 = vpack.c.bf16 %v7306_v45, %v7315_v51 }
 0x4cf   :  { %v6447_v53 = vpop.f32.mrf.mxu1 }
 0x4d1   :  { %v694_v54 = vpop.f32.mrf.mxu1 }
 0x4d2   :  { %v776_v56 = vmul.f32 0.35355338, %v694_v54 }
 0x4d3   :  { %v6457_v55 = vpop.f32.mrf.mxu1 }
 0x4d4   :  { %v778_v57 = vsel %vm291_vm2, %v776_v56, -inf }
 0x4dd   :  { %779 = vmax.xlane.f32.xlu0 %v778_v57 }
 0x4f3   :  { %800 = vrot.lane.b32.xlu0 %v7250_v8, %s7079_s22 }
 0x4f7   :  { %1181 = vrot.lane.b32.xlu0 %v7250_v8, %s7081_s25 }
 0x4fb   :  { %1336 = vrot.lane.b32.xlu0 %v7250_v8, %s7082_s5 }
 0x4ff   :  { %1414 = vrot.lane.b32.xlu0 %v7254_v11, %s7082_s5 }
 0x503   :  { %1334 = vrot.lane.b32.xlu0 %v7250_v8, %s7083_s6 }
 0x507   :  { %1412 = vrot.lane.b32.xlu0 %v7254_v11, %s7083_s6 }
 0x529   :  { %v783_v58 = vpop.xlane.xlu0 %782 }
 0x52a   :  { %v785_v59 = vsub.f32 %v777_v48, %v783_v58 }
 0x52c   :  { %v788_v60 = vmul.f32 1.442695, %v785_v59 }
 0x52d   :  { %v877_v61 = vpop.permute.xlu0 %876 }
 0x52e   :  { %6705 = vpow2.f32 %v788_v60  ;;  %6469 = vmatpush3.msra.mxu0 %v877_v61 }
 0x52f   :  { %6479 = vmatprep.subr.mxu0 %v7073_v0 }
 0x531   :  { %v1002_v1 = vpop.permute.xlu0 %1001 }
 0x535   :  { %v1082_v2 = vpop.permute.xlu0 %1081 }
 0x53b   :  { %v6706_v62 = vpop.eup %6705 }
 0x53c   :  { %v793_v63 = vsel %vm291_vm2, %v6706_v62, 0.0 }
 0x53d   :  { %794 = vadd.xlane.f32.xlu1 %v793_v63 }
 0x54e   :  { %1079 = vrot.lane.b32.xlu1 %v7254_v11, %s7080_s24 }
 0x566   :  { %v780_v5 = vpop.xlane.xlu0 %779 }
 0x567   :  { %v784_v6 = vsub.f32 %v776_v56, %v780_v5 }
 0x569   :  { %v786_v7 = vmul.f32 1.442695, %v784_v6 }
 0x56a   :  { %v801_v9 = vpop.permute.xlu0 %800 }
 0x56b   :  { %6707 = vpow2.f32 %v786_v7  ;;  %6464 = vmatpush3.msra.mxu1 %v801_v9 }
 0x56c   :  { %6473 = vmatprep.subr.bf16.mxu1 %v7073_v0 }
 0x56e   :  { %v1182_v36 = vpop.permute.xlu0 %1181 }
 0x572   :  { %v1337_v56 = vpop.permute.xlu0 %1336 }
 0x576   :  { %v1415_v58 = vpop.permute.xlu0 %1414 }
 0x578   :  { %v6708_v10 = vpop.eup %6707 }
 0x579   :  { %v790_v12 = vsel %vm291_vm2, %v6708_v10, 0.0 }
 0x57a   :  { %791 = vadd.xlane.f32.xlu1 %v790_v12 }
 0x5c6   :  { %v795_v14 = vpop.xlane.xlu1 %794 }
 0x5c7   :  { %6709 = vrcp.f32 %v795_v14 }
 0x5ca   :  { %v1080_v17 = vpop.permute.xlu1 %1079 }
 0x5d4   :  { %v6710_v15 = vpop.eup %6709 }
 0x5d5   :  { %v799_v16 = vmul.f32 %v6710_v15, %v6706_v62  ;;  %v1335_v62 = vpop.permute.xlu0 %1334 }
 0x5d7   :  { %6471 = vmatmul.mubr.msk.f32.vlgmr.msra.gmra.mxu0 %vm291_vm2, %v799_v16 }
 0x5d8   :  { %6480 = vmatpush3.xpose.msk.msra.mxu0 %vm291_vm2, %v1004_v13  ;;  %6481 = vmatprep.mubr.msk.f32.mxu0 %vm7074_vm0, %v7073_v0 }
 0x5d9   :  { %6484 = vmatprep.subr.mxu0 %v7073_v0 }
 0x5db   :  { %6482 = vmatmul.mubr.msk.f32.vlgmr.msra.gmra.mxu0 %vm291_vm2, %v1002_v1  ;;  %v1413_v1 = vpop.permute.xlu0 %1412 }
 0x5dc   :  { %6485 = vmatpush3.xpose.msk.msra.mxu0 %vm291_vm2, %v1082_v2  ;;  %6486 = vmatprep.mubr.msk.f32.mxu0 %vm7074_vm0, %v7073_v0 }
 0x5dd   :  { %6494 = vmatprep.subr.mxu0 %v7073_v0 }
 0x5df   :  { %6487 = vmatmul.mubr.msk.f32.vlgmr.msra.gmra.mxu0 %vm291_vm2, %v1080_v17 }
 0x5e0   :  { %6496 = vmatprep.mubr.msk.f32.mxu0 %vm7074_vm0, %v7073_v0 }
 0x603   :  { %v792_v18 = vpop.xlane.xlu1 %791 }
 0x604   :  { %6711 = vrcp.f32 %v792_v18 }
 0x611   :  { %v6712_v19 = vpop.eup %6711 }
 0x612   :  { %v797_v20 = vmul.f32 %v6712_v19, %v6708_v10 }
 0x614   :  { %6466 = vmatmul.mubr.msk.f32.vlgmr.msra.gmra.mxu1 %vm291_vm2, %v797_v20 }
 0x615   :  { %6475 = vmatprep.mubr.msk.bf16.mxu1 %vm7074_vm0, %v7073_v0  ;;  %6474 = vmatpush3.bf16.msra.mxu1 %v958_v22 }
 0x616   :  { %6489 = vmatprep.subr.mxu1 %v7073_v0 }
 0x697   :  { %v948_v23 = vpop.f32.mrf.mxu0 }
 0x699   :  { %v6472_v24 = vpop.f32.mrf.mxu0 }
 0x69b   :  { %v1075_v25 = vpop.f32.mrf.mxu0 }
 0x69c   :  { %v1157_v26 = vmul.f32 0.35355338, %v1075_v25 }
 0x69d   :  { %v6483_v27 = vpop.f32.mrf.mxu0 }
 0x69e   :  { %v1159_v28 = vsel %vm291_vm2, %v1157_v26, -inf }
 0x69f   :  { %1160 = vmax.xlane.f32.xlu1 %v1159_v28  ;;  %v1153_v29 = vpop.f32.mrf.mxu0 }
 0x6a0   :  { %v1158_v30 = vmul.f32 0.35355338, %v1153_v29 }
 0x6a1   :  { %v6488_v31 = vpop.f32.mrf.mxu0 }
 0x6a2   :  { %v1162_v32 = vsel %vm291_vm2, %v1158_v30, -inf }
 0x6a3   :  { %1163 = vmax.xlane.f32.xlu1 %v1162_v32 }
 0x6d4   :  { %v872_v33 = vpop.f32.mrf.mxu1 }
 0x6d5   :  { %v952_v34 = vpack.c.bf16 %v948_v23, %v872_v33 }
 0x6d6   :  { %v6467_v35 = vpop.f32.mrf.mxu1 }
 0x6d7   :  { %6476 = vmatmul.mubr.msk.bf16.vlgmr.msra.gmra.mxu1 %vm291_vm2, %v952_v34  ;;  %v284_v35 = vld [vmem:[#allocation7] sm:$0xf] }
 0x6d8   :  { %6490 = vmatpush3.msra.mxu1 %v1182_v36  ;;  %6491 = vmatprep.mubr.msk.f32.mxu1 %vm7074_vm0, %v7073_v0  ;;  %v1718_v36 = vsel %vm956_vm3, %v284_v35, 0 }
 0x6d9   :  { %6499 = vmatprep.subr.mxu1 %v7073_v0 }
 0x728   :  { %v1161_v37 = vpop.xlane.xlu1 %1160 }
 0x729   :  { %v1165_v38 = vsub.f32 %v1157_v26, %v1161_v37  ;;  %v287_v37 = vld [vmem:[#allocation7 + $0xc] sm:$0xf] }
 0x72b   :  { %v1167_v39 = vmul.f32 1.442695, %v1165_v38  ;;  %v1671_v38 = vsel %vm956_vm3, %v287_v37, 0  ;;  %v7085_v37 = vmov 0  }
 0x72c   :  { %v1164_v40 = vpop.xlane.xlu1 %1163 }
 0x72d   :  { %6713 = vpow2.f32 %v1167_v39  ;;  %v1166_v41 = vsub.f32 %v1158_v30, %v1164_v40 }
 0x72f   :  { %v1169_v42 = vmul.f32 1.442695, %v1166_v41  ;;  %v286_v41 = vld [vmem:[#allocation7 + $0x8] sm:$0xf] }
 0x731   :  { %6715 = vpow2.f32 %v1169_v42 }
 0x73a   :  { %v6714_v43 = vpop.eup %6713 }
 0x73b   :  { %v1171_v44 = vsel %vm291_vm2, %v6714_v43, 0.0 }
 0x73c   :  { %1172 = vadd.xlane.f32.xlu1 %v1171_v44  ;;  %v1765_v44 = vsel %vm956_vm3, %v286_v41, 0 }
 0x73e   :  { %v6716_v46 = vpop.eup %6715 }
 0x73f   :  { %v1174_v47 = vsel %vm291_vm2, %v6716_v46, 0.0 }
 0x740   :  { %1175 = vadd.xlane.f32.xlu1 %v1174_v47 }
 0x751   :  { %1257 = vrot.lane.b32.xlu1 %v7254_v11, %s7081_s25 }
 0x797   :  { %v7366_v48 = vpop.f32.mrf.mxu1 }
 0x799   :  { %v6477_v49 = vpop.f32.mrf.mxu1 }
 0x79b   :  { %v7368_v50 = vpop.f32.mrf.mxu1 }
 0x79d   :  { %v6478_v53 = vpop.f32.mrf.mxu1 }
 0x7c5   :  { %v1173_v54 = vpop.xlane.xlu1 %1172 }
 0x7c6   :  { %6717 = vrcp.f32 %v1173_v54 }
 0x7c9   :  { %v1176_v55 = vpop.xlane.xlu1 %1175 }
 0x7ca   :  { %6719 = vrcp.f32 %v1176_v55 }
 0x7cd   :  { %v1258_v57 = vpop.permute.xlu1 %1257 }
 0x7ce   :  { %6495 = vmatpush3.msra.mxu0 %v1258_v57 }
 0x7cf   :  { %6504 = vmatprep.subr.mxu0 %v7073_v0 }
 0x7d3   :  { %v6718_v59 = vpop.eup %6717 }
 0x7d4   :  { %v1178_v60 = vmul.f32 %v6718_v59, %v6714_v43 }
 0x7d6   :  { %6492 = vmatmul.mubr.msk.f32.vlgmr.msra.gmra.mxu1 %vm291_vm2, %v1178_v60  ;;  %v6142_v60 = vld [vmem:[%s7964_s4] ss:$0 sm:$0xff] }
 0x7d7   :  { %v6720_v61 = vpop.eup %6719  ;;  %6500 = vmatpush3.xpose.msk.msra.mxu1 %vm291_vm2, %v1337_v56  ;;  %6501 = vmatprep.mubr.msk.f32.mxu1 %vm7074_vm0, %v7073_v0 }
 0x7d8   :  { %v1180_v63 = vmul.f32 %v6720_v61, %v6716_v46  ;;  %6509 = vmatprep.subr.mxu1 %v7073_v0 }
 0x7da   :  { %6497 = vmatmul.mubr.msk.f32.vlgmr.msra.gmra.mxu0 %vm291_vm2, %v1180_v63  ;;  %6502 = vmatmul.mubr.msk.f32.vlgmr.msra.gmra.mxu1 %vm291_vm2, %v1335_v62 }
 0x7db   :  { %6505 = vmatpush3.xpose.msk.msra.mxu0 %vm291_vm2, %v1415_v58  ;;  %6506 = vmatprep.mubr.msk.f32.mxu0 %vm7074_vm0, %v7073_v0 }
 0x7dc   :  { %6514 = vmatprep.subr.mxu0 %v7073_v0  ;;  %6511 = vmatprep.mubr.msk.f32.mxu1 %vm7074_vm0, %v7073_v0 }
 0x7de   :  { %6507 = vmatmul.mubr.msk.f32.vlgmr.msra.gmra.mxu0 %vm291_vm2, %v1413_v1 }
 0x7df   :  { %6516 = vmatprep.mubr.msk.f32.mxu0 %vm7074_vm0, %v7073_v0 }
 0x896   :  { %v7387_v2 = vpop.f32.mrf.mxu1 }
 0x898   :  { %v6493_v5 = vpop.f32.mrf.mxu1 }
 0x89a   :  { %v7389_v6 = vpop.f32.mrf.mxu0  ;;  %v1408_v7 = vpop.f32.mrf.mxu1 }
 0x89b   :  { %v1333_v9 = vpack.c.bf16 %v7389_v6, %v7387_v2  ;;  %v1490_v10 = vmul.f32 0.35355338, %v1408_v7 }
 0x89c   :  { %v6498_v12 = vpop.f32.mrf.mxu0  ;;  %v6503_v13 = vpop.f32.mrf.mxu1 }
 0x89d   :  { %v1492_v14 = vsel %vm291_vm2, %v1490_v10, -inf }
 0x89e   :  { %1493 = vmax.xlane.f32.xlu1 %v1492_v14  ;;  %v1486_v15 = vpop.f32.mrf.mxu0 }
 0x89f   :  { %v1491_v16 = vmul.f32 0.35355338, %v1486_v15 }
 0x8a0   :  { %v6508_v17 = vpop.f32.mrf.mxu0 }
 0x8a1   :  { %v1495_v18 = vsel %vm291_vm2, %v1491_v16, -inf }
 0x8a2   :  { %1496 = vmax.xlane.f32.xlu0 %v1495_v18 }
 0x927   :  { %v1494_v19 = vpop.xlane.xlu1 %1493 }
 0x928   :  { %v1498_v20 = vsub.f32 %v1490_v10, %v1494_v19 }
 0x92a   :  { %v1500_v21 = vmul.f32 1.442695, %v1498_v20 }
 0x92b   :  { %v1497_v22 = vpop.xlane.xlu0 %1496 }
 0x92c   :  { %6721 = vpow2.f32 %v1500_v21  ;;  %v1499_v23 = vsub.f32 %v1491_v16, %v1497_v22  ;;  %v1883_v21 = vld [vmem:[#allocation11 + $0x80] sm:$0xff] }
 0x92d   :  { %v1891_v22 = vld [vmem:[#allocation11 + $0xc0] sm:$0xff] }
 0x92e   :  { %v1502_v24 = vmul.f32 1.442695, %v1499_v23  ;;  %v6162_v23 = vcombine.high %v1883_v21, %v1891_v22 }
 0x930   :  { %6723 = vpow2.f32 %v1502_v24  ;;  %v1892_v24 = vld [vmem:[#allocation11 + $0xc8] sm:$0xff] }
 0x939   :  { %v6722_v25 = vpop.eup %6721 }
 0x93a   :  { %v1504_v26 = vsel %vm291_vm2, %v6722_v25, 0.0 }
 0x93b   :  { %1505 = vadd.xlane.f32.xlu0 %v1504_v26 }
 0x93d   :  { %v6724_v27 = vpop.eup %6723 }
 0x93e   :  { %v1507_v28 = vsel %vm291_vm2, %v6724_v27, 0.0 }
 0x93f   :  { %1508 = vadd.xlane.f32.xlu1 %v1507_v28  ;;  %v1867_v28 = vld [vmem:[#allocation11] sm:$0xff] }
 0x950   :  { %1590 = vrot.lane.b32.xlu1 %v7254_v11, %s7084_s26 }
 0x951   :  { %1514 = vrot.lane.b32.xlu0 %v7250_v8, %s7084_s26 }
 0x9c4   :  { %v1506_v29 = vpop.xlane.xlu0 %1505 }
 0x9c5   :  { %6725 = vrcp.f32 %v1506_v29  ;;  %v1875_v29 = vld [vmem:[#allocation11 + $0x40] sm:$0xff] }
 0x9c8   :  { %v1509_v30 = vpop.xlane.xlu1 %1508  ;;  %v1515_v31 = vpop.permute.xlu0 %1514 }
 0x9c9   :  { %6727 = vrcp.f32 %v1509_v30  ;;  %6510 = vmatpush3.msra.mxu1 %v1515_v31  ;;  %v1868_v30 = vld [vmem:[#allocation11 + $0x8] sm:$0xff]  ;;  %v6146_v31 = vcombine.high %v1867_v28, %v1875_v29 }
 0x9ca   :  { %6519 = vmatprep.subr.bf16.mxu1 %v7073_v0 }
 0x9cc   :  { %v1591_v32 = vpop.permute.xlu1 %1590 }
 0x9cd   :  { %6515 = vmatpush3.msra.mxu0 %v1591_v32  ;;  %v1876_v32 = vld [vmem:[#allocation11 + $0x48] sm:$0xff] }
 0x9ce   :  { %6525 = vmatprep.subr.bf16.mxu0 %v7073_v0  ;;  %v6148_v35 = vcombine.high %v1868_v30, %v1876_v32 }
 0x9d2   :  { %v6726_v33 = vpop.eup %6725 }
 0x9d3   :  { %v1511_v34 = vmul.f32 %v6726_v33, %v6722_v25  ;;  %v6161_v25 = vcombine.low %v1883_v21, %v1891_v22  ;;  %v6145_v33 = vcombine.low %v1867_v28, %v1875_v29  ;;  %v1889_v22 = vld [vmem:[#allocation11 + $0xb0] sm:$0xff] }
 0x9d4   :  { %v1873_v29 = vld [vmem:[#allocation11 + $0x30] sm:$0xff] }
 0x9d5   :  { %6512 = vmatmul.mubr.msk.f32.vlgmr.msra.gmra.mxu1 %vm291_vm2, %v1511_v34  ;;  %v6147_v34 = vcombine.low %v1868_v30, %v1876_v32  ;;  %v1881_v30 = vld [vmem:[#allocation11 + $0x70] sm:$0xff]  ;;  %v1882_v32 = vld [vmem:[#allocation11 + $0x78] sm:$0xff] }
 0x9d6   :  { %v6728_v11 = vpop.eup %6727  ;;  %6521 = vmatprep.mubr.msk.bf16.mxu1 %vm7074_vm0, %v7073_v0  ;;  %6520 = vmatpush3.bf16.msra.mxu1 %v1671_v38 }
 0x9d7   :  { %v1513_v8 = vmul.f32 %v6728_v11, %v6724_v27  ;;  %6531 = vmatprep.subr.bf16.mxu1 %v7073_v0  ;;  %v1885_v11 = vld [vmem:[#allocation11 + $0x90] sm:$0xff] }
 0x9d9   :  { %6517 = vmatmul.mubr.msk.f32.vlgmr.msra.gmra.mxu0 %vm291_vm2, %v1513_v8  ;;  %v1893_v8 = vld [vmem:[#allocation11 + $0xd0] sm:$0xff] }
 0x9da   :  { %6526 = vmatpush3.bf16.msra.mxu0 %v1718_v36  ;;  %6527 = vmatprep.mubr.msk.bf16.mxu0 %vm7074_vm0, %v7073_v0  ;;  %v1886_v36 = vld [vmem:[#allocation11 + $0x98] sm:$0xff]  ;;  %v6166_v38 = vcombine.high %v1885_v11, %v1893_v8 }
 0x9db   :  { %2158 = vmatprep.subr.bf16.mxu0 %v6162_v23  ;;  %v1890_v23 = vld [vmem:[#allocation11 + $0xb8] sm:$0xff] }
 0x9dd   :  { %6528 = vmatmul.mubr.msk.bf16.vlgmr.msra.gmra.mxu0 %vm291_vm2, %v619_v52 }
 0x9de   :  { %2159 = vmatpush1.bf16.msra.mxu0 %v6161_v25  ;;  %2178 = vmatprep.mubr.bf16.mxu0 %v7085_v37 }
 0x9df   :  { %2160 = vmatprep.subr.bf16.mxu0 %v6146_v31  ;;  %v1874_v31 = vld [vmem:[#allocation11 + $0x38] sm:$0xff] }
 0x9e2   :  { %2161 = vmatpush1.bf16.msra.mxu0 %v6145_v33 }
 0x9e3   :  { %2244 = vmatprep.subr.bf16.mxu0 %v6166_v38  ;;  %v2555_v38 = vld [vmem:[#allocation14 + $0x88] sm:$0xff] }
 0xa95   :  { %v1586_v39 = vpop.f32.mrf.mxu1 }
 0xa97   :  { %v6513_v40 = vpop.f32.mrf.mxu1 }
 0xa98   :  { %v6165_v40 = vcombine.low %v1885_v11, %v1893_v8  ;;  %v6160_v11 = vcombine.high %v1874_v31, %v1882_v32  ;;  %v2554_v8 = vld [vmem:[#allocation14 + $0x80] sm:$0xff] }
 0xa99   :  { %v1662_v42 = vpop.f32.mrf.mxu0 }
 0xa9a   :  { %v1666_v43 = vpack.c.bf16 %v1662_v42, %v1586_v39  ;;  %v1894_v39 = vld [vmem:[#allocation11 + $0xd8] sm:$0xff] }
 0xa9b   :  { %v6518_v46 = vpop.f32.mrf.mxu0  ;;  %v6167_v41 = vcombine.low %v1886_v36, %v1894_v39  ;;  %v6168_v42 = vcombine.high %v1886_v36, %v1894_v39  ;;  %v2562_v36 = vld [vmem:[#allocation14 + $0xc0] sm:$0xff]  ;;  %v2563_v39 = vld [vmem:[#allocation14 + $0xc8] sm:$0xff] }
 0xa9c   :  { %6522 = vmatmul.mubr.msk.bf16.vlgmr.msra.gmra.mxu1 %vm291_vm2, %v1666_v43 }
 0xa9d   :  { %v1754_v47 = vpop.f32.mrf.mxu0  ;;  %6532 = vmatpush3.bf16.msra.mxu1 %v1765_v44  ;;  %6533 = vmatprep.mubr.msk.bf16.mxu1 %vm7074_vm0, %v7073_v0 }
 0xa9e   :  { %v1755_v57 = vadd.f32 %v1754_v47, %v7366_v48 }
 0xa9f   :  { %v6529_v45 = vpop.f32.mrf.mxu0 }
 0xaa1   :  { %v1757_v51 = vpop.f32.mrf.mxu0 }
 0xaa2   :  { %v1758_v63 = vadd.f32 %v1757_v51, %v7368_v50 }
 0xaa3   :  { %v6530_v52 = vpop.f32.mrf.mxu0 }
 0xaa4   :  { %6534 = vmatmul.mubr.msk.bf16.vlgmr.msra.gmra.mxu1 %vm291_vm2, %v1333_v9 }
 0xaa5   :  { %2221 = vmatprep.mubr.bf16.mxu1 %v7085_v37 }
 0xb5c   :  { %v1707_v49 = vpop.f32.mrf.mxu1 }
 0xb5e   :  { %v6523_v53 = vpop.f32.mrf.mxu1 }
 0xb5f   :  { %v6143_v53 = vld [vmem:[#allocation8] ss:$0 sm:$0xff] }
 0xb60   :  { %v1710_v54 = vpop.f32.mrf.mxu1 }
 0xb62   :  { %v6524_v55 = vpop.f32.mrf.mxu1 }
 0xb64   :  { %v1801_v56 = vpop.f32.mrf.mxu1 }
 0xb65   :  { %v1802_v58 = vadd.f32 %v1801_v56, %v1707_v49 }
 0xb66   :  { %v6535_v59 = vpop.f32.mrf.mxu1 }
 0xb67   :  { %v1808_v61 = vadd.f32 %v1802_v58, %v1755_v57  ;;  %v6144_v57 = vld [vmem:[#allocation10] ss:$0 sm:$0xff]  ;;  %v1869_v59 = vld [vmem:[#allocation11 + $0x10] sm:$0xff] }
 0xb68   :  { %v1804_v62 = vpop.f32.mrf.mxu1 }
 0xb69   :  { %v1805_v1 = vadd.f32 %v1804_v62, %v1710_v54  ;;  %v1817_v2 = vadd.f32 %v6142_v60, %v1808_v61  ;;  %v1870_v61 = vld [vmem:[#allocation11 + $0x18] sm:$0xff] }
 0xb6a   :  { %v6536_v5 = vpop.f32.mrf.mxu1  ;;  %v1878_v62 = vld [vmem:[#allocation11 + $0x58] sm:$0xff] }
 0xb6b   :  { %v1809_v6 = vadd.f32 %v1805_v1, %v1758_v63  ;;  %v1819_v7 = vadd.f32 %v1817_v2, %v7236_v3 }
 0xb6d   :  { %v1823_v9 = vsel %vm239_vm1, %v1819_v7, 0.0  ;;  %v1818_v10 = vadd.f32 %v6142_v60, %v1809_v6  ;;  %v1877_v60 = vld [vmem:[#allocation11 + $0x50] sm:$0xff]  ;;  %v6152_v6 = vcombine.high %v1870_v61, %v1878_v62 }
 0xb6e   :  { %1824 = vadd.xlane.f32.xlu1 %v1823_v9  ;;  %v6150_v5 = vcombine.high %v1869_v59, %v1877_v60  ;;  %v1895_v9 = vld [vmem:[#allocation11 + $0xe0] sm:$0xff] }
 0xb6f   :  { %v1820_v48 = vadd.f32 %v1818_v10, %v7238_v4  ;;  %v1884_v4 = vld [vmem:[#allocation11 + $0x88] sm:$0xff] }
 0xb70   :  { %v6163_v26 = vcombine.low %v1884_v4, %v1892_v24  ;;  %v6164_v27 = vcombine.high %v1884_v4, %v1892_v24  ;;  %v1888_v10 = vld [vmem:[#allocation11 + $0xa8] sm:$0xff]  ;;  %v1897_v4 = vld [vmem:[#allocation11 + $0xf0] sm:$0xff]  ;;  %v1898_v24 = vld [vmem:[#allocation11 + $0xf8] sm:$0xff] }
 0xb71   :  { %v1826_v12 = vsel %vm239_vm1, %v1820_v48, 0.0  ;;  %v6176_v28 = vcombine.high %v1890_v23, %v1898_v24  ;;  %v6173_v33 = vcombine.low %v1889_v22, %v1897_v4 }
 0xb72   :  { %1827 = vadd.xlane.f32.xlu0 %v1826_v12  ;;  %2201 = vmatprep.subr.bf16.mxu1 %v6164_v27  ;;  %v6149_v12 = vcombine.low %v1869_v59, %v1877_v60  ;;  %v6174_v27 = vcombine.high %v1889_v22, %v1897_v4  ;;  %v7475_v60 = vld [vmem:[#allocation14 + $0xd8] sm:$0xff] }
 0xb73   :  { %2202 = vmatpush1.bf16.msra.mxu1 %v6163_v26 }
 0xb74   :  { %2203 = vmatprep.subr.bf16.mxu1 %v6148_v35  ;;  %v6158_v35 = vcombine.high %v1873_v29, %v1881_v30 }
 0xb77   :  { %2204 = vmatpush1.bf16.msra.mxu1 %v6147_v34  ;;  %v6175_v34 = vcombine.low %v1890_v23, %v1898_v24 }
 0xb78   :  { %2287 = vmatprep.subr.bf16.mxu1 %v6168_v42  ;;  %v6203_v42 = vcombine.high %v2554_v8, %v2562_v36 }
 0xbf7   :  { %v1825_v13 = vpop.xlane.xlu1 %1824 }
 0xbf8   :  { %v1830_v14 = vmul.f32 0.03125, %v1825_v13  ;;  %v6151_v13 = vcombine.low %v1870_v61, %v1878_v62 }
 0xbfa   :  { %v1832_v15 = vsub.f32 %v1819_v7, %v1830_v14  ;;  %v1887_v7 = vld [vmem:[#allocation11 + $0xa0] sm:$0xff] }
 0xbfb   :  { %v1828_v16 = vpop.xlane.xlu0 %1827  ;;  %v6170_v14 = vcombine.high %v1887_v7, %v1895_v9 }
 0xbfc   :  { %v1831_v50 = vmul.f32 0.03125, %v1828_v16  ;;  %v1834_v17 = vmul.f32 %v1832_v15, %v1832_v15  ;;  %v1871_v16 = vld [vmem:[#allocation11 + $0x20] sm:$0xff] }
 0xbfe   :  { %v1833_v18 = vsub.f32 %v1820_v48, %v1831_v50  ;;  %v1836_v19 = vsel %vm239_vm1, %v1834_v17, 0.0  ;;  %v1896_v48 = vld [vmem:[#allocation11 + $0xe8] sm:$0xff]  ;;  %v1879_v50 = vld [vmem:[#allocation11 + $0x60] sm:$0xff] }
 0xbff   :  { %1837 = vadd.xlane.f32.xlu0 %v1836_v19  ;;  %v1872_v17 = vld [vmem:[#allocation11 + $0x28] sm:$0xff]  ;;  %v6169_v19 = vcombine.low %v1887_v7, %v1895_v9  ;;  %v6153_v25 = vcombine.low %v1871_v16, %v1879_v50 }
 0xc00   :  { %v1835_v3 = vmul.f32 %v1833_v18, %v1833_v18 }
 0xc02   :  { %v1839_v20 = vsel %vm239_vm1, %v1835_v3, 0.0  ;;  %v6171_v3 = vcombine.low %v1888_v10, %v1896_v48 }
 0xc03   :  { %1840 = vadd.xlane.f32.xlu1 %v1839_v20  ;;  %v6154_v20 = vcombine.high %v1871_v16, %v1879_v50 }
 0xc88   :  { %v1838_v43 = vpop.xlane.xlu0 %1837 }
 0xc89   :  { %v1842_v44 = vmul.f32 0.03125, %v1838_v43  ;;  %v6205_v43 = vcombine.high %v2555_v38, %v2563_v39 }
 0xc8b   :  { %v1844_v46 = vadd.f32 1e-05, %v1842_v44  ;;  %v6202_v44 = vcombine.low %v2554_v8, %v2562_v36  ;;  %v7513_v36 = vld [vmem:[#allocation14 + $0x10] sm:$0xff] }
 0xc8c   :  { %v1841_v47 = vpop.xlane.xlu1 %1840 }
 0xc8d   :  { %6729 = vrsqrt.f32 %v1844_v46  ;;  %v1843_v45 = vmul.f32 0.03125, %v1841_v47  ;;  %v6204_v46 = vcombine.low %v2555_v38, %v2563_v39  ;;  %v2538_v47 = vld [vmem:[#allocation14] sm:$0xff]  ;;  %v7515_v38 = vld [vmem:[#allocation14 + $0x50] sm:$0xff] }
 0xc8f   :  { %v1845_v51 = vadd.f32 1e-05, %v1843_v45  ;;  %v2546_v45 = vld [vmem:[#allocation14 + $0x40] sm:$0xff] }
 0xc91   :  { %6731 = vrsqrt.f32 %v1845_v51  ;;  %v2539_v51 = vld [vmem:[#allocation14 + $0x8] sm:$0xff] }
 0xc9a   :  { %v6730_v52 = vpop.eup %6729 }
 0xc9b   :  { %v1848_v49 = vmul.f32 %v6730_v52, %v1832_v15  ;;  %v6172_v15 = vcombine.high %v1888_v10, %v1896_v48  ;;  %v6187_v52 = vcombine.high %v2538_v47, %v2546_v45 }
 0xc9d   :  { %v1856_v55 = vmul.f32 %v6143_v53, %v1848_v49  ;;  %v2547_v49 = vld [vmem:[#allocation14 + $0x48] sm:$0xff] }
 0xc9e   :  { %v6732_v54 = vpop.eup %6731 }
 0xc9f   :  { %v1849_v56 = vmul.f32 %v6732_v54, %v1833_v18  ;;  %v7437_v63 = vadd.f32 %v6144_v57, %v1856_v55  ;;  %v1880_v18 = vld [vmem:[#allocation11 + $0x68] sm:$0xff]  ;;  %v6188_v54 = vcombine.low %v2539_v51, %v2547_v49  ;;  %v6189_v55 = vcombine.high %v2539_v51, %v2547_v49 }
 0xca0   :  { %v6156_v21 = vcombine.high %v1872_v17, %v1880_v18  ;;  %v6155_v26 = vcombine.low %v1872_v17, %v1880_v18 }
 0xca1   :  { %v1857_v58 = vmul.f32 %v6143_v53, %v1849_v56  ;;  %v6186_v53 = vcombine.low %v2538_v47, %v2546_v45  ;;  %v7467_v56 = vld [vmem:[#allocation14 + $0x90] sm:$0xff] }
 0xca3   :  { %v7439_v1 = vadd.f32 %v6144_v57, %v1857_v58  ;;  %v7469_v57 = vld [vmem:[#allocation14 + $0xd0] sm:$0xff]  ;;  %v7471_v58 = vld [vmem:[#allocation14 + $0x98] sm:$0xff] }
 0xca4   :  { %v6207_v59 = vcombine.high %v7467_v56, %v7469_v57  ;;  %v6206_v61 = vcombine.low %v7467_v56, %v7469_v57  ;;  %v6208_v62 = vcombine.low %v7471_v58, %v7475_v60 }
 0xca5   :  { %v7443_v2 = vpack.c.bf16 %v7439_v1, %v7437_v63 }
 0xca7   :  { %6177 = vmatmul.mubr.msk.bf16.vlgmr.msra.gmra.mxu0 %vm239_vm1, %v7443_v2  ;;  %6178 = vmatmul.mubr.msk.bf16.vlgmr.msra.gmra.mxu1 %vm239_vm1, %v7443_v2 }
 0xca8   :  { %2245 = vmatpush1.bf16.msra.mxu0 %v6165_v40  ;;  %2288 = vmatpush1.bf16.msra.mxu1 %v6167_v41  ;;  %v6157_v40 = vcombine.low %v1873_v29, %v1881_v30  ;;  %v6159_v41 = vcombine.low %v1874_v31, %v1882_v32 }
 0xca9   :  { %2246 = vmatprep.subr.bf16.mxu0 %v6150_v5  ;;  %2289 = vmatprep.subr.bf16.mxu1 %v6152_v6  ;;  %v1903_v5 = vlaneseq }
 0xcaa   :  { %2264 = vmatprep.mubr.bf16.mxu0 %v7085_v37  ;;  %2307 = vmatprep.mubr.bf16.mxu1 %v7085_v37 }
 0xcab   :  { %v1904_v6 = vshrl.u32 %v1903_v5, 7 }
 0xcac   :  { %2247 = vmatpush1.bf16.msra.mxu0 %v6149_v12  ;;  %2290 = vmatpush1.bf16.msra.mxu1 %v6151_v13  ;;  %v7491_v12 = vld [vmem:[#allocation13] sm:$0xff] }
 0xcad   :  { %2330 = vmatprep.subr.bf16.mxu0 %v6170_v14  ;;  %2373 = vmatprep.subr.bf16.mxu1 %v6172_v15  ;;  %v7483_v7 = vsub.s32 1, %v1904_v6  ;;  %v7485_v9 = vsub.s32 3, %v1904_v6  ;;  %v7487_v10 = vsub.s32 0, %v1904_v6  ;;  %v7489_v48 = vsub.s32 2, %v1904_v6 }
 0xcae   :  { %v7503_v22 = vsub.s32 7, %v1904_v6 }
 0xcaf   :  { %6179 = vmatmul.mubr.msk.bf16.vlgmr.msra.gmra.mxu0 %vm239_vm1, %v7443_v2  ;;  %6180 = vmatmul.mubr.msk.bf16.vlgmr.msra.gmra.mxu1 %vm239_vm1, %v7443_v2  ;;  %v1910_v15 = vrot.slane %v7491_v12, %v7483_v7  ;;  %v1918_v16 = vrot.slane %v7491_v12, %v7485_v9  ;;  %v1906_v50 = vrot.slane %v7491_v12, %v7487_v10 }
 0xcb0   :  { %2331 = vmatpush1.bf16.msra.mxu0 %v6169_v19  ;;  %2374 = vmatpush1.bf16.msra.mxu1 %v6171_v3  ;;  %v1914_v17 = vrot.slane %v7491_v12, %v7489_v48  ;;  %v1934_v8 = vrot.slane %v7491_v12, %v7503_v22 }
 0xcb1   :  { %2332 = vmatprep.subr.bf16.mxu0 %v6154_v20  ;;  %2375 = vmatprep.subr.bf16.mxu1 %v6156_v21  ;;  %v7501_v21 = vsub.s32 5, %v1904_v6 }
 0xcb2   :  { %2350 = vmatprep.mubr.bf16.mxu0 %v7085_v37  ;;  %2393 = vmatprep.mubr.bf16.mxu1 %v7085_v37 }
 0xcb4   :  { %2333 = vmatpush1.bf16.msra.mxu0 %v6153_v25  ;;  %2376 = vmatpush1.bf16.msra.mxu1 %v6155_v26 }
 0xcb5   :  { %2416 = vmatprep.subr.bf16.mxu0 %v6174_v27  ;;  %2459 = vmatprep.subr.bf16.mxu1 %v6176_v28 }
 0xcb7   :  { %6181 = vmatmul.mubr.msk.bf16.vlgmr.msra.gmra.mxu0 %vm239_vm1, %v7443_v2  ;;  %6182 = vmatmul.mubr.msk.bf16.vlgmr.msra.gmra.mxu1 %vm239_vm1, %v7443_v2 }
 0xcb8   :  { %2417 = vmatpush1.bf16.msra.mxu0 %v6173_v33  ;;  %2460 = vmatpush1.bf16.msra.mxu1 %v6175_v34 }
 0xcb9   :  { %2418 = vmatprep.subr.bf16.mxu0 %v6158_v35  ;;  %2461 = vmatprep.subr.bf16.mxu1 %v6160_v11  ;;  %v1926_v11 = vrot.slane %v7491_v12, %v7501_v21 }
 0xcba   :  { %2436 = vmatprep.mubr.bf16.mxu0 %v7085_v37  ;;  %2479 = vmatprep.mubr.bf16.mxu1 %v7085_v37 }
 0xcbc   :  { %2419 = vmatpush1.bf16.msra.mxu0 %v6157_v40  ;;  %2462 = vmatpush1.bf16.msra.mxu1 %v6159_v41 }
 0xcbd   :  { %2749 = vmatprep.subr.bf16.mxu0 %v6203_v42  ;;  %2790 = vmatprep.subr.bf16.mxu1 %v6205_v43  ;;  %v7517_v43 = vld [vmem:[#allocation14 + $0x18] sm:$0xff] }
 0xcbf   :  { %6183 = vmatmul.mubr.msk.bf16.vlgmr.msra.gmra.mxu0 %vm239_vm1, %v7443_v2  ;;  %6184 = vmatmul.mubr.msk.bf16.vlgmr.msra.gmra.mxu1 %vm239_vm1, %v7443_v2  ;;  %v6209_v2 = vcombine.high %v7471_v58, %v7475_v60  ;;  %v2559_v60 = vld [vmem:[#allocation14 + $0xa8] sm:$0xff] }
 0xcc0   :  { %2750 = vmatpush1.bf16.xpose.msra.mxu0 %v6202_v44  ;;  %2791 = vmatpush1.bf16.xpose.msra.mxu1 %v6204_v46  ;;  %v7519_v44 = vld [vmem:[#allocation14 + $0x58] sm:$0xff] }
 0xcc1   :  { %2751 = vmatprep.subr.bf16.mxu0 %v6187_v52  ;;  %2792 = vmatprep.subr.bf16.mxu1 %v6189_v55  ;;  %v6193_v5 = vcombine.high %v7517_v43, %v7519_v44 }
 0xcc8   :  { %2752 = vmatpush1.bf16.xpose.msra.mxu0 %v6186_v53  ;;  %2793 = vmatpush1.bf16.xpose.msra.mxu1 %v6188_v54 }
 0xcc9   :  { %2831 = vmatprep.subr.bf16.mxu0 %v6207_v59  ;;  %2872 = vmatprep.subr.bf16.mxu1 %v6209_v2  ;;  %v6191_v2 = vcombine.high %v7513_v36, %v7515_v38 }
 0xd67   :  { %v2180_v13 = vpop.f32.mrf.mxu0  ;;  %v2223_v14 = vpop.f32.mrf.mxu1 }
 0xd68   :  { %v2181_v26 = vadd.f32 %v2180_v13, %v1906_v50  ;;  %v2224_v27 = vadd.f32 %v2223_v14, %v1914_v17 }
 0xd69   :  { %v2182_v18 = vpop.f32.mrf.mxu0  ;;  %v2225_v19 = vpop.f32.mrf.mxu1 }
 0xd6a   :  { %v2183_v4 = vadd.f32 %v2182_v18, %v1910_v15  ;;  %v2226_v23 = vadd.f32 %v2225_v19, %v1918_v16  ;;  %v2490_v46 = vmax.f32 %v2181_v26, 0.0  ;;  %v2492_v47 = vmax.f32 %v2224_v27, 0.0 }
 0xd6b   :  { %v2184_v3 = vpop.f32.mrf.mxu0  ;;  %v2227_v20 = vpop.f32.mrf.mxu1 }
 0xd6c   :  { %v2185_v24 = vadd.f32 %v2184_v3, %v1906_v50  ;;  %v2228_v25 = vadd.f32 %v2227_v20, %v1914_v17  ;;  %v2491_v39 = vmax.f32 %v2183_v4, 0.0  ;;  %v2493_v40 = vmax.f32 %v2226_v23, 0.0  ;;  %v7535_v3 = vld [vmem:[#allocation13 + $0x8] sm:$0xff]  ;;  %v7543_v23 = vld [vmem:[#allocation14 + $0xa0] sm:$0xff] }
 0xd6d   :  { %v2186_v28 = vpop.f32.mrf.mxu0  ;;  %v2229_v29 = vpop.f32.mrf.mxu1  ;;  %v1942_v4 = vrot.slane %v7535_v3, %v7483_v7 }
 0xd6e   :  { %v2187_v30 = vadd.f32 %v2186_v28, %v1910_v15  ;;  %v2230_v31 = vadd.f32 %v2229_v29, %v1918_v16  ;;  %v2506_v32 = vmax.f32 %v2185_v24, 0.0  ;;  %v2508_v33 = vmax.f32 %v2228_v25, 0.0  ;;  %v7545_v24 = vld [vmem:[#allocation14 + $0xe0] sm:$0xff] }
 0xd6f   :  { %v7505_v34 = vpop.f32.mrf.mxu0  ;;  %v7507_v35 = vpop.f32.mrf.mxu1  ;;  %v7525_v15 = vsub.s32 4, %v1904_v6  ;;  %v7527_v16 = vsub.s32 6, %v1904_v6  ;;  %v1950_v28 = vrot.slane %v7535_v3, %v7485_v9 }
 0xd70   :  { %v2507_v41 = vmax.f32 %v2187_v30, 0.0  ;;  %v2509_v42 = vmax.f32 %v2230_v31, 0.0  ;;  %v2522_v53 = vpack.c.bf16 %v2506_v32, %v2490_v46  ;;  %v2524_v54 = vpack.c.bf16 %v2508_v33, %v2492_v47 }
 0xd71   :  { %v2268_v45 = vpop.f32.mrf.mxu0  ;;  %v2311_v51 = vpop.f32.mrf.mxu1  ;;  %v1922_v25 = vrot.slane %v7491_v12, %v7525_v15  ;;  %v1930_v26 = vrot.slane %v7491_v12, %v7527_v16  ;;  %v6190_v32 = vcombine.low %v7513_v36, %v7515_v38  ;;  %v6192_v33 = vcombine.low %v7517_v43, %v7519_v44 }
 0xd72   :  { %v2523_v52 = vpack.c.bf16 %v2507_v41, %v2491_v39  ;;  %v2525_v49 = vpack.c.bf16 %v2509_v42, %v2493_v40  ;;  %v2269_v13 = vadd.f32 %v2268_v45, %v1926_v11  ;;  %v2312_v14 = vadd.f32 %v2311_v51, %v1934_v8 }
 0xd73   :  { %v2270_v55 = vpop.f32.mrf.mxu0  ;;  %v2313_v59 = vpop.f32.mrf.mxu1  ;;  %v6211_v12 = vcombine.high %v7543_v23, %v7545_v24  ;;  %v2267_v46 = vadd.f32 %v7505_v34, %v1922_v25  ;;  %v2310_v47 = vadd.f32 %v7507_v35, %v1930_v26 }
 0xd74   :  { %2769 = vmatprep.mubr.bf16.mxu0 %v2523_v52  ;;  %2810 = vmatprep.mubr.bf16.mxu1 %v2525_v49  ;;  %v2495_v56 = vmax.f32 %v2269_v13, 0.0  ;;  %v2497_v57 = vmax.f32 %v2312_v14, 0.0  ;;  %v2550_v13 = vld [vmem:[#allocation14 + $0x60] sm:$0xff]  ;;  %v2543_v14 = vld [vmem:[#allocation14 + $0x28] sm:$0xff] }
 0xd75   :  { %v2272_v50 = vpop.f32.mrf.mxu0  ;;  %v2315_v17 = vpop.f32.mrf.mxu1  ;;  %2770 = vmatmul.mubr.bf16.vlgmr.msra.gmra.mxu0 %v2522_v53  ;;  %2811 = vmatmul.mubr.bf16.vlgmr.msra.gmra.mxu1 %v2524_v54  ;;  %v2494_v35 = vmax.f32 %v2267_v46, 0.0  ;;  %v1966_v46 = vrot.slane %v7535_v3, %v7503_v22 }
 0xd76   :  { %v2273_v18 = vadd.f32 %v2272_v50, %v1926_v11  ;;  %v2316_v19 = vadd.f32 %v2315_v17, %v1934_v8  ;;  %2832 = vmatpush1.bf16.xpose.msra.mxu0 %v6206_v61  ;;  %2873 = vmatpush1.bf16.xpose.msra.mxu1 %v6208_v62  ;;  %v2567_v62 = vld [vmem:[#allocation14 + $0xe8] sm:$0xff]  ;;  %v2271_v11 = vadd.f32 %v2270_v55, %v1922_v25 }
 0xd77   :  { %v7537_v20 = vpop.f32.mrf.mxu0  ;;  %v7539_v6 = vpop.f32.mrf.mxu1  ;;  %2833 = vmatprep.subr.bf16.mxu0 %v6191_v2  ;;  %2874 = vmatprep.subr.bf16.mxu1 %v6193_v5  ;;  %v2314_v8 = vadd.f32 %v2313_v59, %v1930_v26  ;;  %v6213_v41 = vcombine.high %v2559_v60, %v2567_v62  ;;  %v2542_v59 = vld [vmem:[#allocation14 + $0x20] sm:$0xff]  ;;  %v2496_v2 = vmax.f32 %v2310_v47, 0.0  ;;  %v2551_v50 = vld [vmem:[#allocation14 + $0x68] sm:$0xff] }
 0xd78   :  { %v2511_v61 = vmax.f32 %v2273_v18, 0.0  ;;  %v2513_v58 = vmax.f32 %v2316_v19, 0.0  ;;  %v2510_v51 = vmax.f32 %v2271_v11, 0.0  ;;  %v6210_v19 = vcombine.low %v7543_v23, %v7545_v24  ;;  %v2560_v23 = vld [vmem:[#allocation14 + $0xb0] sm:$0xff] }
 0xd79   :  { %v2354_v27 = vpop.f32.mrf.mxu0  ;;  %v2397_v29 = vpop.f32.mrf.mxu1  ;;  %v2512_v52 = vmax.f32 %v2314_v8, 0.0  ;;  %v6195_v25 = vcombine.high %v2542_v59, %v2550_v13  ;;  %v6197_v26 = vcombine.high %v2543_v14, %v2551_v50  ;;  %v2568_v24 = vld [vmem:[#allocation14 + $0xf0] sm:$0xff]  ;;  %v1958_v11 = vrot.slane %v7535_v3, %v7501_v21 }
 0xd7a   :  { %v2527_v30 = vpack.c.bf16 %v2511_v61, %v2495_v56  ;;  %v2529_v31 = vpack.c.bf16 %v2513_v58, %v2497_v57  ;;  %v2355_v42 = vadd.f32 %v2354_v27, %v1942_v4  ;;  %v2398_v36 = vadd.f32 %v2397_v29, %v1950_v28 }
 0xd7b   :  { %v2356_v39 = vpop.f32.mrf.mxu0  ;;  %v7557_v40 = vpop.f32.mrf.mxu1  ;;  %v2528_v56 = vpack.c.bf16 %v2512_v52, %v2496_v2  ;;  %v6212_v58 = vcombine.low %v2559_v60, %v2567_v62  ;;  %v1938_v29 = vrot.slane %v7535_v3, %v7487_v10  ;;  %v2561_v60 = vld [vmem:[#allocation14 + $0xb8] sm:$0xff]  ;;  %v6214_v2 = vcombine.low %v2560_v23, %v2568_v24 }
 0xd7c   :  { %2851 = vmatprep.mubr.bf16.mxu0 %v2527_v30  ;;  %2892 = vmatprep.mubr.bf16.mxu1 %v2529_v31  ;;  %v2499_v54 = vmax.f32 %v2355_v42, 0.0  ;;  %v2501_v5 = vmax.f32 %v2398_v36, 0.0  ;;  %v2569_v62 = vld [vmem:[#allocation14 + $0xf8] sm:$0xff]  ;;  %v1946_v30 = vrot.slane %v7535_v3, %v7489_v48 }
 0xd7d   :  { %v2358_v38 = vpop.f32.mrf.mxu0  ;;  %v2401_v45 = vpop.f32.mrf.mxu1  ;;  %v6217_v47 = vcombine.high %v2561_v60, %v2569_v62  ;;  %v2353_v36 = vadd.f32 %v7537_v20, %v1938_v29  ;;  %v2545_v20 = vld [vmem:[#allocation14 + $0x38] sm:$0xff] }
 0xd7e   :  { %v2359_v43 = vadd.f32 %v2358_v38, %v1942_v4  ;;  %v2402_v44 = vadd.f32 %v2401_v45, %v1950_v28  ;;  %2834 = vmatpush1.bf16.xpose.msra.mxu0 %v6190_v32  ;;  %2875 = vmatpush1.bf16.xpose.msra.mxu1 %v6192_v33  ;;  %v2526_v4 = vpack.c.bf16 %v2510_v51, %v2494_v35 }
 0xd7f   :  { %v7563_v49 = vpop.f32.mrf.mxu0  ;;  %v7565_v53 = vpop.f32.mrf.mxu1  ;;  %2913 = vmatprep.subr.bf16.mxu0 %v6211_v12  ;;  %2954 = vmatprep.subr.bf16.mxu1 %v6213_v41  ;;  %v6194_v32 = vcombine.low %v2542_v59, %v2550_v13  ;;  %v2357_v33 = vadd.f32 %v2356_v39, %v1938_v29  ;;  %v6196_v12 = vcombine.low %v2543_v14, %v2551_v50 }
 0xd80   :  { %v2515_v55 = vmax.f32 %v2359_v43, 0.0  ;;  %v2517_v34 = vmax.f32 %v2402_v44, 0.0  ;;  %v6215_v41 = vcombine.high %v2560_v23, %v2568_v24  ;;  %v2400_v42 = vadd.f32 %v7557_v40, %v1946_v30 }
 0xd81   :  { %v2440_v18 = vpop.f32.mrf.mxu0  ;;  %v2483_v61 = vpop.f32.mrf.mxu1  ;;  %v2396_v45 = vadd.f32 %v7539_v6, %v1946_v30  ;;  %v2514_v39 = vmax.f32 %v2357_v33, 0.0  ;;  %v6216_v14 = vcombine.low %v2561_v60, %v2569_v62 }
 0xd82   :  { %v2531_v17 = vpack.c.bf16 %v2515_v55, %v2499_v54  ;;  %v2533_v57 = vpack.c.bf16 %v2517_v34, %v2501_v5  ;;  %v2441_v44 = vadd.f32 %v2440_v18, %v1958_v11  ;;  %v2516_v51 = vmax.f32 %v2400_v42, 0.0  ;;  %v2544_v55 = vld [vmem:[#allocation14 + $0x30] sm:$0xff]  ;;  %v2553_v5 = vld [vmem:[#allocation14 + $0x78] sm:$0xff] }
 0xd83   :  { %v7569_v27 = vpop.f32.mrf.mxu0  ;;  %v7571_v28 = vpop.f32.mrf.mxu1  ;;  %v2484_v52 = vadd.f32 %v2483_v61, %v1966_v46  ;;  %v2498_v54 = vmax.f32 %v2353_v36, 0.0  ;;  %v2552_v34 = vld [vmem:[#allocation14 + $0x70] sm:$0xff]  ;;  %v2500_v59 = vmax.f32 %v2396_v45, 0.0  ;;  %v1962_v61 = vrot.slane %v7535_v3, %v7527_v16 }
 0xd84   :  { %v2503_v6 = vmax.f32 %v2441_v44, 0.0  ;;  %v6199_v18 = vcombine.high %v2544_v55, %v2552_v34 }
 0xd85   :  { %2852 = vmatmul.mubr.bf16.vlgmr.msra.gmra.mxu0 %v2526_v4  ;;  %2893 = vmatmul.mubr.bf16.vlgmr.msra.gmra.mxu1 %v2528_v56  ;;  %v2444_v31 = vpop.f32.mrf.mxu0  ;;  %v2487_v8 = vpop.f32.mrf.mxu1  ;;  %v2530_v13 = vpack.c.bf16 %v2514_v39, %v2498_v54  ;;  %v2532_v50 = vpack.c.bf16 %v2516_v51, %v2500_v59  ;;  %v6201_v4 = vcombine.high %v2545_v20, %v2553_v5  ;;  %v6185_v39 = vld [vmem:[#allocation16] ss:$0 sm:$0xff] }
 0xd86   :  { %2914 = vmatpush1.bf16.xpose.msra.mxu0 %v6210_v19  ;;  %2933 = vmatprep.mubr.bf16.mxu0 %v2531_v17  ;;  %v2445_v38 = vadd.f32 %v2444_v31, %v1958_v11  ;;  %v2488_v43 = vadd.f32 %v2487_v8, %v1966_v46  ;;  %v2505_v17 = vmax.f32 %v2484_v52, 0.0  ;;  %v2486_v23 = vadd.f32 %v7571_v28, %v1962_v61 }
 0xd87   :  { %2955 = vmatpush1.bf16.xpose.msra.mxu1 %v6212_v58  ;;  %2974 = vmatprep.mubr.bf16.mxu1 %v2533_v57  ;;  %v1954_v57 = vrot.slane %v7535_v3, %v7525_v15  ;;  %v6198_v58 = vcombine.low %v2544_v55, %v2552_v34  ;;  %v2482_v29 = vadd.f32 %v7565_v53, %v1962_v61 }
 0xd88   :  { %2915 = vmatprep.subr.bf16.mxu0 %v6195_v25  ;;  %2956 = vmatprep.subr.bf16.mxu1 %v6197_v26  ;;  %v2519_v40 = vmax.f32 %v2445_v38, 0.0  ;;  %v2521_v35 = vmax.f32 %v2488_v43, 0.0  ;;  %v6200_v26 = vcombine.low %v2545_v20, %v2553_v5  ;;  %v2520_v62 = vmax.f32 %v2486_v23, 0.0 }
 0xd89   :  { %v2443_v25 = vadd.f32 %v7569_v27, %v1954_v57  ;;  %v2439_v24 = vadd.f32 %v7563_v49, %v1954_v57  ;;  %v2504_v3 = vmax.f32 %v2482_v29, 0.0 }
 0xd8a   :  { %v2535_v19 = vpack.c.bf16 %v2519_v40, %v2503_v6  ;;  %v2537_v56 = vpack.c.bf16 %v2521_v35, %v2505_v17 }
 0xd8b   :  { %v2518_v60 = vmax.f32 %v2443_v25, 0.0  ;;  %v2502_v30 = vmax.f32 %v2439_v24, 0.0 }
 0xd8d   :  { %v2534_v31 = vpack.c.bf16 %v2518_v60, %v2502_v30 }
 0xd8e   :  { %2916 = vmatpush1.bf16.xpose.msra.mxu0 %v6194_v32  ;;  %v2536_v32 = vpack.c.bf16 %v2520_v62, %v2504_v3 }
 0xd8f   :  { %2957 = vmatpush1.bf16.xpose.msra.mxu1 %v6196_v12  ;;  %2995 = vmatprep.subr.bf16.mxu0 %v6215_v41 }
 0xd90   :  { %3036 = vmatprep.subr.bf16.mxu1 %v6217_v47 }
 0xd95   :  { %2934 = vmatmul.mubr.bf16.vlgmr.msra.gmra.mxu0 %v2530_v13 }
 0xd96   :  { %2975 = vmatmul.mubr.bf16.vlgmr.msra.gmra.mxu1 %v2532_v50  ;;  %2996 = vmatpush1.bf16.xpose.msra.mxu0 %v6214_v2 }
 0xd97   :  { %3015 = vmatprep.mubr.bf16.mxu0 %v2535_v19  ;;  %3037 = vmatpush1.bf16.xpose.msra.mxu1 %v6216_v14 }
 0xd98   :  { %3056 = vmatprep.mubr.bf16.mxu1 %v2537_v56  ;;  %2997 = vmatprep.subr.bf16.mxu0 %v6199_v18 }
 0xd99   :  { %3038 = vmatprep.subr.bf16.mxu1 %v6201_v4 }
 0xd9e   :  { %2998 = vmatpush1.bf16.xpose.msra.mxu0 %v6198_v58 }
 0xd9f   :  { %3039 = vmatpush1.bf16.xpose.msra.mxu1 %v6200_v26  ;;  %6537 = vmatprep.subr.bf16.mxu0 %v7073_v0 }
 0xda0   :  { %6545 = vmatprep.subr.mxu1 %v7073_v0 }
 0xda5   :  { %3016 = vmatmul.mubr.bf16.vlgmr.msra.gmra.mxu0 %v2534_v31 }
 0xda6   :  { %3057 = vmatmul.mubr.bf16.vlgmr.msra.gmra.mxu1 %v2536_v32  ;;  %6541 = vmatprep.mubr.msk.bf16.mxu0 %vm7074_vm0, %v7073_v0 }
 0xda7   :  { %6547 = vmatprep.mubr.msk.f32.mxu1 %vm7074_vm0, %v7073_v0 }
 0xe35   :  { %v2771_v49 = vpop.f32.mrf.mxu0  ;;  %v2812_v53 = vpop.f32.mrf.mxu1 }
 0xe36   :  { %v2772_v44 = vadd.f32 %v6185_v39, %v2771_v49 }
 0xe37   :  { %v2773_v27 = vpop.f32.mrf.mxu0  ;;  %v2814_v28 = vpop.f32.mrf.mxu1 }
 0xe38   :  { %v2813_v40 = vadd.f32 %v2812_v53, %v2772_v44 }
 0xe39   :  { %v2774_v33 = vpop.f32.mrf.mxu0  ;;  %v2815_v11 = vpop.f32.mrf.mxu1 }
 0xe3a   :  { %v2775_v55 = vadd.f32 %v6185_v39, %v2774_v33 }
 0xe3b   :  { %v2776_v8 = vpop.f32.mrf.mxu0  ;;  %v2817_v12 = vpop.f32.mrf.mxu1 }
 0xe3c   :  { %v2816_v5 = vadd.f32 %v2815_v11, %v2775_v55 }
 0xe45   :  { %v2853_v41 = vpop.f32.mrf.mxu0  ;;  %v2894_v42 = vpop.f32.mrf.mxu1 }
 0xe46   :  { %v2854_v35 = vadd.f32 %v2853_v41, %v2813_v40 }
 0xe47   :  { %v2855_v46 = vpop.f32.mrf.mxu0  ;;  %v2896_v47 = vpop.f32.mrf.mxu1 }
 0xe48   :  { %v2895_v6 = vadd.f32 %v2894_v42, %v2854_v35  ;;  %v6693_v46 = vld [vmem:[#allocation5 + $0x18] sm:$0xff]  }
 0xe49   :  { %v2856_v36 = vpop.f32.mrf.mxu0  ;;  %v2897_v38 = vpop.f32.mrf.mxu1  ;;  %6538 = vmatpush3.bf16.msra.mxu0 %v6693_v46 }
 0xe4a   :  { %v2857_v14 = vadd.f32 %v2856_v36, %v2816_v5  ;;  %6539 = vmatprep.subr.bf16.mxu0 %v7073_v0  ;;  %v6221_v5 = vld [vmem:[%s7962_s2 + $0x1] ss:$0 sm:$0xff] }
 0xe4b   :  { %v2858_v45 = vpop.f32.mrf.mxu0  ;;  %v2899_v43 = vpop.f32.mrf.mxu1 }
 0xe4c   :  { %v2898_v17 = vadd.f32 %v2897_v38, %v2857_v14 }
 0xe55   :  { %v2935_v51 = vpop.f32.mrf.mxu0 }
 0xe56   :  { %v2976_v52 = vpop.f32.mrf.mxu1  ;;  %v2936_v50 = vadd.f32 %v2935_v51, %v2895_v6 }
 0xe57   :  { %v2937_v54 = vpop.f32.mrf.mxu0 }
 0xe58   :  { %v2978_v34 = vpop.f32.mrf.mxu1  ;;  %v2977_v18 = vadd.f32 %v2976_v52, %v2936_v50  ;;  %v6218_v52 = vld [vmem:[#allocation17] ss:$0 sm:$0xff] }
 0xe59   :  { %v2938_v59 = vpop.f32.mrf.mxu0  ;;  %v6219_v34 = vld [vmem:[#allocation19] ss:$0 sm:$0xff] }
 0xe5a   :  { %v2979_v2 = vpop.f32.mrf.mxu1  ;;  %v2939_v19 = vadd.f32 %v2938_v59, %v2898_v17 }
 0xe5b   :  { %v2940_v20 = vpop.f32.mrf.mxu0 }
 0xe5c   :  { %v2981_v13 = vpop.f32.mrf.mxu1  ;;  %v2980_v58 = vadd.f32 %v2979_v2, %v2939_v19 }
 0xe65   :  { %v3017_v4 = vpop.f32.mrf.mxu0 }
 0xe66   :  { %v3018_v56 = vadd.f32 %v3017_v4, %v2977_v18  ;;  %v3058_v57 = vpop.f32.mrf.mxu1 }
 0xe67   :  { %v3019_v61 = vpop.f32.mrf.mxu0 }
 0xe68   :  { %v3059_v25 = vadd.f32 %v3058_v57, %v3018_v56  ;;  %v3060_v26 = vpop.f32.mrf.mxu1 }
 0xe69   :  { %v3020_v23 = vpop.f32.mrf.mxu0 }
 0xe6a   :  { %v3021_v24 = vadd.f32 %v3020_v23, %v2980_v58  ;;  %v3061_v29 = vpop.f32.mrf.mxu1  ;;  %v3065_v60 = vadd.f32 %v3059_v25, %v7437_v63 }
 0xe6b   :  { %v3022_v62 = vpop.f32.mrf.mxu0 }
 0xe6c   :  { %v3062_v30 = vadd.f32 %v3061_v29, %v3021_v24  ;;  %v3063_v3 = vpop.f32.mrf.mxu1  ;;  %v3069_v31 = vsel %vm239_vm1, %v3065_v60, 0.0 }
 0xe6d   :  { %3070 = vadd.xlane.f32.xlu0 %v3069_v31 }
 0xe6e   :  { %v3066_v32 = vadd.f32 %v3062_v30, %v7439_v1  ;;  %v6694_v1 = vld [vmem:[#allocation5 + $0x10] sm:$0xff]  }
 0xe6f   :  { %6540 = vmatpush3.bf16.msra.mxu0 %v6694_v1 }
 0xe70   :  { %v3072_v49 = vsel %vm239_vm1, %v3066_v32, 0.0  ;;  %6550 = vmatprep.subr.mxu0 %v7073_v0 }
 0xe71   :  { %3073 = vadd.xlane.f32.xlu1 %v3072_v49 }
 0xef6   :  { %v3071_v53 = vpop.xlane.xlu0 %3070 }
 0xef7   :  { %v3075_v27 = vmul.f32 0.03125, %v3071_v53 }
 0xef9   :  { %v3077_v28 = vsub.f32 %v3065_v60, %v3075_v27 }
 0xefa   :  { %v3074_v33 = vpop.xlane.xlu1 %3073 }
 0xefb   :  { %v3076_v11 = vmul.f32 0.03125, %v3074_v33  ;;  %v3079_v8 = vmul.f32 %v3077_v28, %v3077_v28 }
 0xefd   :  { %v3078_v12 = vsub.f32 %v3066_v32, %v3076_v11  ;;  %v3081_v63 = vsel %vm239_vm1, %v3079_v8, 0.0 }
 0xefe   :  { %3082 = vadd.xlane.f32.xlu0 %v3081_v63 }
 0xeff   :  { %v3080_v41 = vmul.f32 %v3078_v12, %v3078_v12 }
 0xf01   :  { %v3084_v42 = vsel %vm239_vm1, %v3080_v41, 0.0 }
 0xf02   :  { %3085 = vadd.xlane.f32.xlu1 %v3084_v42 }
 0xf87   :  { %v3083_v47 = vpop.xlane.xlu0 %3082 }
 0xf88   :  { %v3087_v36 = vmul.f32 0.03125, %v3083_v47 }
 0xf8a   :  { %v3089_v38 = vadd.f32 1e-05, %v3087_v36 }
 0xf8b   :  { %v3086_v45 = vpop.xlane.xlu1 %3085 }
 0xf8c   :  { %6733 = vrsqrt.f32 %v3089_v38  ;;  %v3088_v43 = vmul.f32 0.03125, %v3086_v45 }
 0xf8e   :  { %v3090_v39 = vadd.f32 1e-05, %v3088_v43 }
 0xf90   :  { %6735 = vrsqrt.f32 %v3090_v39 }
 0xf99   :  { %v6734_v44 = vpop.eup %6733 }
 0xf9a   :  { %v3093_v51 = vmul.f32 %v6734_v44, %v3077_v28 }
 0xf9c   :  { %v3101_v55 = vmul.f32 %v6218_v52, %v3093_v51 }
 0xf9d   :  { %v6736_v54 = vpop.eup %6735 }
 0xf9e   :  { %v3094_v40 = vmul.f32 %v6736_v54, %v3078_v12  ;;  %v7606_v35 = vadd.f32 %v6219_v34, %v3101_v55 }
 0xfa0   :  { %v3102_v59 = vmul.f32 %v6218_v52, %v3094_v40 }
 0xfa2   :  { %v7608_v2 = vadd.f32 %v6219_v34, %v3102_v59 }
 0xfa4   :  { %v3111_v20 = vpack.c.bf16 %v7608_v2, %v7606_v35 }
 0xfa6   :  { %6542 = vmatmul.mubr.msk.bf16.vlgmr.msra.gmra.mxu0 %vm239_vm1, %v3111_v20 }
 0xfa7   :  { %6552 = vmatprep.mubr.msk.f32.mxu0 %vm7074_vm0, %v7073_v0 }
0x1066   :  { %v3174_v13 = vpop.f32.mrf.mxu0 }
0x1067   :  { %v7618_v6 = vadd.f32 %v6221_v5, %v3174_v13 }
0x1068   :  { %v6543_v14 = vpop.f32.mrf.mxu0 }
0x1069   :  { %3187 = vrot.lane.b32.xlu1 %v7618_v6, %s7075_s28 }
0x106a   :  { %v3177_v50 = vpop.f32.mrf.mxu0 }
0x106b   :  { %v7622_v17 = vadd.f32 %v6221_v5, %v3177_v50 }
0x106c   :  { %v6544_v18 = vpop.f32.mrf.mxu0 }
0x106d   :  { %3264 = vrot.lane.b32.xlu0 %v7622_v17, %s7075_s28 }
0x10db   :  { %v3188_v19 = vpop.permute.xlu1 %3187 }
0x10dc   :  { %6546 = vmatpush3.xpose.msk.msra.mxu1 %vm291_vm2, %v3188_v19 }
0x10dd   :  { %6555 = vmatprep.subr.mxu1 %v7073_v0 }
0x10df   :  { %6548 = vmatmul.mubr.msk.f32.vlgmr.msra.gmra.mxu1 %vm291_vm2, %v7618_v6  ;;  %v3265_v4 = vpop.permute.xlu0 %3264 }
0x10e0   :  { %6551 = vmatpush3.xpose.msk.msra.mxu0 %vm291_vm2, %v3265_v4  ;;  %6557 = vmatprep.mubr.msk.f32.mxu1 %vm7074_vm0, %v7073_v0 }
0x10e1   :  { %6560 = vmatprep.subr.mxu0 %v7073_v0 }
0x10e3   :  { %6553 = vmatmul.mubr.msk.f32.vlgmr.msra.gmra.mxu0 %vm291_vm2, %v7622_v17 }
0x10e4   :  { %6562 = vmatprep.mubr.msk.f32.mxu0 %vm7074_vm0, %v7073_v0 }
0x119f   :  { %v3259_v56 = vpop.f32.mrf.mxu1 }
0x11a0   :  { %v3340_v30 = vmul.f32 0.35355338, %v3259_v56 }
0x11a1   :  { %v6549_v57 = vpop.f32.mrf.mxu1 }
0x11a2   :  { %v3342_v3 = vsel %vm291_vm2, %v3340_v30, -inf }
0x11a3   :  { %v3336_v61 = vpop.f32.mrf.mxu0 }
0x11a4   :  { %v3341_v58 = vmul.f32 0.35355338, %v3336_v61 }
0x11a5   :  { %v6554_v25 = vpop.f32.mrf.mxu0 }
0x11a6   :  { %v3345_v26 = vsel %vm291_vm2, %v3341_v58, -inf }
0x11a7   :  { %3346 = vmax.xlane.f32.xlu1 %v3345_v26 }
0x11b8   :  { %3597 = vrot.lane.b32.xlu1 %v7622_v17, %s7077_s9 }
0x11bc   :  { %3595 = vrot.lane.b32.xlu1 %v7622_v17, %s7076_s29 }
0x1230   :  { %v3347_v23 = vpop.xlane.xlu1 %3346 }
0x1231   :  { %v3349_v24 = vsub.f32 %v3341_v58, %v3347_v23 }
0x1233   :  { %v3352_v29 = vmul.f32 1.442695, %v3349_v24 }
0x1234   :  { %v3598_v53 = vpop.permute.xlu1 %3597 }
0x1235   :  { %6737 = vpow2.f32 %v3352_v29 }
0x1238   :  { %v3596_v28 = vpop.permute.xlu1 %3595 }
0x1242   :  { %v6738_v60 = vpop.eup %6737 }
0x1243   :  { %v3357_v62 = vsel %vm291_vm2, %v6738_v60, 0.0 }
0x1244   :  { %3358 = vadd.xlane.f32.xlu0 %v3357_v62 }
0x125a   :  { %3440 = vrot.lane.b32.xlu0 %v7622_v17, %s7054_s21 }
0x1279   :  { %3343 = vmax.xlane.f32.xlu0 %v3342_v3 }
0x128f   :  { %3364 = vrot.lane.b32.xlu0 %v7618_v6, %s7054_s21 }
0x1293   :  { %3517 = vrot.lane.b32.xlu0 %v7618_v6, %s7076_s29 }
0x12cd   :  { %v3359_v31 = vpop.xlane.xlu0 %3358 }
0x12ce   :  { %6739 = vrcp.f32 %v3359_v31 }
0x12d1   :  { %v3441_v32 = vpop.permute.xlu0 %3440 }
0x12d2   :  { %6561 = vmatpush3.msra.mxu0 %v3441_v32 }
0x12d3   :  { %6570 = vmatprep.subr.mxu0 %v7073_v0 }
0x12db   :  { %v6740_v49 = vpop.eup %6739 }
0x12dc   :  { %v3363_v27 = vmul.f32 %v6740_v49, %v6738_v60 }
0x12de   :  { %6563 = vmatmul.mubr.msk.f32.vlgmr.msra.gmra.mxu0 %vm291_vm2, %v3363_v27 }
0x12df   :  { %6571 = vmatpush3.xpose.msk.msra.mxu0 %vm291_vm2, %v3598_v53  ;;  %6572 = vmatprep.mubr.msk.f32.mxu0 %vm7074_vm0, %v7073_v0 }
0x12e0   :  { %6580 = vmatprep.subr.mxu0 %v7073_v0 }
0x12e2   :  { %6573 = vmatmul.mubr.msk.f32.vlgmr.msra.gmra.mxu0 %vm291_vm2, %v3596_v28 }
0x12e3   :  { %6582 = vmatprep.mubr.msk.f32.mxu0 %vm7074_vm0, %v7073_v0 }
0x1302   :  { %v3344_v33 = vpop.xlane.xlu0 %3343 }
0x1303   :  { %v3348_v11 = vsub.f32 %v3340_v30, %v3344_v33 }
0x1305   :  { %v3350_v8 = vmul.f32 1.442695, %v3348_v11 }
0x1306   :  { %v3365_v12 = vpop.permute.xlu0 %3364 }
0x1307   :  { %6741 = vpow2.f32 %v3350_v8  ;;  %6556 = vmatpush3.msra.mxu1 %v3365_v12 }
0x1308   :  { %6565 = vmatprep.subr.mxu1 %v7073_v0 }
0x130a   :  { %v3518_v51 = vpop.permute.xlu0 %3517 }
0x1314   :  { %v6742_v63 = vpop.eup %6741 }
0x1315   :  { %v3354_v41 = vsel %vm291_vm2, %v6742_v63, 0.0 }
0x1316   :  { %3355 = vadd.xlane.f32.xlu1 %v3354_v41  ;;  %v3183_v41 = vld [vmem:[#allocation7 + $0x14] sm:$0xf] }
0x1327   :  { %3519 = vrot.lane.b32.xlu1 %v7618_v6, %s7077_s9 }
0x139e   :  { %v7664_v42 = vpop.f32.mrf.mxu0 }
0x139f   :  { %v3356_v46 = vpop.xlane.xlu1 %3355 }
0x13a0   :  { %6743 = vrcp.f32 %v3356_v46  ;;  %v6564_v1 = vpop.f32.mrf.mxu0  ;;  %v3854_v46 = vsel %vm956_vm3, %v3183_v41, 0 }
0x13a2   :  { %v3669_v47 = vpop.f32.mrf.mxu0 }
0x13a3   :  { %v3674_v36 = vmul.f32 0.35355338, %v3669_v47  ;;  %v3520_v44 = vpop.permute.xlu1 %3519 }
0x13a4   :  { %v6574_v38 = vpop.f32.mrf.mxu0 }
0x13a5   :  { %v3678_v45 = vsel %vm291_vm2, %v3674_v36, -inf }
0x13a6   :  { %3679 = vmax.xlane.f32.xlu1 %v3678_v45 }
0x13ad   :  { %v6744_v43 = vpop.eup %6743 }
0x13ae   :  { %v3361_v39 = vmul.f32 %v6744_v43, %v6742_v63 }
0x13b0   :  { %6558 = vmatmul.mubr.msk.f32.vlgmr.msra.gmra.mxu1 %vm291_vm2, %v3361_v39 }
0x13b1   :  { %6566 = vmatpush3.xpose.msk.msra.mxu1 %vm291_vm2, %v3520_v44  ;;  %6567 = vmatprep.mubr.msk.f32.mxu1 %vm7074_vm0, %v7073_v0 }
0x13b2   :  { %6575 = vmatprep.subr.mxu1 %v7073_v0 }
0x13b4   :  { %6568 = vmatmul.mubr.msk.f32.vlgmr.msra.gmra.mxu1 %vm291_vm2, %v3518_v51 }
0x13b5   :  { %6577 = vmatprep.mubr.msk.f32.mxu1 %vm7074_vm0, %v7073_v0 }
0x13b7   :  { %3899 = vrot.lane.b32.xlu1 %v7618_v6, %s7078_s3 }
0x13bb   :  { %3897 = vrot.lane.b32.xlu1 %v7618_v6, %s7080_s24 }
0x13bf   :  { %3975 = vrot.lane.b32.xlu1 %v7622_v17, %s7080_s24 }
0x142f   :  { %v3680_v52 = vpop.xlane.xlu1 %3679 }
0x1430   :  { %v3682_v54 = vsub.f32 %v3674_v36, %v3680_v52 }
0x1432   :  { %v3685_v40 = vmul.f32 1.442695, %v3682_v54 }
0x1433   :  { %v3900_v4 = vpop.permute.xlu1 %3899 }
0x1434   :  { %6745 = vpow2.f32 %v3685_v40 }
0x1437   :  { %v3898_v61 = vpop.permute.xlu1 %3897 }
0x143b   :  { %v3976_v25 = vpop.permute.xlu1 %3975 }
0x1441   :  { %v6746_v55 = vpop.eup %6745 }
0x1442   :  { %v3690_v34 = vsel %vm291_vm2, %v6746_v55, 0.0 }
0x1443   :  { %3691 = vadd.xlane.f32.xlu0 %v3690_v34 }
0x1459   :  { %3773 = vrot.lane.b32.xlu0 %v7622_v17, %s7079_s22 }
0x145d   :  { %3977 = vrot.lane.b32.xlu0 %v7622_v17, %s7078_s3 }
0x1470   :  { %v7686_v59 = vpop.f32.mrf.mxu1 }
0x1472   :  { %v6559_v20 = vpop.f32.mrf.mxu1 }
0x1474   :  { %v3591_v5 = vpop.f32.mrf.mxu1 }
0x1475   :  { %v3673_v14 = vmul.f32 0.35355338, %v3591_v5 }
0x1476   :  { %v6569_v13 = vpop.f32.mrf.mxu1 }
0x1477   :  { %v3675_v50 = vsel %vm291_vm2, %v3673_v14, -inf }
0x147c   :  { %3676 = vmax.xlane.f32.xlu0 %v3675_v50 }
0x1492   :  { %3697 = vrot.lane.b32.xlu0 %v7618_v6, %s7079_s22 }
0x1496   :  { %4077 = vrot.lane.b32.xlu0 %v7618_v6, %s7081_s25 }
0x149a   :  { %4232 = vrot.lane.b32.xlu0 %v7618_v6, %s7082_s5 }
0x149e   :  { %4310 = vrot.lane.b32.xlu0 %v7622_v17, %s7082_s5 }
0x14a2   :  { %4230 = vrot.lane.b32.xlu0 %v7618_v6, %s7083_s6 }
0x14a6   :  { %4308 = vrot.lane.b32.xlu0 %v7622_v17, %s7083_s6 }
0x14cc   :  { %v3692_v18 = vpop.xlane.xlu0 %3691 }
0x14cd   :  { %6747 = vrcp.f32 %v3692_v18 }
0x14d0   :  { %v3774_v19 = vpop.permute.xlu0 %3773 }
0x14d1   :  { %6581 = vmatpush3.msra.mxu0 %v3774_v19 }
0x14d2   :  { %6591 = vmatprep.subr.mxu0 %v7073_v0 }
0x14d4   :  { %v3978_v58 = vpop.permute.xlu0 %3977 }
0x14da   :  { %v6748_v56 = vpop.eup %6747 }
0x14db   :  { %v3696_v57 = vmul.f32 %v6748_v56, %v6746_v55 }
0x14dd   :  { %6583 = vmatmul.mubr.msk.f32.vlgmr.msra.gmra.mxu0 %vm291_vm2, %v3696_v57 }
0x14de   :  { %6592 = vmatpush3.xpose.msk.msra.mxu0 %vm291_vm2, %v3900_v4  ;;  %6593 = vmatprep.mubr.msk.f32.mxu0 %vm7074_vm0, %v7073_v0 }
0x14df   :  { %6596 = vmatprep.subr.mxu0 %v7073_v0 }
0x14e1   :  { %6594 = vmatmul.mubr.msk.f32.vlgmr.msra.gmra.mxu0 %vm291_vm2, %v3898_v61 }
0x14e2   :  { %6597 = vmatpush3.xpose.msk.msra.mxu0 %vm291_vm2, %v3978_v58  ;;  %6598 = vmatprep.mubr.msk.f32.mxu0 %vm7074_vm0, %v7073_v0 }
0x14e3   :  { %6606 = vmatprep.subr.mxu0 %v7073_v0 }
0x14e5   :  { %6599 = vmatmul.mubr.msk.f32.vlgmr.msra.gmra.mxu0 %vm291_vm2, %v3976_v25 }
0x14e6   :  { %6608 = vmatprep.mubr.msk.f32.mxu0 %vm7074_vm0, %v7073_v0 }
0x1505   :  { %v3677_v26 = vpop.xlane.xlu0 %3676 }
0x1506   :  { %v3681_v23 = vsub.f32 %v3673_v14, %v3677_v26 }
0x1508   :  { %v3683_v24 = vmul.f32 1.442695, %v3681_v23 }
0x1509   :  { %v3698_v29 = vpop.permute.xlu0 %3697 }
0x150a   :  { %6749 = vpow2.f32 %v3683_v24  ;;  %6576 = vmatpush3.msra.mxu1 %v3698_v29 }
0x150b   :  { %6585 = vmatprep.subr.bf16.mxu1 %v7073_v0 }
0x150d   :  { %v4078_v34 = vpop.permute.xlu0 %4077 }
0x1511   :  { %v4233_v13 = vpop.permute.xlu0 %4232 }
0x1515   :  { %v4311_v50 = vpop.permute.xlu0 %4310 }
0x1517   :  { %v6750_v60 = vpop.eup %6749 }
0x1518   :  { %v3687_v62 = vsel %vm291_vm2, %v6750_v60, 0.0 }
0x1519   :  { %3688 = vadd.xlane.f32.xlu1 %v3687_v62  ;;  %v4231_v56 = vpop.permute.xlu0 %4230 }
0x151d   :  { %v4309_v61 = vpop.permute.xlu0 %4308 }
0x159d   :  { %v3845_v30 = vpop.f32.mrf.mxu0 }
0x159f   :  { %v6584_v3 = vpop.f32.mrf.mxu0 }
0x15a1   :  { %v3971_v31 = vpop.f32.mrf.mxu0 }
0x15a2   :  { %v4053_v32 = vmul.f32 0.35355338, %v3971_v31  ;;  %v3689_v49 = vpop.xlane.xlu1 %3688 }
0x15a3   :  { %6751 = vrcp.f32 %v3689_v49  ;;  %v6595_v53 = vpop.f32.mrf.mxu0 }
0x15a4   :  { %v4055_v27 = vsel %vm291_vm2, %v4053_v32, -inf }
0x15a5   :  { %4056 = vmax.xlane.f32.xlu1 %v4055_v27  ;;  %v4049_v28 = vpop.f32.mrf.mxu0 }
0x15a6   :  { %v4054_v33 = vmul.f32 0.35355338, %v4049_v28 }
0x15a7   :  { %v6600_v11 = vpop.f32.mrf.mxu0 }
0x15a8   :  { %v4058_v8 = vsel %vm291_vm2, %v4054_v33, -inf }
0x15a9   :  { %4059 = vmax.xlane.f32.xlu1 %v4058_v8 }
0x15b0   :  { %v6752_v12 = vpop.eup %6751 }
0x15b1   :  { %v3694_v63 = vmul.f32 %v6752_v12, %v6750_v60 }
0x15b3   :  { %6578 = vmatmul.mubr.msk.f32.vlgmr.msra.gmra.mxu1 %vm291_vm2, %v3694_v63 }
0x15b4   :  { %6587 = vmatprep.mubr.msk.bf16.mxu1 %vm7074_vm0, %v7073_v0  ;;  %6586 = vmatpush3.bf16.msra.mxu1 %v3854_v46 }
0x15b5   :  { %6601 = vmatprep.subr.mxu1 %v7073_v0 }
0x162e   :  { %v4057_v1 = vpop.xlane.xlu1 %4056 }
0x162f   :  { %v4061_v47 = vsub.f32 %v4053_v32, %v4057_v1 }
0x1631   :  { %v4063_v36 = vmul.f32 1.442695, %v4061_v47 }
0x1632   :  { %v4060_v38 = vpop.xlane.xlu1 %4059 }
0x1633   :  { %6753 = vpow2.f32 %v4063_v36  ;;  %v4062_v45 = vsub.f32 %v4054_v33, %v4060_v38 }
0x1635   :  { %v4065_v43 = vmul.f32 1.442695, %v4062_v45 }
0x1637   :  { %6755 = vpow2.f32 %v4065_v43 }
0x1640   :  { %v6754_v39 = vpop.eup %6753 }
0x1641   :  { %v4067_v44 = vsel %vm291_vm2, %v6754_v39, 0.0 }
0x1642   :  { %4068 = vadd.xlane.f32.xlu1 %v4067_v44 }
0x1644   :  { %v6756_v51 = vpop.eup %6755 }
0x1645   :  { %v4070_v52 = vsel %vm291_vm2, %v6756_v51, 0.0 }
0x1646   :  { %4071 = vadd.xlane.f32.xlu1 %v4070_v52 }
0x1657   :  { %4153 = vrot.lane.b32.xlu1 %v7622_v17, %s7081_s25 }
0x1673   :  { %v3769_v54 = vpop.f32.mrf.mxu1 }
0x1674   :  { %v3849_v40 = vpack.c.bf16 %v3845_v30, %v3769_v54  ;;  %v3182_v54 = vld [vmem:[#allocation7 + $0x10] sm:$0xf] }
0x1675   :  { %v6579_v55 = vpop.f32.mrf.mxu1 }
0x1676   :  { %6588 = vmatmul.mubr.msk.bf16.vlgmr.msra.gmra.mxu1 %vm291_vm2, %v3849_v40  ;;  %v4614_v40 = vsel %vm956_vm3, %v3182_v54, 0  ;;  %v3516_v55 = vpack.c.bf16 %v7664_v42, %v7686_v59 }
0x1677   :  { %6602 = vmatpush3.msra.mxu1 %v4078_v34  ;;  %6603 = vmatprep.mubr.msk.f32.mxu1 %vm7074_vm0, %v7073_v0  ;;  %v3185_v34 = vld [vmem:[#allocation7 + $0x1c] sm:$0xf] }
0x1678   :  { %6611 = vmatprep.subr.mxu1 %v7073_v0 }
0x16cb   :  { %v4069_v20 = vpop.xlane.xlu1 %4068 }
0x16cc   :  { %6757 = vrcp.f32 %v4069_v20  ;;  %v4567_v20 = vsel %vm956_vm3, %v3185_v34, 0  ;;  %v4767_v34 = vld [vmem:[#allocation11 + $0x108] sm:$0xff] }
0x16cf   :  { %v4072_v5 = vpop.xlane.xlu1 %4071 }
0x16d0   :  { %6759 = vrcp.f32 %v4072_v5 }
0x16d3   :  { %v4154_v14 = vpop.permute.xlu1 %4153 }
0x16d4   :  { %6607 = vmatpush3.msra.mxu0 %v4154_v14  ;;  %v3184_v14 = vld [vmem:[#allocation7 + $0x18] sm:$0xf] }
0x16d5   :  { %6616 = vmatprep.subr.mxu0 %v7073_v0 }
0x16d9   :  { %v6758_v18 = vpop.eup %6757 }
0x16da   :  { %v4074_v19 = vmul.f32 %v6758_v18, %v6754_v39 }
0x16dc   :  { %6604 = vmatmul.mubr.msk.f32.vlgmr.msra.gmra.mxu1 %vm291_vm2, %v4074_v19  ;;  %v4661_v19 = vsel %vm956_vm3, %v3184_v14, 0 }
0x16dd   :  { %v6760_v4 = vpop.eup %6759  ;;  %6612 = vmatpush3.xpose.msk.msra.mxu1 %vm291_vm2, %v4233_v13  ;;  %6613 = vmatprep.mubr.msk.f32.mxu1 %vm7074_vm0, %v7073_v0 }
0x16de   :  { %v4076_v57 = vmul.f32 %v6760_v4, %v6756_v51  ;;  %6621 = vmatprep.subr.mxu1 %v7073_v0 }
0x16e0   :  { %6609 = vmatmul.mubr.msk.f32.vlgmr.msra.gmra.mxu0 %vm291_vm2, %v4076_v57  ;;  %6614 = vmatmul.mubr.msk.f32.vlgmr.msra.gmra.mxu1 %vm291_vm2, %v4231_v56 }
0x16e1   :  { %6617 = vmatpush3.xpose.msk.msra.mxu0 %vm291_vm2, %v4311_v50  ;;  %6618 = vmatprep.mubr.msk.f32.mxu0 %vm7074_vm0, %v7073_v0 }
0x16e2   :  { %6626 = vmatprep.subr.mxu0 %v7073_v0  ;;  %6623 = vmatprep.mubr.msk.f32.mxu1 %vm7074_vm0, %v7073_v0 }
0x16e4   :  { %6619 = vmatmul.mubr.msk.f32.vlgmr.msra.gmra.mxu0 %vm291_vm2, %v4309_v61 }
0x16e5   :  { %6628 = vmatprep.mubr.msk.f32.mxu0 %vm7074_vm0, %v7073_v0 }
0x1736   :  { %v7749_v58 = vpop.f32.mrf.mxu1 }
0x1738   :  { %v6589_v25 = vpop.f32.mrf.mxu1 }
0x173a   :  { %v7751_v26 = vpop.f32.mrf.mxu1 }
0x173c   :  { %v6590_v23 = vpop.f32.mrf.mxu1 }
0x179c   :  { %v7753_v24 = vpop.f32.mrf.mxu1 }
0x179e   :  { %v6605_v29 = vpop.f32.mrf.mxu1 }
0x17a0   :  { %v7755_v60 = vpop.f32.mrf.mxu0  ;;  %v4304_v62 = vpop.f32.mrf.mxu1 }
0x17a1   :  { %v4229_v30 = vpack.c.bf16 %v7755_v60, %v7753_v24  ;;  %v4386_v3 = vmul.f32 0.35355338, %v4304_v62 }
0x17a2   :  { %v6610_v31 = vpop.f32.mrf.mxu0  ;;  %v6615_v32 = vpop.f32.mrf.mxu1 }
0x17a3   :  { %v4388_v49 = vsel %vm291_vm2, %v4386_v3, -inf }
0x17a4   :  { %4389 = vmax.xlane.f32.xlu1 %v4388_v49  ;;  %v4382_v53 = vpop.f32.mrf.mxu0  ;;  %v6254_v49 = vld [vmem:[%s7964_s4 + $0x1] ss:$0 sm:$0xff] }
0x17a5   :  { %v4387_v27 = vmul.f32 0.35355338, %v4382_v53 }
0x17a6   :  { %v6620_v28 = vpop.f32.mrf.mxu0 }
0x17a7   :  { %v4391_v33 = vsel %vm291_vm2, %v4387_v27, -inf }
0x17a8   :  { %4392 = vmax.xlane.f32.xlu0 %v4391_v33 }
0x182d   :  { %v4390_v11 = vpop.xlane.xlu1 %4389 }
0x182e   :  { %v4394_v8 = vsub.f32 %v4386_v3, %v4390_v11 }
0x1830   :  { %v4396_v12 = vmul.f32 1.442695, %v4394_v8 }
0x1831   :  { %v4393_v63 = vpop.xlane.xlu0 %4392 }
0x1832   :  { %6761 = vpow2.f32 %v4396_v12  ;;  %v4395_v41 = vsub.f32 %v4387_v27, %v4393_v63 }
0x1834   :  { %v4398_v46 = vmul.f32 1.442695, %v4395_v41 }
0x1836   :  { %6763 = vpow2.f32 %v4398_v46 }
0x183f   :  { %v6762_v1 = vpop.eup %6761 }
0x1840   :  { %v4400_v47 = vsel %vm291_vm2, %v6762_v1, 0.0 }
0x1841   :  { %4401 = vadd.xlane.f32.xlu0 %v4400_v47 }
0x1843   :  { %v6764_v36 = vpop.eup %6763 }
0x1844   :  { %v4403_v38 = vsel %vm291_vm2, %v6764_v36, 0.0 }
0x1845   :  { %4404 = vadd.xlane.f32.xlu1 %v4403_v38 }
0x1856   :  { %4486 = vrot.lane.b32.xlu1 %v7622_v17, %s7084_s26 }
0x1857   :  { %4410 = vrot.lane.b32.xlu0 %v7618_v6, %s7084_s26 }
0x18ca   :  { %v4402_v45 = vpop.xlane.xlu0 %4401 }
0x18cb   :  { %6765 = vrcp.f32 %v4402_v45 }
0x18ce   :  { %v4405_v43 = vpop.xlane.xlu1 %4404  ;;  %v4411_v39 = vpop.permute.xlu0 %4410 }
0x18cf   :  { %6767 = vrcp.f32 %v4405_v43  ;;  %6622 = vmatpush3.msra.mxu1 %v4411_v39  ;;  %v4782_v39 = vld [vmem:[#allocation11 + $0x180] sm:$0xff] }
0x18d0   :  { %6631 = vmatprep.subr.bf16.mxu1 %v7073_v0 }
0x18d2   :  { %v4487_v44 = vpop.permute.xlu1 %4486 }
0x18d3   :  { %6627 = vmatpush3.msra.mxu0 %v4487_v44  ;;  %v4790_v44 = vld [vmem:[#allocation11 + $0x1c0] sm:$0xff] }
0x18d4   :  { %6637 = vmatprep.subr.bf16.mxu0 %v7073_v0  ;;  %v6273_v54 = vcombine.low %v4782_v39, %v4790_v44 }
0x18d8   :  { %v6766_v51 = vpop.eup %6765 }
0x18d9   :  { %v4407_v52 = vmul.f32 %v6766_v51, %v6762_v1  ;;  %v6274_v51 = vcombine.high %v4782_v39, %v4790_v44  ;;  %v4770_v44 = vld [vmem:[#allocation11 + $0x120] sm:$0xff] }
0x18db   :  { %6624 = vmatmul.mubr.msk.f32.vlgmr.msra.gmra.mxu1 %vm291_vm2, %v4407_v52  ;;  %v4791_v52 = vld [vmem:[#allocation11 + $0x1c8] sm:$0xff] }
0x18dc   :  { %v6768_v17 = vpop.eup %6767  ;;  %6633 = vmatprep.mubr.msk.bf16.mxu1 %vm7074_vm0, %v7073_v0  ;;  %6632 = vmatpush3.bf16.msra.mxu1 %v4567_v20 }
0x18dd   :  { %v4409_v6 = vmul.f32 %v6768_v17, %v6764_v36  ;;  %6643 = vmatprep.subr.bf16.mxu1 %v7073_v0 }
0x18df   :  { %6629 = vmatmul.mubr.msk.f32.vlgmr.msra.gmra.mxu0 %vm291_vm2, %v4409_v6 }
0x18e0   :  { %6638 = vmatpush3.bf16.msra.mxu0 %v4614_v40  ;;  %6639 = vmatprep.mubr.msk.bf16.mxu0 %vm7074_vm0, %v7073_v0  ;;  %v4766_v40 = vld [vmem:[#allocation11 + $0x100] sm:$0xff] }
0x18e1   :  { %5058 = vmatprep.subr.bf16.mxu0 %v6274_v51  ;;  %v4771_v51 = vld [vmem:[#allocation11 + $0x128] sm:$0xff] }
0x18e3   :  { %6640 = vmatmul.mubr.msk.bf16.vlgmr.msra.gmra.mxu0 %vm291_vm2, %v3516_v55  ;;  %v4774_v55 = vld [vmem:[#allocation11 + $0x140] sm:$0xff] }
0x18e4   :  { %5078 = vmatprep.mubr.bf16.mxu0 %v7085_v37  ;;  %5059 = vmatpush1.bf16.msra.mxu0 %v6273_v54  ;;  %v6258_v20 = vcombine.high %v4766_v40, %v4774_v55 }
0x18e6   :  { %5060 = vmatprep.subr.bf16.mxu0 %v6258_v20  ;;  %v4789_v20 = vld [vmem:[#allocation11 + $0x1b8] sm:$0xff] }
0x199b   :  { %v4482_v5 = vpop.f32.mrf.mxu1 }
0x199d   :  { %v6625_v13 = vpop.f32.mrf.mxu1 }
0x199e   :  { %v6257_v13 = vcombine.low %v4766_v40, %v4774_v55  ;;  %v4788_v55 = vld [vmem:[#allocation11 + $0x1b0] sm:$0xff] }
0x199f   :  { %v4558_v50 = vpop.f32.mrf.mxu0 }
0x19a0   :  { %v4562_v18 = vpack.c.bf16 %v4558_v50, %v4482_v5  ;;  %v4775_v5 = vld [vmem:[#allocation11 + $0x148] sm:$0xff]  ;;  %5061 = vmatpush1.bf16.msra.mxu0 %v6257_v13 }
0x19a1   :  { %v6630_v4 = vpop.f32.mrf.mxu0  ;;  %v6259_v14 = vcombine.low %v4767_v34, %v4775_v5  ;;  %v6260_v50 = vcombine.high %v4767_v34, %v4775_v5  ;;  %v4796_v34 = vld [vmem:[#allocation11 + $0x1f0] sm:$0xff]  ;;  %v4797_v5 = vld [vmem:[#allocation11 + $0x1f8] sm:$0xff] }
0x19a2   :  { %6634 = vmatmul.mubr.msk.bf16.vlgmr.msra.gmra.mxu1 %vm291_vm2, %v4562_v18  ;;  %v4784_v18 = vld [vmem:[#allocation11 + $0x190] sm:$0xff]  ;;  %v4785_v4 = vld [vmem:[#allocation11 + $0x198] sm:$0xff] }
0x19a3   :  { %v4650_v42 = vpop.f32.mrf.mxu0  ;;  %6644 = vmatpush3.bf16.msra.mxu1 %v4661_v19  ;;  %6645 = vmatprep.mubr.msk.bf16.mxu1 %vm7074_vm0, %v7073_v0  ;;  %v4792_v19 = vld [vmem:[#allocation11 + $0x1d0] sm:$0xff] }
0x19a4   :  { %v4651_v3 = vadd.f32 %v4650_v42, %v7749_v58  ;;  %v6277_v42 = vcombine.low %v4784_v18, %v4792_v19 }
0x19a5   :  { %v6641_v59 = vpop.f32.mrf.mxu0 }
0x19a6   :  { %v6278_v59 = vcombine.high %v4784_v18, %v4792_v19  ;;  %v6288_v18 = vcombine.high %v4789_v20, %v4797_v5  ;;  %v4772_v19 = vld [vmem:[#allocation11 + $0x130] sm:$0xff] }
0x19a7   :  { %v4653_v56 = vpop.f32.mrf.mxu0 }
0x19a8   :  { %v4654_v24 = vadd.f32 %v4653_v56, %v7751_v26  ;;  %v4793_v56 = vld [vmem:[#allocation11 + $0x1d8] sm:$0xff]  ;;  %5144 = vmatprep.subr.bf16.mxu0 %v6278_v59 }
0x19a9   :  { %v6642_v57 = vpop.f32.mrf.mxu0  ;;  %v4781_v59 = vld [vmem:[#allocation11 + $0x178] sm:$0xff] }
0x19aa   :  { %6646 = vmatmul.mubr.msk.bf16.vlgmr.msra.gmra.mxu1 %vm291_vm2, %v4229_v30  ;;  %v6279_v57 = vcombine.low %v4785_v4, %v4793_v56 }
0x19ab   :  { %5121 = vmatprep.mubr.bf16.mxu1 %v7085_v37 }
0x1a62   :  { %v4603_v61 = vpop.f32.mrf.mxu1 }
0x1a64   :  { %v6635_v25 = vpop.f32.mrf.mxu1 }
0x1a66   :  { %v4606_v23 = vpop.f32.mrf.mxu1 }
0x1a68   :  { %v6636_v29 = vpop.f32.mrf.mxu1 }
0x1a6a   :  { %v4697_v62 = vpop.f32.mrf.mxu1 }
0x1a6b   :  { %v4698_v31 = vadd.f32 %v4697_v62, %v4603_v61  ;;  %v6280_v61 = vcombine.high %v4785_v4, %v4793_v56  ;;  %v4780_v4 = vld [vmem:[#allocation11 + $0x170] sm:$0xff]  ;;  %v6285_v56 = vcombine.low %v4788_v55, %v4796_v34 }
0x1a6c   :  { %v6647_v32 = vpop.f32.mrf.mxu1 }
0x1a6d   :  { %v4704_v53 = vadd.f32 %v4698_v31, %v4651_v3 }
0x1a6e   :  { %v4700_v27 = vpop.f32.mrf.mxu1 }
0x1a6f   :  { %v4701_v60 = vadd.f32 %v4700_v27, %v4606_v23  ;;  %v4714_v30 = vadd.f32 %v6254_v49, %v4704_v53  ;;  %v6255_v53 = vld [vmem:[#allocation8 + $0x1] ss:$0 sm:$0xff] }
0x1a70   :  { %v6648_v28 = vpop.f32.mrf.mxu1 }
0x1a71   :  { %v4705_v33 = vadd.f32 %v4701_v60, %v4654_v24  ;;  %v4716_v11 = vadd.f32 %v4714_v30, %v7606_v35  ;;  %v6256_v30 = vld [vmem:[#allocation10 + $0x1] ss:$0 sm:$0xff] }
0x1a73   :  { %v4722_v8 = vsel %vm239_vm1, %v4716_v11, 0.0  ;;  %v4715_v12 = vadd.f32 %v6254_v49, %v4705_v33  ;;  %v4768_v33 = vld [vmem:[#allocation11 + $0x110] sm:$0xff] }
0x1a74   :  { %4723 = vadd.xlane.f32.xlu1 %v4722_v8  ;;  %v4769_v8 = vld [vmem:[#allocation11 + $0x118] sm:$0xff] }
0x1a75   :  { %v4717_v58 = vadd.f32 %v4715_v12, %v7608_v2  ;;  %v4783_v2 = vld [vmem:[#allocation11 + $0x188] sm:$0xff]  ;;  %v4777_v12 = vld [vmem:[#allocation11 + $0x158] sm:$0xff] }
0x1a76   :  { %v6275_v17 = vcombine.low %v4783_v2, %v4791_v52  ;;  %v6276_v6 = vcombine.high %v4783_v2, %v4791_v52  ;;  %v4778_v2 = vld [vmem:[#allocation11 + $0x160] sm:$0xff]  ;;  %v4779_v52 = vld [vmem:[#allocation11 + $0x168] sm:$0xff] }
0x1a77   :  { %v4725_v63 = vsel %vm239_vm1, %v4717_v58, 0.0  ;;  %v6268_v40 = vcombine.high %v4771_v51, %v4779_v52  ;;  %v6265_v13 = vcombine.low %v4770_v44, %v4778_v2 }
0x1a78   :  { %4726 = vadd.xlane.f32.xlu0 %v4725_v63  ;;  %5101 = vmatprep.subr.bf16.mxu1 %v6276_v6  ;;  %v6266_v6 = vcombine.high %v4770_v44, %v4778_v2 }
0x1a79   :  { %5102 = vmatpush1.bf16.msra.mxu1 %v6275_v17 }
0x1a7a   :  { %5103 = vmatprep.subr.bf16.mxu1 %v6260_v50  ;;  %v6286_v50 = vcombine.high %v4788_v55, %v4796_v34 }
0x1a7d   :  { %5104 = vmatpush1.bf16.msra.mxu1 %v6259_v14  ;;  %v6267_v14 = vcombine.low %v4771_v51, %v4779_v52 }
0x1a7e   :  { %5187 = vmatprep.subr.bf16.mxu1 %v6280_v61  ;;  %v6270_v61 = vcombine.high %v4772_v19, %v4780_v4 }
0x1afd   :  { %v4724_v41 = vpop.xlane.xlu1 %4723 }
0x1afe   :  { %v4728_v46 = vmul.f32 0.03125, %v4724_v41 }
0x1b00   :  { %v4730_v1 = vsub.f32 %v4716_v11, %v4728_v46  ;;  %v4776_v11 = vld [vmem:[#allocation11 + $0x150] sm:$0xff] }
0x1b01   :  { %v4727_v47 = vpop.xlane.xlu0 %4726  ;;  %v6262_v46 = vcombine.high %v4768_v33, %v4776_v11 }
0x1b02   :  { %v4729_v26 = vmul.f32 0.03125, %v4727_v47  ;;  %v4732_v36 = vmul.f32 %v4730_v1, %v4730_v1  ;;  %v4786_v47 = vld [vmem:[#allocation11 + $0x1a0] sm:$0xff] }
0x1b04   :  { %v4731_v38 = vsub.f32 %v4717_v58, %v4729_v26  ;;  %v4734_v45 = vsel %vm239_vm1, %v4732_v36, 0.0  ;;  %v4794_v26 = vld [vmem:[#allocation11 + $0x1e0] sm:$0xff]  ;;  %v4787_v36 = vld [vmem:[#allocation11 + $0x1a8] sm:$0xff] }
0x1b05   :  { %4735 = vadd.xlane.f32.xlu0 %v4734_v45  ;;  %v6261_v45 = vcombine.low %v4768_v33, %v4776_v11  ;;  %v6281_v54 = vcombine.low %v4786_v47, %v4794_v26  ;;  %v5448_v11 = vld [vmem:[#allocation14 + $0x148] sm:$0xff] }
0x1b06   :  { %v4733_v35 = vmul.f32 %v4731_v38, %v4731_v38 }
0x1b08   :  { %v4737_v43 = vsel %vm239_vm1, %v4733_v35, 0.0  ;;  %v6263_v35 = vcombine.low %v4769_v8, %v4777_v12 }
0x1b09   :  { %4738 = vadd.xlane.f32.xlu1 %v4737_v43  ;;  %v6282_v43 = vcombine.high %v4786_v47, %v4794_v26  ;;  %v7836_v47 = vld [vmem:[#allocation14 + $0x198] sm:$0xff] }
0x1b0a   :  { %v7840_v26 = vld [vmem:[#allocation14 + $0x1d8] sm:$0xff] }
0x1b8e   :  { %v4736_v25 = vpop.xlane.xlu0 %4735 }
0x1b8f   :  { %v4740_v23 = vmul.f32 0.03125, %v4736_v25 }
0x1b91   :  { %v4742_v29 = vadd.f32 1e-05, %v4740_v23  ;;  %v5455_v23 = vld [vmem:[#allocation14 + $0x180] sm:$0xff] }
0x1b92   :  { %v4739_v62 = vpop.xlane.xlu1 %4738 }
0x1b93   :  { %6769 = vrsqrt.f32 %v4742_v29  ;;  %v4741_v3 = vmul.f32 0.03125, %v4739_v62  ;;  %v5463_v29 = vld [vmem:[#allocation14 + $0x1c0] sm:$0xff]  ;;  %v5456_v62 = vld [vmem:[#allocation14 + $0x188] sm:$0xff] }
0x1b95   :  { %v4743_v31 = vadd.f32 1e-05, %v4741_v3  ;;  %v5464_v3 = vld [vmem:[#allocation14 + $0x1c8] sm:$0xff] }
0x1b97   :  { %6771 = vrsqrt.f32 %v4743_v31  ;;  %v6269_v31 = vcombine.low %v4772_v19, %v4780_v4 }
0x1ba0   :  { %v6770_v32 = vpop.eup %6769 }
0x1ba1   :  { %v4746_v49 = vmul.f32 %v6770_v32, %v4730_v1  ;;  %v6264_v1 = vcombine.high %v4769_v8, %v4777_v12 }
0x1ba3   :  { %v4754_v24 = vmul.f32 %v6255_v53, %v4746_v49  ;;  %v6315_v49 = vcombine.high %v5455_v23, %v5463_v29 }
0x1ba4   :  { %v6772_v27 = vpop.eup %6771 }
0x1ba5   :  { %v4747_v60 = vmul.f32 %v6772_v27, %v4731_v38  ;;  %v7802_v58 = vadd.f32 %v6256_v30, %v4754_v24  ;;  %v4795_v38 = vld [vmem:[#allocation11 + $0x1e8] sm:$0xff]  ;;  %v6314_v27 = vcombine.low %v5455_v23, %v5463_v29  ;;  %v6316_v24 = vcombine.low %v5456_v62, %v5464_v3  ;;  %v7866_v23 = vld [vmem:[#allocation14 + $0x110] sm:$0xff] }
0x1ba6   :  { %v6284_v39 = vcombine.high %v4787_v36, %v4795_v38  ;;  %v6283_v17 = vcombine.low %v4787_v36, %v4795_v38  ;;  %v6320_v38 = vcombine.low %v7836_v47, %v7840_v26  ;;  %v7868_v29 = vld [vmem:[#allocation14 + $0x150] sm:$0xff] }
0x1ba7   :  { %v4755_v28 = vmul.f32 %v6255_v53, %v4747_v60  ;;  %v6317_v53 = vcombine.high %v5456_v62, %v5464_v3  ;;  %v5439_v60 = vld [vmem:[#allocation14 + $0x100] sm:$0xff] }
0x1ba9   :  { %v7804_v63 = vadd.f32 %v6256_v30, %v4755_v28  ;;  %v5447_v30 = vld [vmem:[#allocation14 + $0x140] sm:$0xff]  ;;  %v5440_v28 = vld [vmem:[#allocation14 + $0x108] sm:$0xff] }
0x1baa   :  { %v6299_v33 = vcombine.high %v5439_v60, %v5447_v30  ;;  %v6300_v8 = vcombine.low %v5440_v28, %v5448_v11  ;;  %v6301_v12 = vcombine.high %v5440_v28, %v5448_v11 }
0x1bab   :  { %v7808_v41 = vpack.c.bf16 %v7804_v63, %v7802_v58 }
0x1bad   :  { %6289 = vmatmul.mubr.msk.bf16.vlgmr.msra.gmra.mxu0 %vm239_vm1, %v7808_v41  ;;  %6290 = vmatmul.mubr.msk.bf16.vlgmr.msra.gmra.mxu1 %vm239_vm1, %v7808_v41 }
0x1bae   :  { %5145 = vmatpush1.bf16.msra.mxu0 %v6277_v42  ;;  %5188 = vmatpush1.bf16.msra.mxu1 %v6279_v57  ;;  %v4773_v42 = vld [vmem:[#allocation11 + $0x138] sm:$0xff]  ;;  %v6287_v57 = vcombine.low %v4789_v20, %v4797_v5 }
0x1baf   :  { %5146 = vmatprep.subr.bf16.mxu0 %v6262_v46  ;;  %5189 = vmatprep.subr.bf16.mxu1 %v6264_v1  ;;  %v6272_v25 = vcombine.high %v4773_v42, %v4781_v59  ;;  %v6271_v32 = vcombine.low %v4773_v42, %v4781_v59  ;;  %v7832_v46 = vld [vmem:[#allocation14 + $0x190] sm:$0xff] }
0x1bb0   :  { %5164 = vmatprep.mubr.bf16.mxu0 %v7085_v37  ;;  %5207 = vmatprep.mubr.bf16.mxu1 %v7085_v37  ;;  %v7834_v1 = vld [vmem:[#allocation14 + $0x1d0] sm:$0xff] }
0x1bb1   :  { %v6318_v36 = vcombine.low %v7832_v46, %v7834_v1 }
0x1bb2   :  { %5147 = vmatpush1.bf16.msra.mxu0 %v6261_v45  ;;  %5190 = vmatpush1.bf16.msra.mxu1 %v6263_v35  ;;  %v6321_v45 = vcombine.high %v7836_v47, %v7840_v26  ;;  %v7848_v35 = vld [vmem:[#allocation13 + $0x10] sm:$0xff] }
0x1bb3   :  { %5230 = vmatprep.subr.bf16.mxu0 %v6282_v43  ;;  %5273 = vmatprep.subr.bf16.mxu1 %v6284_v39  ;;  %v4810_v44 = vrot.slane %v7848_v35, %v7483_v7  ;;  %v4818_v2 = vrot.slane %v7848_v35, %v7485_v9  ;;  %v4806_v51 = vrot.slane %v7848_v35, %v7487_v10 }
0x1bb4   :  { %v4814_v52 = vrot.slane %v7848_v35, %v7489_v48 }
0x1bb5   :  { %6291 = vmatmul.mubr.msk.bf16.vlgmr.msra.gmra.mxu0 %vm239_vm1, %v7808_v41  ;;  %6292 = vmatmul.mubr.msk.bf16.vlgmr.msra.gmra.mxu1 %vm239_vm1, %v7808_v41 }
0x1bb6   :  { %5231 = vmatpush1.bf16.msra.mxu0 %v6281_v54  ;;  %5274 = vmatpush1.bf16.msra.mxu1 %v6283_v17 }
0x1bb7   :  { %5232 = vmatprep.subr.bf16.mxu0 %v6266_v6  ;;  %5275 = vmatprep.subr.bf16.mxu1 %v6268_v40 }
0x1bb8   :  { %5250 = vmatprep.mubr.bf16.mxu0 %v7085_v37  ;;  %5293 = vmatprep.mubr.bf16.mxu1 %v7085_v37 }
0x1bba   :  { %5233 = vmatpush1.bf16.msra.mxu0 %v6265_v13  ;;  %5276 = vmatpush1.bf16.msra.mxu1 %v6267_v14 }
0x1bbb   :  { %5316 = vmatprep.subr.bf16.mxu0 %v6286_v50  ;;  %5359 = vmatprep.subr.bf16.mxu1 %v6288_v18 }
0x1bbd   :  { %6293 = vmatmul.mubr.msk.bf16.vlgmr.msra.gmra.mxu0 %vm239_vm1, %v7808_v41  ;;  %6294 = vmatmul.mubr.msk.bf16.vlgmr.msra.gmra.mxu1 %vm239_vm1, %v7808_v41 }
0x1bbe   :  { %5317 = vmatpush1.bf16.msra.mxu0 %v6285_v56  ;;  %5360 = vmatpush1.bf16.msra.mxu1 %v6287_v57 }
0x1bbf   :  { %5318 = vmatprep.subr.bf16.mxu0 %v6270_v61  ;;  %5361 = vmatprep.subr.bf16.mxu1 %v6272_v25  ;;  %v4826_v61 = vrot.slane %v7848_v35, %v7501_v21  ;;  %v4834_v25 = vrot.slane %v7848_v35, %v7503_v22 }
0x1bc0   :  { %5336 = vmatprep.mubr.bf16.mxu0 %v7085_v37  ;;  %5379 = vmatprep.mubr.bf16.mxu1 %v7085_v37  ;;  %v6298_v37 = vcombine.low %v5439_v60, %v5447_v30 }
0x1bc2   :  { %5319 = vmatpush1.bf16.msra.mxu0 %v6269_v31  ;;  %5362 = vmatpush1.bf16.msra.mxu1 %v6271_v32 }
0x1bc3   :  { %5651 = vmatprep.subr.bf16.mxu0 %v6315_v49  ;;  %5692 = vmatprep.subr.bf16.mxu1 %v6317_v53  ;;  %v7870_v49 = vld [vmem:[#allocation14 + $0x118] sm:$0xff] }
0x1bc4   :  { %v7872_v53 = vld [vmem:[#allocation14 + $0x158] sm:$0xff] }
0x1bc5   :  { %6295 = vmatmul.mubr.msk.bf16.vlgmr.msra.gmra.mxu0 %vm239_vm1, %v7808_v41  ;;  %6296 = vmatmul.mubr.msk.bf16.vlgmr.msra.gmra.mxu1 %vm239_vm1, %v7808_v41  ;;  %v6319_v41 = vcombine.high %v7832_v46, %v7834_v1  ;;  %v6303_v46 = vcombine.high %v7866_v23, %v7868_v29  ;;  %v6305_v1 = vcombine.high %v7870_v49, %v7872_v53 }
0x1bc6   :  { %5652 = vmatpush1.bf16.xpose.msra.mxu0 %v6314_v27  ;;  %5693 = vmatpush1.bf16.xpose.msra.mxu1 %v6316_v24 }
0x1bc7   :  { %5653 = vmatprep.subr.bf16.mxu0 %v6299_v33  ;;  %5694 = vmatprep.subr.bf16.mxu1 %v6301_v12 }
0x1bce   :  { %5654 = vmatpush1.bf16.xpose.msra.mxu0 %v6298_v37  ;;  %5695 = vmatpush1.bf16.xpose.msra.mxu1 %v6300_v8 }
0x1bcf   :  { %5733 = vmatprep.subr.bf16.mxu0 %v6319_v41  ;;  %5774 = vmatprep.subr.bf16.mxu1 %v6321_v45 }
0x1c6d   :  { %v5080_v43 = vpop.f32.mrf.mxu0  ;;  %v5123_v39 = vpop.f32.mrf.mxu1 }
0x1c6e   :  { %v5081_v13 = vadd.f32 %v5080_v43, %v4806_v51  ;;  %v5124_v14 = vadd.f32 %v5123_v39, %v4814_v52 }
0x1c6f   :  { %v5082_v54 = vpop.f32.mrf.mxu0  ;;  %v5125_v17 = vpop.f32.mrf.mxu1 }
0x1c70   :  { %v5083_v55 = vadd.f32 %v5082_v54, %v4810_v44  ;;  %v5126_v34 = vadd.f32 %v5125_v17, %v4818_v2  ;;  %v5390_v27 = vmax.f32 %v5081_v13, 0.0  ;;  %v5392_v24 = vmax.f32 %v5124_v14, 0.0  ;;  %v7886_v54 = vld [vmem:[#allocation14 + $0x1a0] sm:$0xff] }
0x1c71   :  { %v5084_v6 = vpop.f32.mrf.mxu0  ;;  %v5127_v40 = vpop.f32.mrf.mxu1  ;;  %v7888_v17 = vld [vmem:[#allocation14 + $0x1e0] sm:$0xff] }
0x1c72   :  { %v5085_v20 = vadd.f32 %v5084_v6, %v4806_v51  ;;  %v5128_v5 = vadd.f32 %v5127_v40, %v4814_v52  ;;  %v5391_v62 = vmax.f32 %v5083_v55, 0.0  ;;  %v5393_v3 = vmax.f32 %v5126_v34, 0.0  ;;  %v5468_v34 = vld [vmem:[#allocation14 + $0x1e8] sm:$0xff] }
0x1c73   :  { %v5086_v50 = vpop.f32.mrf.mxu0  ;;  %v5129_v18 = vpop.f32.mrf.mxu1 }
0x1c74   :  { %v5087_v19 = vadd.f32 %v5086_v50, %v4810_v44  ;;  %v5130_v4 = vadd.f32 %v5129_v18, %v4818_v2  ;;  %v5406_v42 = vmax.f32 %v5085_v20, 0.0  ;;  %v5408_v59 = vmax.f32 %v5128_v5, 0.0  ;;  %v7878_v44 = vld [vmem:[#allocation13 + $0x18] sm:$0xff] }
0x1c75   :  { %v7858_v56 = vpop.f32.mrf.mxu0  ;;  %v7860_v57 = vpop.f32.mrf.mxu1  ;;  %v4842_v52 = vrot.slane %v7878_v44, %v7483_v7  ;;  %v4822_v20 = vrot.slane %v7848_v35, %v7525_v15  ;;  %v4830_v5 = vrot.slane %v7848_v35, %v7527_v16  ;;  %v4850_v7 = vrot.slane %v7878_v44, %v7485_v9 }
0x1c76   :  { %v5407_v31 = vmax.f32 %v5087_v19, 0.0  ;;  %v5409_v32 = vmax.f32 %v5130_v4, 0.0  ;;  %v5422_v11 = vpack.c.bf16 %v5406_v42, %v5390_v27  ;;  %v5424_v37 = vpack.c.bf16 %v5408_v59, %v5392_v24 }
0x1c77   :  { %v5168_v60 = vpop.f32.mrf.mxu0  ;;  %v5211_v30 = vpop.f32.mrf.mxu1  ;;  %v6302_v19 = vcombine.low %v7866_v23, %v7868_v29  ;;  %v6304_v4 = vcombine.low %v7870_v49, %v7872_v53  ;;  %v6323_v35 = vcombine.high %v7886_v54, %v7888_v17  ;;  %v5167_v9 = vadd.f32 %v7858_v56, %v4822_v20 }
0x1c78   :  { %v5423_v28 = vpack.c.bf16 %v5407_v31, %v5391_v62  ;;  %v5425_v33 = vpack.c.bf16 %v5409_v32, %v5393_v3  ;;  %v5169_v47 = vadd.f32 %v5168_v60, %v4826_v61  ;;  %v5212_v41 = vadd.f32 %v5211_v30, %v4834_v25 }
0x1c79   :  { %v5170_v8 = vpop.f32.mrf.mxu0  ;;  %v5213_v12 = vpop.f32.mrf.mxu1  ;;  %v5210_v31 = vadd.f32 %v7860_v57, %v4830_v5  ;;  %v5394_v57 = vmax.f32 %v5167_v9, 0.0 }
0x1c7a   :  { %5671 = vmatprep.mubr.bf16.mxu0 %v5423_v28  ;;  %5712 = vmatprep.mubr.bf16.mxu1 %v5425_v33  ;;  %v5395_v6 = vmax.f32 %v5169_v47, 0.0  ;;  %v5397_v40 = vmax.f32 %v5212_v41, 0.0  ;;  %v5171_v42 = vadd.f32 %v5170_v8, %v4822_v20  ;;  %v5214_v59 = vadd.f32 %v5213_v12, %v4830_v5  ;;  %v5451_v12 = vld [vmem:[#allocation14 + $0x160] sm:$0xff] }
0x1c7b   :  { %v5172_v26 = vpop.f32.mrf.mxu0  ;;  %v5215_v45 = vpop.f32.mrf.mxu1  ;;  %5672 = vmatmul.mubr.bf16.vlgmr.msra.gmra.mxu0 %v5422_v11  ;;  %5713 = vmatmul.mubr.bf16.vlgmr.msra.gmra.mxu1 %v5424_v37  ;;  %v5443_v11 = vld [vmem:[#allocation14 + $0x120] sm:$0xff]  ;;  %v5396_v37 = vmax.f32 %v5210_v31, 0.0  ;;  %v4838_v5 = vrot.slane %v7878_v44, %v7487_v10 }
0x1c7c   :  { %v5173_v43 = vadd.f32 %v5172_v26, %v4826_v61  ;;  %v5216_v39 = vadd.f32 %v5215_v45, %v4834_v25  ;;  %5734 = vmatpush1.bf16.xpose.msra.mxu0 %v6318_v36  ;;  %5775 = vmatpush1.bf16.xpose.msra.mxu1 %v6320_v38  ;;  %v5460_v38 = vld [vmem:[#allocation14 + $0x1a8] sm:$0xff]  ;;  %v5410_v27 = vmax.f32 %v5171_v42, 0.0  ;;  %v5412_v24 = vmax.f32 %v5214_v59, 0.0 }
0x1c7d   :  { %v7880_v2 = vpop.f32.mrf.mxu0  ;;  %v7882_v51 = vpop.f32.mrf.mxu1  ;;  %5735 = vmatprep.subr.bf16.mxu0 %v6303_v46  ;;  %5776 = vmatprep.subr.bf16.mxu1 %v6305_v1  ;;  %v6325_v62 = vcombine.high %v5460_v38, %v5468_v34  ;;  %v5444_v46 = vld [vmem:[#allocation14 + $0x128] sm:$0xff]  ;;  %v6322_v26 = vcombine.low %v7886_v54, %v7888_v17  ;;  %v5461_v54 = vld [vmem:[#allocation14 + $0x1b0] sm:$0xff] }
0x1c7e   :  { %v5411_v55 = vmax.f32 %v5173_v43, 0.0  ;;  %v5413_v36 = vmax.f32 %v5216_v39, 0.0  ;;  %v5452_v1 = vld [vmem:[#allocation14 + $0x168] sm:$0xff]  ;;  %v5426_v45 = vpack.c.bf16 %v5410_v27, %v5394_v57  ;;  %v5428_v43 = vpack.c.bf16 %v5412_v24, %v5396_v37  ;;  %v5469_v17 = vld [vmem:[#allocation14 + $0x1f0] sm:$0xff]  ;;  %v5454_v24 = vld [vmem:[#allocation14 + $0x178] sm:$0xff] }
0x1c7f   :  { %v5254_v13 = vpop.f32.mrf.mxu0  ;;  %v5297_v14 = vpop.f32.mrf.mxu1  ;;  %v6327_v42 = vcombine.high %v5461_v54, %v5469_v17  ;;  %v6326_v27 = vcombine.low %v5461_v54, %v5469_v17 }
0x1c80   :  { %v5427_v50 = vpack.c.bf16 %v5411_v55, %v5395_v6  ;;  %v5429_v18 = vpack.c.bf16 %v5413_v36, %v5397_v40  ;;  %v5255_v3 = vadd.f32 %v5254_v13, %v4842_v52  ;;  %v5298_v23 = vadd.f32 %v5297_v14, %v4850_v7 }
0x1c81   :  { %v5256_v61 = vpop.f32.mrf.mxu0  ;;  %v7900_v25 = vpop.f32.mrf.mxu1  ;;  %v6324_v6 = vcombine.low %v5460_v38, %v5468_v34  ;;  %v6307_v40 = vcombine.high %v5443_v11, %v5451_v12  ;;  %v6309_v55 = vcombine.high %v5444_v46, %v5452_v1  ;;  %v5462_v38 = vld [vmem:[#allocation14 + $0x1b8] sm:$0xff]  ;;  %v4846_v13 = vrot.slane %v7878_v44, %v7489_v48 }
0x1c82   :  { %5753 = vmatprep.mubr.bf16.mxu0 %v5427_v50  ;;  %5794 = vmatprep.mubr.bf16.mxu1 %v5429_v18  ;;  %v5399_v28 = vmax.f32 %v5255_v3, 0.0  ;;  %v5401_v8 = vmax.f32 %v5298_v23, 0.0  ;;  %v5470_v34 = vld [vmem:[#allocation14 + $0x1f8] sm:$0xff]  ;;  %v6306_v14 = vcombine.low %v5443_v11, %v5451_v12  ;;  %v5257_v50 = vadd.f32 %v5256_v61, %v4838_v5 }
0x1c83   :  { %v5258_v29 = vpop.f32.mrf.mxu0  ;;  %v5301_v32 = vpop.f32.mrf.mxu1  ;;  %v4858_v18 = vrot.slane %v7878_v44, %v7501_v21  ;;  %v5300_v59 = vadd.f32 %v7900_v25, %v4846_v13  ;;  %v6329_v10 = vcombine.high %v5462_v38, %v5470_v34  ;;  %v5296_v48 = vadd.f32 %v7882_v51, %v4846_v13 }
0x1c84   :  { %v5259_v49 = vadd.f32 %v5258_v29, %v4842_v52  ;;  %v5302_v53 = vadd.f32 %v5301_v32, %v4850_v7  ;;  %5736 = vmatpush1.bf16.xpose.msra.mxu0 %v6302_v19  ;;  %5777 = vmatpush1.bf16.xpose.msra.mxu1 %v6304_v4  ;;  %v6308_v4 = vcombine.low %v5444_v46, %v5452_v1  ;;  %v5414_v61 = vmax.f32 %v5257_v50, 0.0  ;;  %v5445_v32 = vld [vmem:[#allocation14 + $0x130] sm:$0xff] }
0x1c85   :  { %v7906_v60 = vpop.f32.mrf.mxu0  ;;  %v7908_v30 = vpop.f32.mrf.mxu1  ;;  %5815 = vmatprep.subr.bf16.mxu0 %v6323_v35  ;;  %5856 = vmatprep.subr.bf16.mxu1 %v6325_v62  ;;  %v4866_v35 = vrot.slane %v7878_v44, %v7503_v22  ;;  %v5253_v62 = vadd.f32 %v7880_v2, %v4838_v5  ;;  %v5416_v21 = vmax.f32 %v5300_v59, 0.0  ;;  %v5400_v22 = vmax.f32 %v5296_v48, 0.0  ;;  %v5446_v2 = vld [vmem:[#allocation14 + $0x138] sm:$0xff] }
0x1c86   :  { %v5415_v33 = vmax.f32 %v5259_v49, 0.0  ;;  %v5417_v56 = vmax.f32 %v5302_v53, 0.0  ;;  %v5453_v49 = vld [vmem:[#allocation14 + $0x170] sm:$0xff]  ;;  %v4854_v46 = vrot.slane %v7878_v44, %v7525_v15  ;;  %v4862_v1 = vrot.slane %v7878_v44, %v7527_v16 }
0x1c87   :  { %v5340_v41 = vpop.f32.mrf.mxu0  ;;  %v5383_v52 = vpop.f32.mrf.mxu1  ;;  %v5398_v29 = vmax.f32 %v5253_v62, 0.0  ;;  %v6311_v57 = vcombine.high %v5445_v32, %v5453_v49 }
0x1c88   :  { %v5431_v47 = vpack.c.bf16 %v5415_v33, %v5399_v28  ;;  %v5433_v39 = vpack.c.bf16 %v5417_v56, %v5401_v8  ;;  %v5341_v31 = vadd.f32 %v5340_v41, %v4858_v18  ;;  %v5384_v23 = vadd.f32 %v5383_v52, %v4866_v35 }
0x1c89   :  { %v7912_v36 = vpop.f32.mrf.mxu0  ;;  %v7914_v20 = vpop.f32.mrf.mxu1  ;;  %v5430_v28 = vpack.c.bf16 %v5414_v61, %v5398_v29  ;;  %v6328_v33 = vcombine.low %v5462_v38, %v5470_v34  ;;  %v5432_v56 = vpack.c.bf16 %v5416_v21, %v5400_v22  ;;  %v6313_v8 = vcombine.high %v5446_v2, %v5454_v24 }
0x1c8a   :  { %v5403_v51 = vmax.f32 %v5341_v31, 0.0  ;;  %v5405_v11 = vmax.f32 %v5384_v23, 0.0  ;;  %v5343_v41 = vadd.f32 %v7912_v36, %v4854_v46 }
0x1c8b   :  { %5754 = vmatmul.mubr.bf16.vlgmr.msra.gmra.mxu0 %v5426_v45  ;;  %5795 = vmatmul.mubr.bf16.vlgmr.msra.gmra.mxu1 %v5428_v43  ;;  %v5344_v7 = vpop.f32.mrf.mxu0  ;;  %v5387_v19 = vpop.f32.mrf.mxu1  ;;  %v5386_v45 = vadd.f32 %v7914_v20, %v4862_v1  ;;  %v5339_v43 = vadd.f32 %v7906_v60, %v4854_v46 }
0x1c8c   :  { %5816 = vmatpush1.bf16.xpose.msra.mxu0 %v6322_v26  ;;  %5835 = vmatprep.mubr.bf16.mxu0 %v5431_v47  ;;  %v5345_v3 = vadd.f32 %v5344_v7, %v4858_v18  ;;  %v5388_v9 = vadd.f32 %v5387_v19, %v4866_v35  ;;  %v6310_v47 = vcombine.low %v5445_v32, %v5453_v49  ;;  %v5418_v52 = vmax.f32 %v5343_v41, 0.0 }
0x1c8d   :  { %5857 = vmatpush1.bf16.xpose.msra.mxu1 %v6324_v6  ;;  %5876 = vmatprep.mubr.bf16.mxu1 %v5433_v39  ;;  %v6312_v26 = vcombine.low %v5446_v2, %v5454_v24  ;;  %v5382_v39 = vadd.f32 %v7908_v30, %v4862_v1  ;;  %v5420_v15 = vmax.f32 %v5386_v45, 0.0  ;;  %v5402_v6 = vmax.f32 %v5339_v43, 0.0 }
0x1c8e   :  { %5817 = vmatprep.subr.bf16.mxu0 %v6307_v40  ;;  %5858 = vmatprep.subr.bf16.mxu1 %v6309_v55  ;;  %v5419_v25 = vmax.f32 %v5345_v3, 0.0  ;;  %v5421_v53 = vmax.f32 %v5388_v9, 0.0 }
0x1c8f   :  { %v5404_v40 = vmax.f32 %v5382_v39, 0.0  ;;  %v5434_v55 = vpack.c.bf16 %v5418_v52, %v5402_v6 }
0x1c90   :  { %v5435_v37 = vpack.c.bf16 %v5419_v25, %v5403_v51  ;;  %v5437_v12 = vpack.c.bf16 %v5421_v53, %v5405_v11 }
0x1c91   :  { %v5436_v16 = vpack.c.bf16 %v5420_v15, %v5404_v40 }
0x1c94   :  { %5818 = vmatpush1.bf16.xpose.msra.mxu0 %v6306_v14 }
0x1c95   :  { %5859 = vmatpush1.bf16.xpose.msra.mxu1 %v6308_v4  ;;  %5897 = vmatprep.subr.bf16.mxu0 %v6327_v42  ;;  %v6297_v4 = vld [vmem:[#allocation16 + $0x1] ss:$0 sm:$0xff] }
0x1c96   :  { %5938 = vmatprep.subr.bf16.mxu1 %v6329_v10 }
0x1c9b   :  { %5836 = vmatmul.mubr.bf16.vlgmr.msra.gmra.mxu0 %v5430_v28 }
0x1c9c   :  { %5877 = vmatmul.mubr.bf16.vlgmr.msra.gmra.mxu1 %v5432_v56  ;;  %5898 = vmatpush1.bf16.xpose.msra.mxu0 %v6326_v27 }
0x1c9d   :  { %5917 = vmatprep.mubr.bf16.mxu0 %v5435_v37  ;;  %5939 = vmatpush1.bf16.xpose.msra.mxu1 %v6328_v33 }
0x1c9e   :  { %5958 = vmatprep.mubr.bf16.mxu1 %v5437_v12  ;;  %5899 = vmatprep.subr.bf16.mxu0 %v6311_v57 }
0x1c9f   :  { %5940 = vmatprep.subr.bf16.mxu1 %v6313_v8 }
0x1ca4   :  { %5900 = vmatpush1.bf16.xpose.msra.mxu0 %v6310_v47 }
0x1ca5   :  { %5941 = vmatpush1.bf16.xpose.msra.mxu1 %v6312_v26  ;;  %6649 = vmatprep.subr.bf16.mxu0 %v7073_v0 }
0x1cab   :  { %5918 = vmatmul.mubr.bf16.vlgmr.msra.gmra.mxu0 %v5434_v55 }
0x1cac   :  { %5959 = vmatmul.mubr.bf16.vlgmr.msra.gmra.mxu1 %v5436_v16  ;;  %6653 = vmatprep.mubr.msk.bf16.mxu0 %vm7074_vm0, %v7073_v0 }
0x1d3b   :  { %v5673_v44 = vpop.f32.mrf.mxu0  ;;  %v5714_v36 = vpop.f32.mrf.mxu1 }
0x1d3c   :  { %v5674_v42 = vadd.f32 %v6297_v4, %v5673_v44 }
0x1d3d   :  { %v5675_v60 = vpop.f32.mrf.mxu0  ;;  %v5716_v20 = vpop.f32.mrf.mxu1 }
0x1d3e   :  { %v5715_v62 = vadd.f32 %v5714_v36, %v5674_v42  ;;  %v6696_v36 = vld [vmem:[%s7973_s13] sm:$0xff]  }
0x1d3f   :  { %v5676_v30 = vpop.f32.mrf.mxu0  ;;  %v5717_v54 = vpop.f32.mrf.mxu1 }
0x1d40   :  { %v5677_v3 = vadd.f32 %v6297_v4, %v5676_v30 }
0x1d41   :  { %v5678_v17 = vpop.f32.mrf.mxu0  ;;  %v5719_v5 = vpop.f32.mrf.mxu1 }
0x1d42   :  { %v5718_v23 = vadd.f32 %v5717_v54, %v5677_v3 }
0x1d4b   :  { %v5755_v38 = vpop.f32.mrf.mxu0  ;;  %v5796_v34 = vpop.f32.mrf.mxu1 }
0x1d4c   :  { %v5756_v61 = vadd.f32 %v5755_v38, %v5715_v62 }
0x1d4d   :  { %v5757_v13 = vpop.f32.mrf.mxu0  ;;  %v5798_v7 = vpop.f32.mrf.mxu1 }
0x1d4e   :  { %v5797_v25 = vadd.f32 %v5796_v34, %v5756_v61  ;;  %v6330_v13 = vld [vmem:[#allocation17 + $0x1] ss:$0 sm:$0xff] }
0x1d4f   :  { %v5758_v14 = vpop.f32.mrf.mxu0  ;;  %v5799_v50 = vpop.f32.mrf.mxu1 }
0x1d50   :  { %v5759_v32 = vadd.f32 %v5758_v14, %v5718_v23 }
0x1d51   :  { %v5760_v18 = vpop.f32.mrf.mxu0  ;;  %v5801_v19 = vpop.f32.mrf.mxu1 }
0x1d52   :  { %v5800_v22 = vadd.f32 %v5799_v50, %v5759_v32 }
0x1d5b   :  { %v5837_v59 = vpop.f32.mrf.mxu0 }
0x1d5c   :  { %v5878_v35 = vpop.f32.mrf.mxu1  ;;  %v5838_v49 = vadd.f32 %v5837_v59, %v5797_v25  ;;  %v6332_v59 = vld [vmem:[#allocation20] ss:$0 sm:$0xff] }
0x1d5d   :  { %v5839_v10 = vpop.f32.mrf.mxu0 }
0x1d5e   :  { %v5880_v48 = vpop.f32.mrf.mxu1  ;;  %v5879_v53 = vadd.f32 %v5878_v35, %v5838_v49 }
0x1d5f   :  { %v5840_v9 = vpop.f32.mrf.mxu0 }
0x1d60   :  { %v5881_v31 = vpop.f32.mrf.mxu1  ;;  %v5841_v27 = vadd.f32 %v5840_v9, %v5800_v22 }
0x1d61   :  { %v5842_v21 = vpop.f32.mrf.mxu0 }
0x1d62   :  { %v5883_v29 = vpop.f32.mrf.mxu1  ;;  %v5882_v33 = vadd.f32 %v5881_v31, %v5841_v27 }
0x1d6b   :  { %v5919_v2 = vpop.f32.mrf.mxu0 }
0x1d6c   :  { %v5920_v24 = vadd.f32 %v5919_v2, %v5879_v53  ;;  %v5960_v28 = vpop.f32.mrf.mxu1 }
0x1d6d   :  { %v5921_v51 = vpop.f32.mrf.mxu0 }
0x1d6e   :  { %v5961_v56 = vadd.f32 %v5960_v28, %v5920_v24  ;;  %v5962_v11 = vpop.f32.mrf.mxu1 }
0x1d6f   :  { %v5922_v57 = vpop.f32.mrf.mxu0 }
0x1d70   :  { %v5923_v37 = vadd.f32 %v5922_v57, %v5882_v33  ;;  %v5963_v8 = vpop.f32.mrf.mxu1  ;;  %v5967_v12 = vadd.f32 %v5961_v56, %v7802_v58 }
0x1d71   :  { %v5924_v46 = vpop.f32.mrf.mxu0 }
0x1d72   :  { %v5964_v1 = vadd.f32 %v5963_v8, %v5923_v37  ;;  %v5965_v47 = vpop.f32.mrf.mxu1  ;;  %v5973_v41 = vsel %vm239_vm1, %v5967_v12, 0.0 }
0x1d73   :  { %5974 = vadd.xlane.f32.xlu0 %v5973_v41 }
0x1d74   :  { %v5968_v26 = vadd.f32 %v5964_v1, %v7804_v63  ;;  %v6695_v63 = vld [vmem:[%s7973_s13 + $0x8] sm:$0xff]   ;;  %s7086_s13 = smov [#allocation22]  }
0x1d75   :  { %6650 = vmatpush3.bf16.msra.mxu0 %v6695_v63  ;;  %s6092_s18 = sshll.u32 %s7086_s13, 4  ;;  %s6093_s18 = int_to_ptr.vmem [resolvable:$true] %s6092_s18 }
0x1d76   :  { %v5976_v45 = vsel %vm239_vm1, %v5968_v26, 0.0  ;;  %6651 = vmatprep.subr.bf16.mxu0 %v7073_v0  ;;  %v6331_v0 = vld [vmem:[#allocation19 + $0x1] ss:$0 sm:$0xff]  ;;  %s7017_s20 = scalar_lea.vmem %s6093_s18, 256  ;;  %p7022_p5 = scmp.lt.s32.totalorder %s6093_s18, %s6093_s18 }
0x1d77   :  { %5977 = vadd.xlane.f32.xlu1 %v5976_v45  ;;  %p7018_p4 = scmp.ne.s32.totalorder %s6093_s18, %s7017_s20  ;;  %p7023_p6 = scmp.lt.s32.totalorder %s7017_s20, %s7017_s20 }
0x1d79   :  { %6652 = vmatpush3.bf16.msra.mxu0 %v6696_v36  ;;  %p7024_p7 = por %p7023_p6, %p7022_p5 }
0x1d7b   :  { %p7025_p8 = pnand %p7024_p7, %p7018_p4 }
0x1dfc   :  { %v5975_v43 = vpop.xlane.xlu0 %5974 }
0x1dfd   :  { %v5979_v39 = vmul.f32 0.03125, %v5975_v43 }
0x1dff   :  { %v5981_v52 = vsub.f32 %v5967_v12, %v5979_v39 }
0x1e00   :  { %v5978_v15 = vpop.xlane.xlu1 %5977 }
0x1e01   :  { %v5980_v6 = vmul.f32 0.03125, %v5978_v15  ;;  %v5983_v40 = vmul.f32 %v5981_v52, %v5981_v52 }
0x1e03   :  { %v5982_v55 = vsub.f32 %v5968_v26, %v5980_v6  ;;  %v5985_v58 = vsel %vm239_vm1, %v5983_v40, 0.0 }
0x1e04   :  { %5986 = vadd.xlane.f32.xlu0 %v5985_v58 }
0x1e05   :  { %v5984_v16 = vmul.f32 %v5982_v55, %v5982_v55 }
0x1e07   :  { %v5988_v44 = vsel %vm239_vm1, %v5984_v16, 0.0 }
0x1e08   :  { %5989 = vadd.xlane.f32.xlu1 %v5988_v44 }
0x1e8d   :  { %v5987_v60 = vpop.xlane.xlu0 %5986 }
0x1e8e   :  { %v5991_v20 = vmul.f32 0.03125, %v5987_v60 }
0x1e90   :  { %v5993_v30 = vadd.f32 1e-05, %v5991_v20 }
0x1e91   :  { %v5990_v54 = vpop.xlane.xlu1 %5989 }
0x1e92   :  { %6773 = vrsqrt.f32 %v5993_v30  ;;  %v5992_v17 = vmul.f32 0.03125, %v5990_v54 }
0x1e94   :  { %v5994_v5 = vadd.f32 1e-05, %v5992_v17 }
0x1e96   :  { %6775 = vrsqrt.f32 %v5994_v5 }
0x1e9f   :  { %v6774_v38 = vpop.eup %6773 }
0x1ea0   :  { %v5997_v34 = vmul.f32 %v6774_v38, %v5981_v52 }
0x1ea2   :  { %v6005_v14 = vmul.f32 %v6330_v13, %v5997_v34 }
0x1ea3   :  { %v6776_v7 = vpop.eup %6775 }
0x1ea4   :  { %v5998_v50 = vmul.f32 %v6776_v7, %v5982_v55  ;;  %v6013_v19 = vadd.f32 %v6331_v0, %v6005_v14 }
0x1ea6   :  { %v6006_v18 = vmul.f32 %v6330_v13, %v5998_v50 }
0x1ea8   :  { %v6014_v4 = vadd.f32 %v6331_v0, %v6006_v18 }
0x1eaa   :  { %v6015_v42 = vpack.c.bf16 %v6014_v4, %v6013_v19 }
0x1eac   :  { %6654 = vmatmul.mubr.msk.bf16.vlgmr.msra.gmra.mxu0 %vm239_vm1, %v6015_v42 }
0x1f6c   :  { %v6076_v35 = vpop.f32.mrf.mxu0 }
0x1f6d   :  { %v6077_v10 = vadd.f32 %v6332_v59, %v6076_v35 }
0x1f6e   :  { %v6655_v62 = vpop.f32.mrf.mxu0 }
0x1f6f   :  { %v6083_v3 = vmax.f32 %v6077_v10, 0.0 }
0x1f70   :  { %v6079_v48 = vpop.f32.mrf.mxu0 }
0x1f71   :  { %6085 = vst.msk [vmem:[#allocation22] sm:$0xff] %vm239_vm1, %v6083_v3  ;;  %v6080_v9 = vadd.f32 %v6332_v59, %v6079_v48 }
0x1f72   :  { %v6656_v61 = vpop.f32.mrf.mxu0 }
0x1f73   :  { %v6084_v31 = vmax.f32 %v6080_v9, 0.0 }
0x1f75   :  { %6086 = vst.msk [vmem:[#allocation22 + $0x8] sm:$0xff] %vm239_vm1, %v6084_v31 }
0x1f76   :  { %7028 = shalt.err (!%p7025_p8)
}
0x1f77   :  { %6098 = dma.vmem_to_hbm [thread:$0]  %s6093_s18, 256, %s7975_s15, [#allocation4], %s7064_s19, %s7064_s19, %s7065_s23  }
0x1f78   :  { %7051 = dma.done.wait [#allocation4], 256  }
0x1f79   :  { %7052 = vsyncadd [#allocation4], 4294967040 }
0x1f7a   :  { %6102 = vsyncpa [#allocation3], 1 }
0x1f7b   :  { %6103 = vsyncpa [#allocation6], 1 }
0x1f7c   :  { %6104 = vsyncpa [#allocation9], 1 }
0x1f7d   :  { %6105 = vsyncpa [#allocation12], 1 }
0x1f7e   :  { %6106 = vsyncpa [#allocation15], 1 }
0x1f7f   :  { %6107 = vsyncpa [#allocation18], 1 }
0x1f80   :  { %6108 = vsyncpa [#allocation21], 1 }
0x1f81   :  { %6109 = vsyncpa [#allocation4], 1 }

</bundles_post_ra>
